<compile_context>
chip_gen: v5e
topology: v5e:2x2
jax: 0.10.0
libtpu: 0.0.40
codegen_flags: <defaults>
</compile_context>

<pallas_src>
import jax
import jax.numpy as jnp
from jax.experimental import pallas as pl
from jax.experimental.pallas import tpu as pltpu


def _round_up(x, m):
    return ((x + m - 1) // m) * m


def _pick_tm(m):
    # Big streaming tiles (memory-bound GEMMs); single tile for tiny M.
    return min(512, _round_up(max(m, 8), 8))


def _pick_tn(cp):
    return 256 if cp % 256 == 0 else 128


_VMEM_LIMIT = 32 * 1024 * 1024  # safe on v5e/v6e (128 MiB) and v7x (64 MiB)


# ----------------------------------------------------------------------------
# Pallas kernels
# ----------------------------------------------------------------------------
def _gemm_leaky_kernel(a_ref, b_ref, o_ref):
    # Single K step: clean streaming GEMM, LeakyReLU fused into the store.
    y = jnp.dot(a_ref[...], b_ref[...], preferred_element_type=jnp.float32)
    o_ref[...] = jnp.where(y > 0, y, 0.2 * y).astype(o_ref.dtype)


def pallas_gemm_leaky(a, b, *, tm, tn):
    """a: [Mp, K] bf16, b: [K, Cp] bf16 -> leaky_relu(a @ b) as bf16 [Mp, Cp]."""
    mp, k = a.shape
    _, cp = b.shape
    return pl.pallas_call(
        _gemm_leaky_kernel,
        out_shape=jax.ShapeDtypeStruct((mp, cp), jnp.bfloat16),
        grid_spec=pltpu.PrefetchScalarGridSpec(
            num_scalar_prefetch=0,
            grid=(mp // tm, cp // tn),
            in_specs=[
                pl.BlockSpec((tm, k), lambda i, j: (i, 0)),
                pl.BlockSpec((k, tn), lambda i, j: (0, j)),
            ],
            out_specs=pl.BlockSpec((tm, tn), lambda i, j: (i, j)),
        ),
        compiler_params=pltpu.CompilerParams(
            dimension_semantics=("parallel", "parallel"),
            vmem_limit_bytes=_VMEM_LIMIT,
        ),
    )(a, b)


def _gemm_stats_kernel(a_ref, b_ref, y_ref, sum_ref, ssq_ref):
    # Single K step GEMM; per-channel sum / sum-of-squares accumulated across
    # the M grid axis directly into resident (1, tn) output blocks.
    y = jnp.dot(a_ref[...], b_ref[...], preferred_element_type=jnp.float32)
    y_ref[...] = y.astype(y_ref.dtype)

    @pl.when(pl.program_id(1) == 0)
    def _():
        sum_ref[...] = jnp.zeros_like(sum_ref)
        ssq_ref[...] = jnp.zeros_like(ssq_ref)

    sum_ref[...] += jnp.sum(y, axis=0, keepdims=True)
    ssq_ref[...] += jnp.sum(y * y, axis=0, keepdims=True)


def pallas_gemm_stats(a, b, *, tm, tn):
    """Returns (y [Mp,Cp] f32, col_sum [1,Cp] f32, col_sumsq [1,Cp] f32)."""
    mp, k = a.shape
    _, cp = b.shape
    return pl.pallas_call(
        _gemm_stats_kernel,
        out_shape=(
            jax.ShapeDtypeStruct((mp, cp), jnp.float32),
            jax.ShapeDtypeStruct((1, cp), jnp.float32),
            jax.ShapeDtypeStruct((1, cp), jnp.float32),
        ),
        grid_spec=pltpu.PrefetchScalarGridSpec(
            num_scalar_prefetch=0,
            # N axis first (parallel), M axis last (reduction for the stats).
            grid=(cp // tn, mp // tm),
            in_specs=[
                pl.BlockSpec((tm, k), lambda j, i: (i, 0)),
                pl.BlockSpec((k, tn), lambda j, i: (0, j)),
            ],
            out_specs=(
                pl.BlockSpec((tm, tn), lambda j, i: (i, j)),
                pl.BlockSpec((1, tn), lambda j, i: (0, j)),
                pl.BlockSpec((1, tn), lambda j, i: (0, j)),
            ),
        ),
        compiler_params=pltpu.CompilerParams(
            dimension_semantics=("parallel", "arbitrary"),
            vmem_limit_bytes=_VMEM_LIMIT,
        ),
    )(a, b)


def _affine_leaky_kernel(y_ref, s_ref, t_ref, o_ref):
    v = y_ref[...] * s_ref[...] + t_ref[...]
    o_ref[...] = jnp.where(v > 0, v, 0.2 * v).astype(o_ref.dtype)


def pallas_affine_leaky(y, scale, shift, *, tm):
    """y: [Mp, Cp] f32; scale/shift: [1, Cp] f32 -> leaky(y*scale+shift) bf16."""
    mp, cp = y.shape
    return pl.pallas_call(
        _affine_leaky_kernel,
        out_shape=jax.ShapeDtypeStruct((mp, cp), jnp.bfloat16),
        grid=(mp // tm,),
        in_specs=[
            pl.BlockSpec((tm, cp), lambda i: (i, 0)),
            pl.BlockSpec((1, cp), lambda i: (0, 0)),
            pl.BlockSpec((1, cp), lambda i: (0, 0)),
        ],
        out_specs=pl.BlockSpec((tm, cp), lambda i: (i, 0)),
        compiler_params=pltpu.CompilerParams(
            dimension_semantics=("parallel",),
            vmem_limit_bytes=_VMEM_LIMIT,
        ),
    )(y, scale, shift)


# ----------------------------------------------------------------------------
# Glue: im2col + per-layer driver
# ----------------------------------------------------------------------------
def _im2col(x_nhwc, k, stride, pad):
    """x: [N,H,W,C] -> patches [N, OH, OW, k*k*C] ordered (kh, kw, c)."""
    n, h, w, c = x_nhwc.shape
    xp = jnp.pad(x_nhwc, ((0, 0), (pad, pad), (pad, pad), (0, 0)))
    oh = (h + 2 * pad - k) // stride + 1
    ow = (w + 2 * pad - k) // stride + 1
    cols = []
    for kh in range(k):
        for kw in range(k):
            cols.append(
                xp[:, kh:kh + stride * oh:stride, kw:kw + stride * ow:stride, :]
            )
    return jnp.concatenate(cols, axis=-1), oh, ow


def conv_block(x_nhwc, w_oihw, *, stride, pad, bn=None):
    """Conv2d(4x4, bias=False) [+ BatchNorm2d train-mode] + LeakyReLU(0.2).

    Returns the bf16 NHWC activation consumed by the next layer.
    """
    n = x_nhwc.shape[0]
    cin = x_nhwc.shape[3]
    cout, _, k, _ = w_oihw.shape

    # Pad input channels once to a multiple of 8 so K = k*k*Cin_p is a multiple
    # of 128 and the (16x-duplicated) patches tensor never needs a pad copy.
    cin_p = _round_up(cin, 8)
    x = x_nhwc.astype(jnp.bfloat16)
    if cin_p != cin:
        x = jnp.pad(x, ((0, 0), (0, 0), (0, 0), (0, cin_p - cin)))

    patches, oh, ow = _im2col(x, k, stride, pad)      # bf16, (kh, kw, c) order
    m = n * oh * ow
    kk = k * k * cin_p
    a = patches.reshape(m, kk)

    tm = _pick_tm(m)
    mp = _round_up(m, tm)
    if mp != m:
        a = jnp.pad(a, ((0, mp - m), (0, 0)))

    cp = _round_up(cout, 128)
    tn = _pick_tn(cp)
    # [Cout, Cin, KH, KW] -> [KH, KW, Cin_p, Cp] -> [K, Cp]  (matches patch order)
    wm = jnp.pad(
        w_oihw.transpose(2, 3, 1, 0),
        ((0, 0), (0, 0), (0, cin_p - cin), (0, cp - cout)),
    ).reshape(kk, cp).astype(jnp.bfloat16)

    if bn is None:
        out = pallas_gemm_leaky(a, wm, tm=tm, tn=tn)                 # bf16 [Mp, Cp]
    else:
        y, col_sum, col_ssq = pallas_gemm_stats(a, wm, tm=tm, tn=tn)  # f32
        gamma, beta = bn
        mean = col_sum[0, :cout] / m                         # batch stats (train mode)
        var = jnp.maximum(col_ssq[0, :cout] / m - mean * mean, 0.0)  # biased variance
        scale = gamma * jax.lax.rsqrt(var + 1e-5)
        shift = beta - mean * scale
        scale_p = jnp.pad(scale, (0, cp - cout)).reshape(1, cp)
        shift_p = jnp.pad(shift, (0, cp - cout)).reshape(1, cp)
        out = pallas_affine_leaky(y, scale_p, shift_p, tm=tm)        # bf16 [Mp, Cp]

    return out[:m, :cout].reshape(n, oh, ow, cout)


def final_conv(x_nhwc, w_oihw):
    """conv6: 4x4, stride 1, pad 0, no BN, no activation.

    M = batch (2), Cout = 1: a tiny GEMV -> plain jnp.dot (a Pallas launch here
    is pure overhead per the perf review)."""
    n = x_nhwc.shape[0]
    cin = x_nhwc.shape[3]
    cout, _, k, _ = w_oihw.shape
    patches, oh, ow = _im2col(x_nhwc.astype(jnp.bfloat16), k, 1, 0)
    a = patches.reshape(n * oh * ow, k * k * cin)
    wm = w_oihw.transpose(2, 3, 1, 0).reshape(k * k * cin, cout).astype(jnp.bfloat16)
    y = jnp.dot(a, wm, preferred_element_type=jnp.float32)
    return y.reshape(n, oh, ow, cout)


# ----------------------------------------------------------------------------
# DCDiscriminator forward
# ----------------------------------------------------------------------------
def init_params(key, ndf):
    chans = [3, ndf, ndf * 2, ndf * 4, ndf * 8, ndf * 16, 1]
    params = {"convs": [], "bns": []}
    keys = jax.random.split(key, len(chans) - 1)
    for i in range(len(chans) - 1):
        cin, cout = chans[i], chans[i + 1]
        w = 0.02 * jax.random.normal(keys[i], (cout, cin, 4, 4), jnp.float32)
        params["convs"].append(w)
    # BatchNorm affine params for layers 2..5 (gamma=1, beta=0, PyTorch default)
    for c in chans[2:6]:
        params["bns"].append(
            (jnp.ones((c,), jnp.float32), jnp.zeros((c,), jnp.float32))
        )
    return params


@jax.jit
def dc_discriminator_forward(params, x_nchw):
    x = jnp.transpose(x_nchw, (0, 2, 3, 1)).astype(jnp.float32)   # NCHW -> NHWC
    convs = params["convs"]
    bns = params["bns"]

    # conv1 + LeakyReLU (no BN) -- LeakyReLU fused into the GEMM epilogue.
    x = conv_block(x, convs[0], stride=2, pad=1, bn=None)
    # conv2..conv5 + BN (batch stats) + LeakyReLU.
    for i in range(1, 5):
        x = conv_block(x, convs[i], stride=2, pad=1, bn=bns[i - 1])
    # conv6: 4x4, stride 1, pad 0, no BN, no activation.
    x = final_conv(x, convs[5])

    return jnp.transpose(x, (0, 3, 1, 2)).astype(jnp.float32)     # NHWC -> NCHW


if __name__ == "__main__":
    # Spatial size must be 128 so the final 4x4/stride-1/pad-0 conv yields 1x1.
    # Small ndf keeps the synthetic test light.
    ndf = 8
    key = jax.random.PRNGKey(0)
    pkey, xkey = jax.random.split(key)
    params = init_params(pkey, ndf)
    x = jax.random.normal(xkey, (2, 3, 128, 128), jnp.float32)    # NCHW, like PyTorch

    out = dc_discriminator_forward(params, x)
    out = jax.block_until_ready(out)

    assert out.shape == (2, 1, 1, 1), out.shape
    assert bool(jnp.all(jnp.isfinite(out)))
    print("KERNEL_OK")
</pallas_src>

<mosaic_0001>
module attributes {stable_mosaic.version = 11 : i64} {
  func.func @_gemm_leaky_kernel(%arg0: i32, %arg1: i32, %arg2: memref<512x128xbf16, #tpu.memory_space<vmem>>, %arg3: memref<128x128xbf16, #tpu.memory_space<vmem>>, %arg4: memref<512x128xbf16, #tpu.memory_space<vmem>>) attributes {dimension_semantics = [#tpu.dimension_semantics<parallel>, #tpu.dimension_semantics<parallel>], iteration_bounds = array<i64: 16, 1>, scalar_prefetch = 0 : i64, scratch_operands = 0 : i64, tpu.core_type = #tpu.core_type<tc>, window_params = [{transform_indices = @transform_0, window_bounds = array<i64: 512, 128>}, {transform_indices = @transform_1, window_bounds = array<i64: 128, 128>}, {transform_indices = @transform_2, window_bounds = array<i64: 512, 128>}]} {
    %c0 = arith.constant 0 : index
    %c0_0 = arith.constant 0 : index
    %0 = vector.load %arg2[%c0, %c0_0] : memref<512x128xbf16, #tpu.memory_space<vmem>>, vector<512x128xbf16>
    %c0_1 = arith.constant 0 : index
    %c0_2 = arith.constant 0 : index
    %1 = vector.load %arg3[%c0_1, %c0_2] : memref<128x128xbf16, #tpu.memory_space<vmem>>, vector<128x128xbf16>
    %cst = arith.constant dense<0.000000e+00> : vector<512x128xf32>
    %2 = tpu.matmul %0, %1, %cst {dimension_numbers = #tpu.dot_dimension_numbers<[1], [0], [0], [1], [0, 0, 1, 1], [], []>} : vector<512x128xbf16>, vector<128x128xbf16>, vector<512x128xf32> -> vector<512x128xf32>
    %cst_3 = arith.constant 0.000000e+00 : f32
    %3 = vector.broadcast %cst_3 : f32 to vector<512x128xf32>
    %4 = arith.cmpf ogt, %2, %3 : vector<512x128xf32>
    %cst_4 = arith.constant 2.000000e-01 : f32
    %5 = vector.broadcast %cst_4 : f32 to vector<512x128xf32>
    %6 = arith.mulf %5, %2 : vector<512x128xf32>
    %7 = arith.select %4, %2, %6 : vector<512x128xi1>, vector<512x128xf32>
    %8 = arith.truncf %7 : vector<512x128xf32> to vector<512x128xbf16>
    %c0_5 = arith.constant 0 : index
    %c0_6 = arith.constant 0 : index
    %9 = vector.load %arg4[%c0_5, %c0_6] : memref<512x128xbf16, #tpu.memory_space<vmem>>, vector<512x128xbf16>
    tpu.vector_store %arg4[%c0_5, %c0_6], %8 {strides = array<i32>} : memref<512x128xbf16, #tpu.memory_space<vmem>>, vector<512x128xbf16>,
    return
  }
  func.func @transform_0(%arg0: i32, %arg1: i32) -> (i32, i32) {
    %c0_i32 = arith.constant 0 : i32
    %c0_i32_0 = arith.constant 0 : i32
    return %arg0, %c0_i32 : i32, i32
  }
  func.func @transform_1(%arg0: i32, %arg1: i32) -> (i32, i32) {
    %c0_i32 = arith.constant 0 : i32
    %c0_i32_0 = arith.constant 0 : i32
    return %c0_i32, %arg1 : i32, i32
  }
  func.func @transform_2(%arg0: i32, %arg1: i32) -> (i32, i32) {
    %c0_i32 = arith.constant 0 : i32
    return %arg0, %arg1 : i32, i32
  }
}

module attributes {stable_mosaic.version = 11 : i64} {
  func.func @_gemm_stats_kernel(%arg0: i32, %arg1: i32, %arg2: memref<512x128xbf16, #tpu.memory_space<vmem>>, %arg3: memref<128x128xbf16, #tpu.memory_space<vmem>>, %arg4: memref<512x128xf32, #tpu.memory_space<vmem>>, %arg5: memref<1x128xf32, #tpu.memory_space<vmem>>, %arg6: memref<1x128xf32, #tpu.memory_space<vmem>>) attributes {dimension_semantics = [#tpu.dimension_semantics<parallel>, #tpu.dimension_semantics<arbitrary>], iteration_bounds = array<i64: 1, 4>, scalar_prefetch = 0 : i64, scratch_operands = 0 : i64, tpu.core_type = #tpu.core_type<tc>, window_params = [{transform_indices = @transform_0, window_bounds = array<i64: 512, 128>}, {transform_indices = @transform_1, window_bounds = array<i64: 128, 128>}, {transform_indices = @transform_2, window_bounds = array<i64: 512, 128>}, {transform_indices = @transform_3, window_bounds = array<i64: 1, 128>}, {transform_indices = @transform_4, window_bounds = array<i64: 1, 128>}]} {
    %c0 = arith.constant 0 : index
    %c0_0 = arith.constant 0 : index
    %0 = vector.load %arg2[%c0, %c0_0] : memref<512x128xbf16, #tpu.memory_space<vmem>>, vector<512x128xbf16>
    %c0_1 = arith.constant 0 : index
    %c0_2 = arith.constant 0 : index
    %1 = vector.load %arg3[%c0_1, %c0_2] : memref<128x128xbf16, #tpu.memory_space<vmem>>, vector<128x128xbf16>
    %cst = arith.constant dense<0.000000e+00> : vector<512x128xf32>
    %2 = tpu.matmul %0, %1, %cst {dimension_numbers = #tpu.dot_dimension_numbers<[1], [0], [0], [1], [0, 0, 1, 1], [], []>} : vector<512x128xbf16>, vector<128x128xbf16>, vector<512x128xf32> -> vector<512x128xf32>
    %c0_3 = arith.constant 0 : index
    %c0_4 = arith.constant 0 : index
    %3 = vector.load %arg4[%c0_3, %c0_4] : memref<512x128xf32, #tpu.memory_space<vmem>>, vector<512x128xf32>
    tpu.vector_store %arg4[%c0_3, %c0_4], %2 {strides = array<i32>} : memref<512x128xf32, #tpu.memory_space<vmem>>, vector<512x128xf32>,
    %c0_i32 = arith.constant 0 : i32
    %4 = arith.cmpi eq, %arg1, %c0_i32 : i32
    %5 = arith.extui %4 : i1 to i32
    %c0_i32_5 = arith.constant 0 : i32
    %6 = arith.cmpi ne, %5, %c0_i32_5 : i32
    scf.if %6 {
      %cst_16 = arith.constant 0.000000e+00 : f32
      %18 = vector.broadcast %cst_16 : f32 to vector<1x128xf32>
      %c0_17 = arith.constant 0 : index
      %c0_18 = arith.constant 0 : index
      %19 = vector.load %arg5[%c0_17, %c0_18] : memref<1x128xf32, #tpu.memory_space<vmem>>, vector<1x128xf32>
      tpu.vector_store %arg5[%c0_17, %c0_18], %18 {strides = array<i32>} : memref<1x128xf32, #tpu.memory_space<vmem>>, vector<1x128xf32>,
      %cst_19 = arith.constant 0.000000e+00 : f32
      %20 = vector.broadcast %cst_19 : f32 to vector<1x128xf32>
      %c0_20 = arith.constant 0 : index
      %c0_21 = arith.constant 0 : index
      %21 = vector.load %arg6[%c0_20, %c0_21] : memref<1x128xf32, #tpu.memory_space<vmem>>, vector<1x128xf32>
      tpu.vector_store %arg6[%c0_20, %c0_21], %20 {strides = array<i32>} : memref<1x128xf32, #tpu.memory_space<vmem>>, vector<1x128xf32>,
    } else {
    }
    %c0_6 = arith.constant 0 : index
    %c0_7 = arith.constant 0 : index
    %7 = vector.load %arg5[%c0_6, %c0_7] : memref<1x128xf32, #tpu.memory_space<vmem>>, vector<1x128xf32>
    %cst_8 = arith.constant dense<0.000000e+00> : vector<128xf32>
    %8 = vector.multi_reduction <add>, %2, %cst_8 [0] : vector<512x128xf32> to vector<128xf32>
    %9 = vector.shape_cast %8 : vector<128xf32> to vector<1x128xf32>
    %10 = arith.addf %7, %9 : vector<1x128xf32>
    %c0_9 = arith.constant 0 : index
    %c0_10 = arith.constant 0 : index
    %11 = vector.load %arg5[%c0_9, %c0_10] : memref<1x128xf32, #tpu.memory_space<vmem>>, vector<1x128xf32>
    tpu.vector_store %arg5[%c0_9, %c0_10], %10 {strides = array<i32>} : memref<1x128xf32, #tpu.memory_space<vmem>>, vector<1x128xf32>,
    %c0_11 = arith.constant 0 : index
    %c0_12 = arith.constant 0 : index
    %12 = vector.load %arg6[%c0_11, %c0_12] : memref<1x128xf32, #tpu.memory_space<vmem>>, vector<1x128xf32>
    %13 = arith.mulf %2, %2 : vector<512x128xf32>
    %cst_13 = arith.constant dense<0.000000e+00> : vector<128xf32>
    %14 = vector.multi_reduction <add>, %13, %cst_13 [0] : vector<512x128xf32> to vector<128xf32>
    %15 = vector.shape_cast %14 : vector<128xf32> to vector<1x128xf32>
    %16 = arith.addf %12, %15 : vector<1x128xf32>
    %c0_14 = arith.constant 0 : index
    %c0_15 = arith.constant 0 : index
    %17 = vector.load %arg6[%c0_14, %c0_15] : memref<1x128xf32, #tpu.memory_space<vmem>>, vector<1x128xf32>
    tpu.vector_store %arg6[%c0_14, %c0_15], %16 {strides = array<i32>} : memref<1x128xf32, #tpu.memory_space<vmem>>, vector<1x128xf32>,
    return
  }
  func.func @transform_0(%arg0: i32, %arg1: i32) -> (i32, i32) {
    %c0_i32 = arith.constant 0 : i32
    %c0_i32_0 = arith.constant 0 : i32
    return %arg1, %c0_i32 : i32, i32
  }
  func.func @transform_1(%arg0: i32, %arg1: i32) -> (i32, i32) {
    %c0_i32 = arith.constant 0 : i32
    %c0_i32_0 = arith.constant 0 : i32
    return %c0_i32, %arg0 : i32, i32
  }
  func.func @transform_2(%arg0: i32, %arg1: i32) -> (i32, i32) {
    %c0_i32 = arith.constant 0 : i32
    return %arg1, %arg0 : i32, i32
  }
  func.func @transform_3(%arg0: i32, %arg1: i32) -> (i32, i32) {
    %c0_i32 = arith.constant 0 : i32
    %c0_i32_0 = arith.constant 0 : i32
    return %c0_i32, %arg0 : i32, i32
  }
  func.func @transform_4(%arg0: i32, %arg1: i32) -> (i32, i32) {
    %c0_i32 = arith.constant 0 : i32
    %c0_i32_0 = arith.constant 0 : i32
    return %c0_i32, %arg0 : i32, i32
  }
}

module attributes {stable_mosaic.version = 11 : i64} {
  func.func @_affine_leaky_kernel(%arg0: i32, %arg1: memref<512x128xf32, #tpu.memory_space<vmem>>, %arg2: memref<1x128xf32, #tpu.memory_space<vmem>>, %arg3: memref<1x128xf32, #tpu.memory_space<vmem>>, %arg4: memref<512x128xbf16, #tpu.memory_space<vmem>>) attributes {dimension_semantics = [#tpu.dimension_semantics<parallel>], iteration_bounds = array<i64: 4>, scalar_prefetch = 0 : i64, scratch_operands = 0 : i64, tpu.core_type = #tpu.core_type<tc>, window_params = [{transform_indices = @transform_0, window_bounds = array<i64: 512, 128>}, {pipeline_mode = #tpu.pipeline_mode<synchronous>, transform_indices = @transform_1, window_bounds = array<i64: 1, 128>}, {pipeline_mode = #tpu.pipeline_mode<synchronous>, transform_indices = @transform_2, window_bounds = array<i64: 1, 128>}, {transform_indices = @transform_3, window_bounds = array<i64: 512, 128>}]} {
    %c0 = arith.constant 0 : index
    %c0_0 = arith.constant 0 : index
    %0 = vector.load %arg1[%c0, %c0_0] : memref<512x128xf32, #tpu.memory_space<vmem>>, vector<512x128xf32>
    %c0_1 = arith.constant 0 : index
    %c0_2 = arith.constant 0 : index
    %1 = vector.load %arg2[%c0_1, %c0_2] : memref<1x128xf32, #tpu.memory_space<vmem>>, vector<1x128xf32>
    %2 = vector.broadcast %1 : vector<1x128xf32> to vector<512x128xf32>
    %3 = arith.mulf %0, %2 : vector<512x128xf32>
    %c0_3 = arith.constant 0 : index
    %c0_4 = arith.constant 0 : index
    %4 = vector.load %arg3[%c0_3, %c0_4] : memref<1x128xf32, #tpu.memory_space<vmem>>, vector<1x128xf32>
    %5 = vector.broadcast %4 : vector<1x128xf32> to vector<512x128xf32>
    %6 = arith.addf %3, %5 : vector<512x128xf32>
    %cst = arith.constant 0.000000e+00 : f32
    %7 = vector.broadcast %cst : f32 to vector<512x128xf32>
    %8 = arith.cmpf ogt, %6, %7 : vector<512x128xf32>
    %cst_5 = arith.constant 2.000000e-01 : f32
    %9 = vector.broadcast %cst_5 : f32 to vector<512x128xf32>
    %10 = arith.mulf %9, %6 : vector<512x128xf32>
    %11 = arith.select %8, %6, %10 : vector<512x128xi1>, vector<512x128xf32>
    %12 = arith.truncf %11 : vector<512x128xf32> to vector<512x128xbf16>
    %c0_6 = arith.constant 0 : index
    %c0_7 = arith.constant 0 : index
    %13 = vector.load %arg4[%c0_6, %c0_7] : memref<512x128xbf16, #tpu.memory_space<vmem>>, vector<512x128xbf16>
    tpu.vector_store %arg4[%c0_6, %c0_7], %12 {strides = array<i32>} : memref<512x128xbf16, #tpu.memory_space<vmem>>, vector<512x128xbf16>,
    return
  }
  func.func @transform_0(%arg0: i32) -> (i32, i32) {
    %c0_i32 = arith.constant 0 : i32
    %c0_i32_0 = arith.constant 0 : i32
    return %arg0, %c0_i32 : i32, i32
  }
  func.func @transform_1(%arg0: i32) -> (i32, i32) {
    %c0_i32 = arith.constant 0 : i32
    %c0_i32_0 = arith.constant 0 : i32
    %c0_i32_1 = arith.constant 0 : i32
    return %c0_i32, %c0_i32_0 : i32, i32
  }
  func.func @transform_2(%arg0: i32) -> (i32, i32) {
    %c0_i32 = arith.constant 0 : i32
    %c0_i32_0 = arith.constant 0 : i32
    %c0_i32_1 = arith.constant 0 : i32
    return %c0_i32, %c0_i32_0 : i32, i32
  }
  func.func @transform_3(%arg0: i32) -> (i32, i32) {
    %c0_i32 = arith.constant 0 : i32
    %c0_i32_0 = arith.constant 0 : i32
    return %arg0, %c0_i32 : i32, i32
  }
}

module attributes {stable_mosaic.version = 11 : i64} {
  func.func @_gemm_stats_kernel(%arg0: i32, %arg1: i32, %arg2: memref<512x256xbf16, #tpu.memory_space<vmem>>, %arg3: memref<256x128xbf16, #tpu.memory_space<vmem>>, %arg4: memref<512x128xf32, #tpu.memory_space<vmem>>, %arg5: memref<1x128xf32, #tpu.memory_space<vmem>>, %arg6: memref<1x128xf32, #tpu.memory_space<vmem>>) attributes {dimension_semantics = [#tpu.dimension_semantics<parallel>, #tpu.dimension_semantics<arbitrary>], iteration_bounds = array<i64: 1, 1>, scalar_prefetch = 0 : i64, scratch_operands = 0 : i64, tpu.core_type = #tpu.core_type<tc>, window_params = [{transform_indices = @transform_0, window_bounds = array<i64: 512, 256>}, {transform_indices = @transform_1, window_bounds = array<i64: 256, 128>}, {transform_indices = @transform_2, window_bounds = array<i64: 512, 128>}, {transform_indices = @transform_3, window_bounds = array<i64: 1, 128>}, {transform_indices = @transform_4, window_bounds = array<i64: 1, 128>}]} {
    %c0 = arith.constant 0 : index
    %c0_0 = arith.constant 0 : index
    %0 = vector.load %arg2[%c0, %c0_0] : memref<512x256xbf16, #tpu.memory_space<vmem>>, vector<512x256xbf16>
    %c0_1 = arith.constant 0 : index
    %c0_2 = arith.constant 0 : index
    %1 = vector.load %arg3[%c0_1, %c0_2] : memref<256x128xbf16, #tpu.memory_space<vmem>>, vector<256x128xbf16>
    %cst = arith.constant dense<0.000000e+00> : vector<512x128xf32>
    %2 = tpu.matmul %0, %1, %cst {dimension_numbers = #tpu.dot_dimension_numbers<[1], [0], [0], [1], [0, 0, 1, 1], [], []>} : vector<512x256xbf16>, vector<256x128xbf16>, vector<512x128xf32> -> vector<512x128xf32>
    %c0_3 = arith.constant 0 : index
    %c0_4 = arith.constant 0 : index
    %3 = vector.load %arg4[%c0_3, %c0_4] : memref<512x128xf32, #tpu.memory_space<vmem>>, vector<512x128xf32>
    tpu.vector_store %arg4[%c0_3, %c0_4], %2 {strides = array<i32>} : memref<512x128xf32, #tpu.memory_space<vmem>>, vector<512x128xf32>,
    %c0_i32 = arith.constant 0 : i32
    %4 = arith.cmpi eq, %arg1, %c0_i32 : i32
    %5 = arith.extui %4 : i1 to i32
    %c0_i32_5 = arith.constant 0 : i32
    %6 = arith.cmpi ne, %5, %c0_i32_5 : i32
    scf.if %6 {
      %cst_16 = arith.constant 0.000000e+00 : f32
      %18 = vector.broadcast %cst_16 : f32 to vector<1x128xf32>
      %c0_17 = arith.constant 0 : index
      %c0_18 = arith.constant 0 : index
      %19 = vector.load %arg5[%c0_17, %c0_18] : memref<1x128xf32, #tpu.memory_space<vmem>>, vector<1x128xf32>
      tpu.vector_store %arg5[%c0_17, %c0_18], %18 {strides = array<i32>} : memref<1x128xf32, #tpu.memory_space<vmem>>, vector<1x128xf32>,
      %cst_19 = arith.constant 0.000000e+00 : f32
      %20 = vector.broadcast %cst_19 : f32 to vector<1x128xf32>
      %c0_20 = arith.constant 0 : index
      %c0_21 = arith.constant 0 : index
      %21 = vector.load %arg6[%c0_20, %c0_21] : memref<1x128xf32, #tpu.memory_space<vmem>>, vector<1x128xf32>
      tpu.vector_store %arg6[%c0_20, %c0_21], %20 {strides = array<i32>} : memref<1x128xf32, #tpu.memory_space<vmem>>, vector<1x128xf32>,
    } else {
    }
    %c0_6 = arith.constant 0 : index
    %c0_7 = arith.constant 0 : index
    %7 = vector.load %arg5[%c0_6, %c0_7] : memref<1x128xf32, #tpu.memory_space<vmem>>, vector<1x128xf32>
    %cst_8 = arith.constant dense<0.000000e+00> : vector<128xf32>
    %8 = vector.multi_reduction <add>, %2, %cst_8 [0] : vector<512x128xf32> to vector<128xf32>
    %9 = vector.shape_cast %8 : vector<128xf32> to vector<1x128xf32>
    %10 = arith.addf %7, %9 : vector<1x128xf32>
    %c0_9 = arith.constant 0 : index
    %c0_10 = arith.constant 0 : index
    %11 = vector.load %arg5[%c0_9, %c0_10] : memref<1x128xf32, #tpu.memory_space<vmem>>, vector<1x128xf32>
    tpu.vector_store %arg5[%c0_9, %c0_10], %10 {strides = array<i32>} : memref<1x128xf32, #tpu.memory_space<vmem>>, vector<1x128xf32>,
    %c0_11 = arith.constant 0 : index
    %c0_12 = arith.constant 0 : index
    %12 = vector.load %arg6[%c0_11, %c0_12] : memref<1x128xf32, #tpu.memory_space<vmem>>, vector<1x128xf32>
    %13 = arith.mulf %2, %2 : vector<512x128xf32>
    %cst_13 = arith.constant dense<0.000000e+00> : vector<128xf32>
    %14 = vector.multi_reduction <add>, %13, %cst_13 [0] : vector<512x128xf32> to vector<128xf32>
    %15 = vector.shape_cast %14 : vector<128xf32> to vector<1x128xf32>
    %16 = arith.addf %12, %15 : vector<1x128xf32>
    %c0_14 = arith.constant 0 : index
    %c0_15 = arith.constant 0 : index
    %17 = vector.load %arg6[%c0_14, %c0_15] : memref<1x128xf32, #tpu.memory_space<vmem>>, vector<1x128xf32>
    tpu.vector_store %arg6[%c0_14, %c0_15], %16 {strides = array<i32>} : memref<1x128xf32, #tpu.memory_space<vmem>>, vector<1x128xf32>,
    return
  }
  func.func @transform_0(%arg0: i32, %arg1: i32) -> (i32, i32) {
    %c0_i32 = arith.constant 0 : i32
    %c0_i32_0 = arith.constant 0 : i32
    return %arg1, %c0_i32 : i32, i32
  }
  func.func @transform_1(%arg0: i32, %arg1: i32) -> (i32, i32) {
    %c0_i32 = arith.constant 0 : i32
    %c0_i32_0 = arith.constant 0 : i32
    return %c0_i32, %arg0 : i32, i32
  }
  func.func @transform_2(%arg0: i32, %arg1: i32) -> (i32, i32) {
    %c0_i32 = arith.constant 0 : i32
    return %arg1, %arg0 : i32, i32
  }
  func.func @transform_3(%arg0: i32, %arg1: i32) -> (i32, i32) {
    %c0_i32 = arith.constant 0 : i32
    %c0_i32_0 = arith.constant 0 : i32
    return %c0_i32, %arg0 : i32, i32
  }
  func.func @transform_4(%arg0: i32, %arg1: i32) -> (i32, i32) {
    %c0_i32 = arith.constant 0 : i32
    %c0_i32_0 = arith.constant 0 : i32
    return %c0_i32, %arg0 : i32, i32
  }
}

module attributes {stable_mosaic.version = 11 : i64} {
  func.func @_affine_leaky_kernel(%arg0: i32, %arg1: memref<512x128xf32, #tpu.memory_space<vmem>>, %arg2: memref<1x128xf32, #tpu.memory_space<vmem>>, %arg3: memref<1x128xf32, #tpu.memory_space<vmem>>, %arg4: memref<512x128xbf16, #tpu.memory_space<vmem>>) attributes {dimension_semantics = [#tpu.dimension_semantics<parallel>], iteration_bounds = array<i64: 1>, scalar_prefetch = 0 : i64, scratch_operands = 0 : i64, tpu.core_type = #tpu.core_type<tc>, window_params = [{transform_indices = @transform_0, window_bounds = array<i64: 512, 128>}, {pipeline_mode = #tpu.pipeline_mode<synchronous>, transform_indices = @transform_1, window_bounds = array<i64: 1, 128>}, {pipeline_mode = #tpu.pipeline_mode<synchronous>, transform_indices = @transform_2, window_bounds = array<i64: 1, 128>}, {transform_indices = @transform_3, window_bounds = array<i64: 512, 128>}]} {
    %c0 = arith.constant 0 : index
    %c0_0 = arith.constant 0 : index
    %0 = vector.load %arg1[%c0, %c0_0] : memref<512x128xf32, #tpu.memory_space<vmem>>, vector<512x128xf32>
    %c0_1 = arith.constant 0 : index
    %c0_2 = arith.constant 0 : index
    %1 = vector.load %arg2[%c0_1, %c0_2] : memref<1x128xf32, #tpu.memory_space<vmem>>, vector<1x128xf32>
    %2 = vector.broadcast %1 : vector<1x128xf32> to vector<512x128xf32>
    %3 = arith.mulf %0, %2 : vector<512x128xf32>
    %c0_3 = arith.constant 0 : index
    %c0_4 = arith.constant 0 : index
    %4 = vector.load %arg3[%c0_3, %c0_4] : memref<1x128xf32, #tpu.memory_space<vmem>>, vector<1x128xf32>
    %5 = vector.broadcast %4 : vector<1x128xf32> to vector<512x128xf32>
    %6 = arith.addf %3, %5 : vector<512x128xf32>
    %cst = arith.constant 0.000000e+00 : f32
    %7 = vector.broadcast %cst : f32 to vector<512x128xf32>
    %8 = arith.cmpf ogt, %6, %7 : vector<512x128xf32>
    %cst_5 = arith.constant 2.000000e-01 : f32
    %9 = vector.broadcast %cst_5 : f32 to vector<512x128xf32>
    %10 = arith.mulf %9, %6 : vector<512x128xf32>
    %11 = arith.select %8, %6, %10 : vector<512x128xi1>, vector<512x128xf32>
    %12 = arith.truncf %11 : vector<512x128xf32> to vector<512x128xbf16>
    %c0_6 = arith.constant 0 : index
    %c0_7 = arith.constant 0 : index
    %13 = vector.load %arg4[%c0_6, %c0_7] : memref<512x128xbf16, #tpu.memory_space<vmem>>, vector<512x128xbf16>
    tpu.vector_store %arg4[%c0_6, %c0_7], %12 {strides = array<i32>} : memref<512x128xbf16, #tpu.memory_space<vmem>>, vector<512x128xbf16>,
    return
  }
  func.func @transform_0(%arg0: i32) -> (i32, i32) {
    %c0_i32 = arith.constant 0 : i32
    %c0_i32_0 = arith.constant 0 : i32
    return %arg0, %c0_i32 : i32, i32
  }
  func.func @transform_1(%arg0: i32) -> (i32, i32) {
    %c0_i32 = arith.constant 0 : i32
    %c0_i32_0 = arith.constant 0 : i32
    %c0_i32_1 = arith.constant 0 : i32
    return %c0_i32, %c0_i32_0 : i32, i32
  }
  func.func @transform_2(%arg0: i32) -> (i32, i32) {
    %c0_i32 = arith.constant 0 : i32
    %c0_i32_0 = arith.constant 0 : i32
    %c0_i32_1 = arith.constant 0 : i32
    return %c0_i32, %c0_i32_0 : i32, i32
  }
  func.func @transform_3(%arg0: i32) -> (i32, i32) {
    %c0_i32 = arith.constant 0 : i32
    %c0_i32_0 = arith.constant 0 : i32
    return %arg0, %c0_i32 : i32, i32
  }
}

module attributes {stable_mosaic.version = 11 : i64} {
  func.func @_affine_leaky_kernel(%arg0: i32, %arg1: memref<128x128xf32, #tpu.memory_space<vmem>>, %arg2: memref<1x128xf32, #tpu.memory_space<vmem>>, %arg3: memref<1x128xf32, #tpu.memory_space<vmem>>, %arg4: memref<128x128xbf16, #tpu.memory_space<vmem>>) attributes {dimension_semantics = [#tpu.dimension_semantics<parallel>], iteration_bounds = array<i64: 1>, scalar_prefetch = 0 : i64, scratch_operands = 0 : i64, tpu.core_type = #tpu.core_type<tc>, window_params = [{transform_indices = @transform_0, window_bounds = array<i64: 128, 128>}, {pipeline_mode = #tpu.pipeline_mode<synchronous>, transform_indices = @transform_1, window_bounds = array<i64: 1, 128>}, {pipeline_mode = #tpu.pipeline_mode<synchronous>, transform_indices = @transform_2, window_bounds = array<i64: 1, 128>}, {transform_indices = @transform_3, window_bounds = array<i64: 128, 128>}]} {
    %c0 = arith.constant 0 : index
    %c0_0 = arith.constant 0 : index
    %0 = vector.load %arg1[%c0, %c0_0] : memref<128x128xf32, #tpu.memory_space<vmem>>, vector<128x128xf32>
    %c0_1 = arith.constant 0 : index
    %c0_2 = arith.constant 0 : index
    %1 = vector.load %arg2[%c0_1, %c0_2] : memref<1x128xf32, #tpu.memory_space<vmem>>, vector<1x128xf32>
    %2 = vector.broadcast %1 : vector<1x128xf32> to vector<128x128xf32>
    %3 = arith.mulf %0, %2 : vector<128x128xf32>
    %c0_3 = arith.constant 0 : index
    %c0_4 = arith.constant 0 : index
    %4 = vector.load %arg3[%c0_3, %c0_4] : memref<1x128xf32, #tpu.memory_space<vmem>>, vector<1x128xf32>
    %5 = vector.broadcast %4 : vector<1x128xf32> to vector<128x128xf32>
    %6 = arith.addf %3, %5 : vector<128x128xf32>
    %cst = arith.constant 0.000000e+00 : f32
    %7 = vector.broadcast %cst : f32 to vector<128x128xf32>
    %8 = arith.cmpf ogt, %6, %7 : vector<128x128xf32>
    %cst_5 = arith.constant 2.000000e-01 : f32
    %9 = vector.broadcast %cst_5 : f32 to vector<128x128xf32>
    %10 = arith.mulf %9, %6 : vector<128x128xf32>
    %11 = arith.select %8, %6, %10 : vector<128x128xi1>, vector<128x128xf32>
    %12 = arith.truncf %11 : vector<128x128xf32> to vector<128x128xbf16>
    %c0_6 = arith.constant 0 : index
    %c0_7 = arith.constant 0 : index
    %13 = vector.load %arg4[%c0_6, %c0_7] : memref<128x128xbf16, #tpu.memory_space<vmem>>, vector<128x128xbf16>
    tpu.vector_store %arg4[%c0_6, %c0_7], %12 {strides = array<i32>} : memref<128x128xbf16, #tpu.memory_space<vmem>>, vector<128x128xbf16>,
    return
  }
  func.func @transform_0(%arg0: i32) -> (i32, i32) {
    %c0_i32 = arith.constant 0 : i32
    %c0_i32_0 = arith.constant 0 : i32
    return %arg0, %c0_i32 : i32, i32
  }
  func.func @transform_1(%arg0: i32) -> (i32, i32) {
    %c0_i32 = arith.constant 0 : i32
    %c0_i32_0 = arith.constant 0 : i32
    %c0_i32_1 = arith.constant 0 : i32
    return %c0_i32, %c0_i32_0 : i32, i32
  }
  func.func @transform_2(%arg0: i32) -> (i32, i32) {
    %c0_i32 = arith.constant 0 : i32
    %c0_i32_0 = arith.constant 0 : i32
    %c0_i32_1 = arith.constant 0 : i32
    return %c0_i32, %c0_i32_0 : i32, i32
  }
  func.func @transform_3(%arg0: i32) -> (i32, i32) {
    %c0_i32 = arith.constant 0 : i32
    %c0_i32_0 = arith.constant 0 : i32
    return %arg0, %c0_i32 : i32, i32
  }
}

module attributes {stable_mosaic.version = 11 : i64} {
  func.func @_gemm_stats_kernel(%arg0: i32, %arg1: i32, %arg2: memref<128x512xbf16, #tpu.memory_space<vmem>>, %arg3: memref<512x128xbf16, #tpu.memory_space<vmem>>, %arg4: memref<128x128xf32, #tpu.memory_space<vmem>>, %arg5: memref<1x128xf32, #tpu.memory_space<vmem>>, %arg6: memref<1x128xf32, #tpu.memory_space<vmem>>) attributes {dimension_semantics = [#tpu.dimension_semantics<parallel>, #tpu.dimension_semantics<arbitrary>], iteration_bounds = array<i64: 1, 1>, scalar_prefetch = 0 : i64, scratch_operands = 0 : i64, tpu.core_type = #tpu.core_type<tc>, window_params = [{transform_indices = @transform_0, window_bounds = array<i64: 128, 512>}, {transform_indices = @transform_1, window_bounds = array<i64: 512, 128>}, {transform_indices = @transform_2, window_bounds = array<i64: 128, 128>}, {transform_indices = @transform_3, window_bounds = array<i64: 1, 128>}, {transform_indices = @transform_4, window_bounds = array<i64: 1, 128>}]} {
    %c0 = arith.constant 0 : index
    %c0_0 = arith.constant 0 : index
    %0 = vector.load %arg2[%c0, %c0_0] : memref<128x512xbf16, #tpu.memory_space<vmem>>, vector<128x512xbf16>
    %c0_1 = arith.constant 0 : index
    %c0_2 = arith.constant 0 : index
    %1 = vector.load %arg3[%c0_1, %c0_2] : memref<512x128xbf16, #tpu.memory_space<vmem>>, vector<512x128xbf16>
    %cst = arith.constant dense<0.000000e+00> : vector<128x128xf32>
    %2 = tpu.matmul %0, %1, %cst {dimension_numbers = #tpu.dot_dimension_numbers<[1], [0], [0], [1], [0, 0, 1, 1], [], []>} : vector<128x512xbf16>, vector<512x128xbf16>, vector<128x128xf32> -> vector<128x128xf32>
    %c0_3 = arith.constant 0 : index
    %c0_4 = arith.constant 0 : index
    %3 = vector.load %arg4[%c0_3, %c0_4] : memref<128x128xf32, #tpu.memory_space<vmem>>, vector<128x128xf32>
    tpu.vector_store %arg4[%c0_3, %c0_4], %2 {strides = array<i32>} : memref<128x128xf32, #tpu.memory_space<vmem>>, vector<128x128xf32>,
    %c0_i32 = arith.constant 0 : i32
    %4 = arith.cmpi eq, %arg1, %c0_i32 : i32
    %5 = arith.extui %4 : i1 to i32
    %c0_i32_5 = arith.constant 0 : i32
    %6 = arith.cmpi ne, %5, %c0_i32_5 : i32
    scf.if %6 {
      %cst_16 = arith.constant 0.000000e+00 : f32
      %18 = vector.broadcast %cst_16 : f32 to vector<1x128xf32>
      %c0_17 = arith.constant 0 : index
      %c0_18 = arith.constant 0 : index
      %19 = vector.load %arg5[%c0_17, %c0_18] : memref<1x128xf32, #tpu.memory_space<vmem>>, vector<1x128xf32>
      tpu.vector_store %arg5[%c0_17, %c0_18], %18 {strides = array<i32>} : memref<1x128xf32, #tpu.memory_space<vmem>>, vector<1x128xf32>,
      %cst_19 = arith.constant 0.000000e+00 : f32
      %20 = vector.broadcast %cst_19 : f32 to vector<1x128xf32>
      %c0_20 = arith.constant 0 : index
      %c0_21 = arith.constant 0 : index
      %21 = vector.load %arg6[%c0_20, %c0_21] : memref<1x128xf32, #tpu.memory_space<vmem>>, vector<1x128xf32>
      tpu.vector_store %arg6[%c0_20, %c0_21], %20 {strides = array<i32>} : memref<1x128xf32, #tpu.memory_space<vmem>>, vector<1x128xf32>,
    } else {
    }
    %c0_6 = arith.constant 0 : index
    %c0_7 = arith.constant 0 : index
    %7 = vector.load %arg5[%c0_6, %c0_7] : memref<1x128xf32, #tpu.memory_space<vmem>>, vector<1x128xf32>
    %cst_8 = arith.constant dense<0.000000e+00> : vector<128xf32>
    %8 = vector.multi_reduction <add>, %2, %cst_8 [0] : vector<128x128xf32> to vector<128xf32>
    %9 = vector.shape_cast %8 : vector<128xf32> to vector<1x128xf32>
    %10 = arith.addf %7, %9 : vector<1x128xf32>
    %c0_9 = arith.constant 0 : index
    %c0_10 = arith.constant 0 : index
    %11 = vector.load %arg5[%c0_9, %c0_10] : memref<1x128xf32, #tpu.memory_space<vmem>>, vector<1x128xf32>
    tpu.vector_store %arg5[%c0_9, %c0_10], %10 {strides = array<i32>} : memref<1x128xf32, #tpu.memory_space<vmem>>, vector<1x128xf32>,
    %c0_11 = arith.constant 0 : index
    %c0_12 = arith.constant 0 : index
    %12 = vector.load %arg6[%c0_11, %c0_12] : memref<1x128xf32, #tpu.memory_space<vmem>>, vector<1x128xf32>
    %13 = arith.mulf %2, %2 : vector<128x128xf32>
    %cst_13 = arith.constant dense<0.000000e+00> : vector<128xf32>
    %14 = vector.multi_reduction <add>, %13, %cst_13 [0] : vector<128x128xf32> to vector<128xf32>
    %15 = vector.shape_cast %14 : vector<128xf32> to vector<1x128xf32>
    %16 = arith.addf %12, %15 : vector<1x128xf32>
    %c0_14 = arith.constant 0 : index
    %c0_15 = arith.constant 0 : index
    %17 = vector.load %arg6[%c0_14, %c0_15] : memref<1x128xf32, #tpu.memory_space<vmem>>, vector<1x128xf32>
    tpu.vector_store %arg6[%c0_14, %c0_15], %16 {strides = array<i32>} : memref<1x128xf32, #tpu.memory_space<vmem>>, vector<1x128xf32>,
    return
  }
  func.func @transform_0(%arg0: i32, %arg1: i32) -> (i32, i32) {
    %c0_i32 = arith.constant 0 : i32
    %c0_i32_0 = arith.constant 0 : i32
    return %arg1, %c0_i32 : i32, i32
  }
  func.func @transform_1(%arg0: i32, %arg1: i32) -> (i32, i32) {
    %c0_i32 = arith.constant 0 : i32
    %c0_i32_0 = arith.constant 0 : i32
    return %c0_i32, %arg0 : i32, i32
  }
  func.func @transform_2(%arg0: i32, %arg1: i32) -> (i32, i32) {
    %c0_i32 = arith.constant 0 : i32
    return %arg1, %arg0 : i32, i32
  }
  func.func @transform_3(%arg0: i32, %arg1: i32) -> (i32, i32) {
    %c0_i32 = arith.constant 0 : i32
    %c0_i32_0 = arith.constant 0 : i32
    return %c0_i32, %arg0 : i32, i32
  }
  func.func @transform_4(%arg0: i32, %arg1: i32) -> (i32, i32) {
    %c0_i32 = arith.constant 0 : i32
    %c0_i32_0 = arith.constant 0 : i32
    return %c0_i32, %arg0 : i32, i32
  }
}

module attributes {stable_mosaic.version = 11 : i64} {
  func.func @_affine_leaky_kernel(%arg0: i32, %arg1: memref<32x128xf32, #tpu.memory_space<vmem>>, %arg2: memref<1x128xf32, #tpu.memory_space<vmem>>, %arg3: memref<1x128xf32, #tpu.memory_space<vmem>>, %arg4: memref<32x128xbf16, #tpu.memory_space<vmem>>) attributes {dimension_semantics = [#tpu.dimension_semantics<parallel>], iteration_bounds = array<i64: 1>, scalar_prefetch = 0 : i64, scratch_operands = 0 : i64, tpu.core_type = #tpu.core_type<tc>, window_params = [{transform_indices = @transform_0, window_bounds = array<i64: 32, 128>}, {pipeline_mode = #tpu.pipeline_mode<synchronous>, transform_indices = @transform_1, window_bounds = array<i64: 1, 128>}, {pipeline_mode = #tpu.pipeline_mode<synchronous>, transform_indices = @transform_2, window_bounds = array<i64: 1, 128>}, {transform_indices = @transform_3, window_bounds = array<i64: 32, 128>}]} {
    %c0 = arith.constant 0 : index
    %c0_0 = arith.constant 0 : index
    %0 = vector.load %arg1[%c0, %c0_0] : memref<32x128xf32, #tpu.memory_space<vmem>>, vector<32x128xf32>
    %c0_1 = arith.constant 0 : index
    %c0_2 = arith.constant 0 : index
    %1 = vector.load %arg2[%c0_1, %c0_2] : memref<1x128xf32, #tpu.memory_space<vmem>>, vector<1x128xf32>
    %2 = vector.broadcast %1 : vector<1x128xf32> to vector<32x128xf32>
    %3 = arith.mulf %0, %2 : vector<32x128xf32>
    %c0_3 = arith.constant 0 : index
    %c0_4 = arith.constant 0 : index
    %4 = vector.load %arg3[%c0_3, %c0_4] : memref<1x128xf32, #tpu.memory_space<vmem>>, vector<1x128xf32>
    %5 = vector.broadcast %4 : vector<1x128xf32> to vector<32x128xf32>
    %6 = arith.addf %3, %5 : vector<32x128xf32>
    %cst = arith.constant 0.000000e+00 : f32
    %7 = vector.broadcast %cst : f32 to vector<32x128xf32>
    %8 = arith.cmpf ogt, %6, %7 : vector<32x128xf32>
    %cst_5 = arith.constant 2.000000e-01 : f32
    %9 = vector.broadcast %cst_5 : f32 to vector<32x128xf32>
    %10 = arith.mulf %9, %6 : vector<32x128xf32>
    %11 = arith.select %8, %6, %10 : vector<32x128xi1>, vector<32x128xf32>
    %12 = arith.truncf %11 : vector<32x128xf32> to vector<32x128xbf16>
    %c0_6 = arith.constant 0 : index
    %c0_7 = arith.constant 0 : index
    %13 = vector.load %arg4[%c0_6, %c0_7] : memref<32x128xbf16, #tpu.memory_space<vmem>>, vector<32x128xbf16>
    tpu.vector_store %arg4[%c0_6, %c0_7], %12 {strides = array<i32>} : memref<32x128xbf16, #tpu.memory_space<vmem>>, vector<32x128xbf16>,
    return
  }
  func.func @transform_0(%arg0: i32) -> (i32, i32) {
    %c0_i32 = arith.constant 0 : i32
    %c0_i32_0 = arith.constant 0 : i32
    return %arg0, %c0_i32 : i32, i32
  }
  func.func @transform_1(%arg0: i32) -> (i32, i32) {
    %c0_i32 = arith.constant 0 : i32
    %c0_i32_0 = arith.constant 0 : i32
    %c0_i32_1 = arith.constant 0 : i32
    return %c0_i32, %c0_i32_0 : i32, i32
  }
  func.func @transform_2(%arg0: i32) -> (i32, i32) {
    %c0_i32 = arith.constant 0 : i32
    %c0_i32_0 = arith.constant 0 : i32
    %c0_i32_1 = arith.constant 0 : i32
    return %c0_i32, %c0_i32_0 : i32, i32
  }
  func.func @transform_3(%arg0: i32) -> (i32, i32) {
    %c0_i32 = arith.constant 0 : i32
    %c0_i32_0 = arith.constant 0 : i32
    return %arg0, %c0_i32 : i32, i32
  }
}

module attributes {stable_mosaic.version = 11 : i64} {
  func.func @_gemm_stats_kernel(%arg0: i32, %arg1: i32, %arg2: memref<32x1024xbf16, #tpu.memory_space<vmem>>, %arg3: memref<1024x128xbf16, #tpu.memory_space<vmem>>, %arg4: memref<32x128xf32, #tpu.memory_space<vmem>>, %arg5: memref<1x128xf32, #tpu.memory_space<vmem>>, %arg6: memref<1x128xf32, #tpu.memory_space<vmem>>) attributes {dimension_semantics = [#tpu.dimension_semantics<parallel>, #tpu.dimension_semantics<arbitrary>], iteration_bounds = array<i64: 1, 1>, scalar_prefetch = 0 : i64, scratch_operands = 0 : i64, tpu.core_type = #tpu.core_type<tc>, window_params = [{transform_indices = @transform_0, window_bounds = array<i64: 32, 1024>}, {transform_indices = @transform_1, window_bounds = array<i64: 1024, 128>}, {transform_indices = @transform_2, window_bounds = array<i64: 32, 128>}, {transform_indices = @transform_3, window_bounds = array<i64: 1, 128>}, {transform_indices = @transform_4, window_bounds = array<i64: 1, 128>}]} {
    %c0 = arith.constant 0 : index
    %c0_0 = arith.constant 0 : index
    %0 = vector.load %arg2[%c0, %c0_0] : memref<32x1024xbf16, #tpu.memory_space<vmem>>, vector<32x1024xbf16>
    %c0_1 = arith.constant 0 : index
    %c0_2 = arith.constant 0 : index
    %1 = vector.load %arg3[%c0_1, %c0_2] : memref<1024x128xbf16, #tpu.memory_space<vmem>>, vector<1024x128xbf16>
    %cst = arith.constant dense<0.000000e+00> : vector<32x128xf32>
    %2 = tpu.matmul %0, %1, %cst {dimension_numbers = #tpu.dot_dimension_numbers<[1], [0], [0], [1], [0, 0, 1, 1], [], []>} : vector<32x1024xbf16>, vector<1024x128xbf16>, vector<32x128xf32> -> vector<32x128xf32>
    %c0_3 = arith.constant 0 : index
    %c0_4 = arith.constant 0 : index
    %3 = vector.load %arg4[%c0_3, %c0_4] : memref<32x128xf32, #tpu.memory_space<vmem>>, vector<32x128xf32>
    tpu.vector_store %arg4[%c0_3, %c0_4], %2 {strides = array<i32>} : memref<32x128xf32, #tpu.memory_space<vmem>>, vector<32x128xf32>,
    %c0_i32 = arith.constant 0 : i32
    %4 = arith.cmpi eq, %arg1, %c0_i32 : i32
    %5 = arith.extui %4 : i1 to i32
    %c0_i32_5 = arith.constant 0 : i32
    %6 = arith.cmpi ne, %5, %c0_i32_5 : i32
    scf.if %6 {
      %cst_16 = arith.constant 0.000000e+00 : f32
      %18 = vector.broadcast %cst_16 : f32 to vector<1x128xf32>
      %c0_17 = arith.constant 0 : index
      %c0_18 = arith.constant 0 : index
      %19 = vector.load %arg5[%c0_17, %c0_18] : memref<1x128xf32, #tpu.memory_space<vmem>>, vector<1x128xf32>
      tpu.vector_store %arg5[%c0_17, %c0_18], %18 {strides = array<i32>} : memref<1x128xf32, #tpu.memory_space<vmem>>, vector<1x128xf32>,
      %cst_19 = arith.constant 0.000000e+00 : f32
      %20 = vector.broadcast %cst_19 : f32 to vector<1x128xf32>
      %c0_20 = arith.constant 0 : index
      %c0_21 = arith.constant 0 : index
      %21 = vector.load %arg6[%c0_20, %c0_21] : memref<1x128xf32, #tpu.memory_space<vmem>>, vector<1x128xf32>
      tpu.vector_store %arg6[%c0_20, %c0_21], %20 {strides = array<i32>} : memref<1x128xf32, #tpu.memory_space<vmem>>, vector<1x128xf32>,
    } else {
    }
    %c0_6 = arith.constant 0 : index
    %c0_7 = arith.constant 0 : index
    %7 = vector.load %arg5[%c0_6, %c0_7] : memref<1x128xf32, #tpu.memory_space<vmem>>, vector<1x128xf32>
    %cst_8 = arith.constant dense<0.000000e+00> : vector<128xf32>
    %8 = vector.multi_reduction <add>, %2, %cst_8 [0] : vector<32x128xf32> to vector<128xf32>
    %9 = vector.shape_cast %8 : vector<128xf32> to vector<1x128xf32>
    %10 = arith.addf %7, %9 : vector<1x128xf32>
    %c0_9 = arith.constant 0 : index
    %c0_10 = arith.constant 0 : index
    %11 = vector.load %arg5[%c0_9, %c0_10] : memref<1x128xf32, #tpu.memory_space<vmem>>, vector<1x128xf32>
    tpu.vector_store %arg5[%c0_9, %c0_10], %10 {strides = array<i32>} : memref<1x128xf32, #tpu.memory_space<vmem>>, vector<1x128xf32>,
    %c0_11 = arith.constant 0 : index
    %c0_12 = arith.constant 0 : index
    %12 = vector.load %arg6[%c0_11, %c0_12] : memref<1x128xf32, #tpu.memory_space<vmem>>, vector<1x128xf32>
    %13 = arith.mulf %2, %2 : vector<32x128xf32>
    %cst_13 = arith.constant dense<0.000000e+00> : vector<128xf32>
    %14 = vector.multi_reduction <add>, %13, %cst_13 [0] : vector<32x128xf32> to vector<128xf32>
    %15 = vector.shape_cast %14 : vector<128xf32> to vector<1x128xf32>
    %16 = arith.addf %12, %15 : vector<1x128xf32>
    %c0_14 = arith.constant 0 : index
    %c0_15 = arith.constant 0 : index
    %17 = vector.load %arg6[%c0_14, %c0_15] : memref<1x128xf32, #tpu.memory_space<vmem>>, vector<1x128xf32>
    tpu.vector_store %arg6[%c0_14, %c0_15], %16 {strides = array<i32>} : memref<1x128xf32, #tpu.memory_space<vmem>>, vector<1x128xf32>,
    return
  }
  func.func @transform_0(%arg0: i32, %arg1: i32) -> (i32, i32) {
    %c0_i32 = arith.constant 0 : i32
    %c0_i32_0 = arith.constant 0 : i32
    return %arg1, %c0_i32 : i32, i32
  }
  func.func @transform_1(%arg0: i32, %arg1: i32) -> (i32, i32) {
    %c0_i32 = arith.constant 0 : i32
    %c0_i32_0 = arith.constant 0 : i32
    return %c0_i32, %arg0 : i32, i32
  }
  func.func @transform_2(%arg0: i32, %arg1: i32) -> (i32, i32) {
    %c0_i32 = arith.constant 0 : i32
    return %arg1, %arg0 : i32, i32
  }
  func.func @transform_3(%arg0: i32, %arg1: i32) -> (i32, i32) {
    %c0_i32 = arith.constant 0 : i32
    %c0_i32_0 = arith.constant 0 : i32
    return %c0_i32, %arg0 : i32, i32
  }
  func.func @transform_4(%arg0: i32, %arg1: i32) -> (i32, i32) {
    %c0_i32 = arith.constant 0 : i32
    %c0_i32_0 = arith.constant 0 : i32
    return %c0_i32, %arg0 : i32, i32
  }
}

</mosaic_0001>

<bundles_post_ra>
// kernel: dc_discriminator_forward.9
= control target key start
LH: loop header
LB: loop body
LE: loop exit
PB: predicated region body
PF: predicated region fallthrough
CT: control target
= control target key end

     0   :  { %s1573_s9 = smov 0   ;;  %s1575_s10 = smov 0   ;;  %s1708_s0 = inlined_call_operand.vmem [shape: bf16[8192,128], index: 0, kind: input, shape index: {}]   ;;  %s1709_s1 = inlined_call_operand.vmem [shape: bf16[128,128], index: 1, kind: input, shape index: {}]   ;;  %s1710_s2 = inlined_call_operand.vmem [shape: bf16[8192,128], index: 2, kind: output, shape index: {}]  }
   0x1   :  { %s1577_s11 = smov 0  }
   0x2 LB: > { %s24_s12 = sadd.s32 1, %s1552_s10  ;;  %p1088_p0 = scmp.ge.s32.totalorder %s1556_s11, 1  ;;  %s1556_s11 = sphi %s1577_s11, %s12_s11   ;;  %s1552_s10 = sphi %s1575_s10, %s1712_s10   ;;  %s1548_s9 = sphi %s1573_s9, %s1711_s9  }
   0x3   : > { %p26_p1 = scmp.ge.s32.totalorder %s24_s12, 16  ;;  %p136_p2 = scmp.lt.s32.totalorder %s1556_s11, 17 }
   0x5   : > { %s1714_s12 = smov (%p26_p1, %s24_s12), 0  ;;  %p137_p3 = pnand %p1088_p0, %p136_p2 }
   0x6   : > { %s1089_s21 = sshll.u32 (!%p137_p3), %s1548_s9, 6 }
   0x7   : > { %140 = sbr.rel (%p137_p3) target bundleno = 304 (0x130), region = 28  ;;  %p166_p4 = scmp.lt.s32.totalorder (!%p137_p3), %s1089_s21, 1023 }
   0xc   : > { %v1294_v0 = vld [vmem:[%s1709_s1 + $0x38] sm:$0xff]  ;;  %v1293_v1 = vld [vmem:[%s1709_s1 + $0x30] sm:$0xff]  ;;  %v1292_v2 = vld [vmem:[%s1709_s1 + $0x28] sm:$0xff]  ;;  %s1716_s21 = smov (!%p166_p4, %s1089_s21), 1023 }
   0xd   : > { %504 = vmatpush.bf16.msra.mxu0 %v1294_v0  ;;  %1486 = vmatpush.bf16.msra.mxu1 %v1294_v0  ;;  %v1291_v3 = vld [vmem:[%s1709_s1 + $0x20] sm:$0xff]  ;;  %v1290_v4 = vld [vmem:[%s1709_s1 + $0x18] sm:$0xff]  ;;  %v1289_v5 = vld [vmem:[%s1709_s1 + $0x10] sm:$0xff]  ;;  %s1090_s28 = sshll.u32 %s1716_s21, 2 }
   0xe   : > { %1487 = vmatpush.bf16.msra.mxu2 %v1294_v0  ;;  %1488 = vmatpush.bf16.msra.mxu3 %v1294_v0  ;;  %v1288_v6 = vld [vmem:[%s1709_s1 + $0x8] sm:$0xff]  ;;  %v1287_v7 = vld [vmem:[%s1709_s1] sm:$0xff]  ;;  %s1626_s5 = scalar_lea.vmem %s1708_s0, %s1090_s28  ;;  %s1665_s8 = scalar_lea.vmem %s1710_s2, %s1090_s28 }
   0xf   : > { %v1255_v8 = vld [vmem:[%s1626_s5] sm:$0xff]  ;;  %v1256_v12 = vld [vmem:[%s1626_s5 + $0x8] sm:$0xff]  ;;  %v1257_v16 = vld [vmem:[%s1626_s5 + $0x10] sm:$0xff] }
  0x10   : > { %v1263_v9 = vld [vmem:[%s1626_s5 + $0x40] sm:$0xff]  ;;  %v1264_v13 = vld [vmem:[%s1626_s5 + $0x48] sm:$0xff]  ;;  %v1265_v17 = vld [vmem:[%s1626_s5 + $0x50] sm:$0xff] }
  0x11   : > { %505 = vmatpush.bf16.msra.mxu0 %v1293_v1  ;;  %1489 = vmatpush.bf16.msra.mxu1 %v1293_v1  ;;  %v1271_v10 = vld [vmem:[%s1626_s5 + $0x80] sm:$0xff]  ;;  %v1272_v14 = vld [vmem:[%s1626_s5 + $0x88] sm:$0xff]  ;;  %v1273_v18 = vld [vmem:[%s1626_s5 + $0x90] sm:$0xff] }
  0x12   : > { %1490 = vmatpush.bf16.msra.mxu2 %v1293_v1  ;;  %1491 = vmatpush.bf16.msra.mxu3 %v1293_v1  ;;  %v1279_v11 = vld [vmem:[%s1626_s5 + $0xc0] sm:$0xff]  ;;  %v1280_v15 = vld [vmem:[%s1626_s5 + $0xc8] sm:$0xff]  ;;  %v1281_v19 = vld [vmem:[%s1626_s5 + $0xd0] sm:$0xff] }
  0x13   : > { %v1258_v20 = vld [vmem:[%s1626_s5 + $0x18] sm:$0xff]  ;;  %v1259_v24 = vld [vmem:[%s1626_s5 + $0x20] sm:$0xff]  ;;  %v1260_v28 = vld [vmem:[%s1626_s5 + $0x28] sm:$0xff] }
  0x14   : > { %v1266_v21 = vld [vmem:[%s1626_s5 + $0x58] sm:$0xff]  ;;  %v1267_v25 = vld [vmem:[%s1626_s5 + $0x60] sm:$0xff]  ;;  %v1268_v29 = vld [vmem:[%s1626_s5 + $0x68] sm:$0xff] }
  0x15   : > { %506 = vmatpush.bf16.msra.mxu0 %v1292_v2  ;;  %1492 = vmatpush.bf16.msra.mxu1 %v1292_v2  ;;  %v1274_v22 = vld [vmem:[%s1626_s5 + $0x98] sm:$0xff]  ;;  %v1275_v26 = vld [vmem:[%s1626_s5 + $0xa0] sm:$0xff]  ;;  %v1276_v30 = vld [vmem:[%s1626_s5 + $0xa8] sm:$0xff] }
  0x16   : > { %1493 = vmatpush.bf16.msra.mxu2 %v1292_v2  ;;  %1494 = vmatpush.bf16.msra.mxu3 %v1292_v2  ;;  %v1282_v23 = vld [vmem:[%s1626_s5 + $0xd8] sm:$0xff]  ;;  %v1283_v27 = vld [vmem:[%s1626_s5 + $0xe0] sm:$0xff]  ;;  %v1284_v31 = vld [vmem:[%s1626_s5 + $0xe8] sm:$0xff] }
  0x17   : > { %v1261_v32 = vld [vmem:[%s1626_s5 + $0x30] sm:$0xff]  ;;  %v1262_v36 = vld [vmem:[%s1626_s5 + $0x38] sm:$0xff] }
  0x18   : > { %v1269_v33 = vld [vmem:[%s1626_s5 + $0x70] sm:$0xff]  ;;  %v1270_v37 = vld [vmem:[%s1626_s5 + $0x78] sm:$0xff] }
  0x19   : > { %507 = vmatpush.bf16.msra.mxu0 %v1291_v3  ;;  %1495 = vmatpush.bf16.msra.mxu1 %v1291_v3  ;;  %v1277_v34 = vld [vmem:[%s1626_s5 + $0xb0] sm:$0xff]  ;;  %v1278_v38 = vld [vmem:[%s1626_s5 + $0xb8] sm:$0xff] }
  0x1a   : > { %1496 = vmatpush.bf16.msra.mxu2 %v1291_v3  ;;  %1497 = vmatpush.bf16.msra.mxu3 %v1291_v3  ;;  %v1285_v35 = vld [vmem:[%s1626_s5 + $0xf0] sm:$0xff]  ;;  %v1286_v39 = vld [vmem:[%s1626_s5 + $0xf8] sm:$0xff] }
  0x1d   : > { %508 = vmatpush.bf16.msra.mxu0 %v1290_v4  ;;  %1498 = vmatpush.bf16.msra.mxu1 %v1290_v4 }
  0x1e   : > { %1499 = vmatpush.bf16.msra.mxu2 %v1290_v4  ;;  %1500 = vmatpush.bf16.msra.mxu3 %v1290_v4 }
  0x21   : > { %509 = vmatpush.bf16.msra.mxu0 %v1289_v5  ;;  %1501 = vmatpush.bf16.msra.mxu1 %v1289_v5 }
  0x22   : > { %1502 = vmatpush.bf16.msra.mxu2 %v1289_v5  ;;  %1503 = vmatpush.bf16.msra.mxu3 %v1289_v5 }
  0x25   : > { %510 = vmatpush.bf16.msra.mxu0 %v1288_v6  ;;  %1504 = vmatpush.bf16.msra.mxu1 %v1288_v6 }
  0x26   : > { %1505 = vmatpush.bf16.msra.mxu2 %v1288_v6  ;;  %1506 = vmatpush.bf16.msra.mxu3 %v1288_v6 }
  0x29   : > { %511 = vmatpush.bf16.msra.mxu0 %v1287_v7  ;;  %1507 = vmatpush.bf16.msra.mxu1 %v1287_v7 }
  0x2a   : > { %1508 = vmatpush.bf16.msra.mxu2 %v1287_v7  ;;  %1509 = vmatpush.bf16.msra.mxu3 %v1287_v7 }
  0x2c   : > { %512 = vmatmul.bf16.vlgmr.msra.gmra.mxu0 %v1255_v8  ;;  %552 = vmatmul.bf16.vlgmr.msra.gmra.mxu1 %v1263_v9 }
  0x2d   : > { %592 = vmatmul.bf16.vlgmr.msra.gmra.mxu2 %v1271_v10  ;;  %632 = vmatmul.bf16.vlgmr.msra.gmra.mxu3 %v1279_v11 }
  0x3c   : > { %517 = vmatmul.bf16.gmra.mxu0 %v1256_v12  ;;  %557 = vmatmul.bf16.gmra.mxu1 %v1264_v13 }
  0x3d   : > { %597 = vmatmul.bf16.gmra.mxu2 %v1272_v14  ;;  %637 = vmatmul.bf16.gmra.mxu3 %v1280_v15 }
  0x4c   : > { %522 = vmatmul.bf16.gmra.mxu0 %v1257_v16  ;;  %562 = vmatmul.bf16.gmra.mxu1 %v1265_v17 }
  0x4d   : > { %602 = vmatmul.bf16.gmra.mxu2 %v1273_v18  ;;  %642 = vmatmul.bf16.gmra.mxu3 %v1281_v19 }
  0x5c   : > { %527 = vmatmul.bf16.gmra.mxu0 %v1258_v20  ;;  %567 = vmatmul.bf16.gmra.mxu1 %v1266_v21 }
  0x5d   : > { %607 = vmatmul.bf16.gmra.mxu2 %v1274_v22  ;;  %647 = vmatmul.bf16.gmra.mxu3 %v1282_v23 }
  0x6c   : > { %532 = vmatmul.bf16.gmra.mxu0 %v1259_v24  ;;  %572 = vmatmul.bf16.gmra.mxu1 %v1267_v25 }
  0x6d   : > { %612 = vmatmul.bf16.gmra.mxu2 %v1275_v26  ;;  %652 = vmatmul.bf16.gmra.mxu3 %v1283_v27 }
  0x7c   : > { %537 = vmatmul.bf16.gmra.mxu0 %v1260_v28  ;;  %577 = vmatmul.bf16.gmra.mxu1 %v1268_v29 }
  0x7d   : > { %617 = vmatmul.bf16.gmra.mxu2 %v1276_v30  ;;  %657 = vmatmul.bf16.gmra.mxu3 %v1284_v31 }
  0x8c   : > { %542 = vmatmul.bf16.gmra.mxu0 %v1261_v32  ;;  %582 = vmatmul.bf16.gmra.mxu1 %v1269_v33 }
  0x8d   : > { %622 = vmatmul.bf16.gmra.mxu2 %v1277_v34  ;;  %662 = vmatmul.bf16.gmra.mxu3 %v1285_v35 }
  0x9c   : > { %547 = vmatmul.bf16.gmra.mxu0 %v1262_v36  ;;  %587 = vmatmul.bf16.gmra.mxu1 %v1270_v37 }
  0x9d   : > { %627 = vmatmul.bf16.gmra.mxu2 %v1278_v38  ;;  %667 = vmatmul.bf16.gmra.mxu3 %v1286_v39 }
  0xa9   : > { %v513_v40 = vpop.f32.mrf.mxu0  ;;  %v553_v41 = vpop.f32.mrf.mxu1 }
  0xaa   : > { %v737_v42 = vmul.f32 0.2, %v513_v40  ;;  %v753_v43 = vmul.f32 0.2, %v553_v41  ;;  %vm673_vm0 = vcmp.gt.f32.partialorder %v513_v40, 0.0  ;;  %vm689_vm1 = vcmp.gt.f32.partialorder %v553_v41, 0.0 }
  0xac   : > { %v801_v50 = vsel %vm673_vm0, %v513_v40, %v737_v42  ;;  %v817_v51 = vsel %vm689_vm1, %v553_v41, %v753_v43 }
  0xb0   : > { %v593_v44 = vpop.f32.mrf.mxu2  ;;  %v633_v45 = vpop.f32.mrf.mxu3 }
  0xb1   : > { %v515_v46 = vpop.f32.mrf.mxu0  ;;  %v555_v47 = vpop.f32.mrf.mxu1  ;;  %v769_v56 = vmul.f32 0.2, %v593_v44  ;;  %v785_v57 = vmul.f32 0.2, %v633_v45  ;;  %vm705_vm4 = vcmp.gt.f32.partialorder %v593_v44, 0.0  ;;  %vm721_vm5 = vcmp.gt.f32.partialorder %v633_v45, 0.0 }
  0xb2   : > { %vm674_vm2 = vcmp.gt.f32.partialorder %v515_v46, 0.0  ;;  %v738_v48 = vmul.f32 0.2, %v515_v46  ;;  %vm690_vm3 = vcmp.gt.f32.partialorder %v555_v47, 0.0  ;;  %v754_v49 = vmul.f32 0.2, %v555_v47 }
  0xb3   : > { %v833_v0 = vsel %vm705_vm4, %v593_v44, %v769_v56  ;;  %v849_v1 = vsel %vm721_vm5, %v633_v45, %v785_v57 }
  0xb4   : > { %v802_v52 = vsel %vm674_vm2, %v515_v46, %v738_v48  ;;  %v818_v53 = vsel %vm690_vm3, %v555_v47, %v754_v49 }
  0xb5   : > { %v1298_v54 = vpack.c.bf16 %v802_v52, %v801_v50  ;;  %v1338_v55 = vpack.c.bf16 %v818_v53, %v817_v51 }
  0xb7   : > { %1299 = vst [vmem:[%s1665_s8] sm:$0xff] %v1298_v54  }
  0xb8   : > { %1462 = vst [vmem:[%s1665_s8 + $0x40] sm:$0xff] %v1338_v55   ;;  %v595_v58 = vpop.f32.mrf.mxu2  ;;  %v635_v59 = vpop.f32.mrf.mxu3 }
  0xb9   : > { %vm706_vm6 = vcmp.gt.f32.partialorder %v595_v58, 0.0  ;;  %v770_v60 = vmul.f32 0.2, %v595_v58  ;;  %vm722_vm7 = vcmp.gt.f32.partialorder %v635_v59, 0.0  ;;  %v786_v61 = vmul.f32 0.2, %v635_v59  ;;  %v518_v62 = vpop.f32.mrf.mxu0  ;;  %v558_v63 = vpop.f32.mrf.mxu1 }
  0xba   : > { %v739_v6 = vmul.f32 0.2, %v518_v62  ;;  %v755_v7 = vmul.f32 0.2, %v558_v63  ;;  %vm675_vm8 = vcmp.gt.f32.partialorder %v518_v62, 0.0  ;;  %vm691_vm9 = vcmp.gt.f32.partialorder %v558_v63, 0.0 }
  0xbb   : > { %v834_v2 = vsel %vm706_vm6, %v595_v58, %v770_v60  ;;  %v850_v3 = vsel %vm722_vm7, %v635_v59, %v786_v61 }
  0xbc   : > { %v1378_v4 = vpack.c.bf16 %v834_v2, %v833_v0  ;;  %v1418_v5 = vpack.c.bf16 %v850_v3, %v849_v1  ;;  %v803_v14 = vsel %vm675_vm8, %v518_v62, %v739_v6  ;;  %v819_v15 = vsel %vm691_vm9, %v558_v63, %v755_v7 }
  0xbe   : > { %1470 = vst [vmem:[%s1665_s8 + $0x80] sm:$0xff] %v1378_v4  }
  0xbf   : > { %1478 = vst [vmem:[%s1665_s8 + $0xc0] sm:$0xff] %v1418_v5  }
  0xc0   : > { %v598_v8 = vpop.f32.mrf.mxu2  ;;  %v638_v9 = vpop.f32.mrf.mxu3 }
  0xc1   : > { %v520_v10 = vpop.f32.mrf.mxu0  ;;  %v560_v11 = vpop.f32.mrf.mxu1  ;;  %v771_v20 = vmul.f32 0.2, %v598_v8  ;;  %v787_v21 = vmul.f32 0.2, %v638_v9  ;;  %vm707_vm12 = vcmp.gt.f32.partialorder %v598_v8, 0.0  ;;  %vm723_vm13 = vcmp.gt.f32.partialorder %v638_v9, 0.0 }
  0xc2   : > { %vm676_vm10 = vcmp.gt.f32.partialorder %v520_v10, 0.0  ;;  %v740_v12 = vmul.f32 0.2, %v520_v10  ;;  %vm692_vm11 = vcmp.gt.f32.partialorder %v560_v11, 0.0  ;;  %v756_v13 = vmul.f32 0.2, %v560_v11 }
  0xc3   : > { %v835_v28 = vsel %vm707_vm12, %v598_v8, %v771_v20  ;;  %v851_v29 = vsel %vm723_vm13, %v638_v9, %v787_v21 }
  0xc4   : > { %v804_v16 = vsel %vm676_vm10, %v520_v10, %v740_v12  ;;  %v820_v17 = vsel %vm692_vm11, %v560_v11, %v756_v13 }
  0xc5   : > { %v1303_v18 = vpack.c.bf16 %v804_v16, %v803_v14  ;;  %v1343_v19 = vpack.c.bf16 %v820_v17, %v819_v15 }
  0xc7   : > { %1455 = vst [vmem:[%s1665_s8 + $0x8] sm:$0xff] %v1303_v18  }
  0xc8   : > { %1463 = vst [vmem:[%s1665_s8 + $0x48] sm:$0xff] %v1343_v19   ;;  %v600_v22 = vpop.f32.mrf.mxu2  ;;  %v640_v23 = vpop.f32.mrf.mxu3 }
  0xc9   : > { %vm708_vm14 = vcmp.gt.f32.partialorder %v600_v22, 0.0  ;;  %v772_v24 = vmul.f32 0.2, %v600_v22  ;;  %vm724_vm15 = vcmp.gt.f32.partialorder %v640_v23, 0.0  ;;  %v788_v25 = vmul.f32 0.2, %v640_v23  ;;  %v523_v26 = vpop.f32.mrf.mxu0  ;;  %v563_v27 = vpop.f32.mrf.mxu1 }
  0xca   : > { %v741_v34 = vmul.f32 0.2, %v523_v26  ;;  %v757_v35 = vmul.f32 0.2, %v563_v27  ;;  %vm677_vm0 = vcmp.gt.f32.partialorder %v523_v26, 0.0  ;;  %vm693_vm1 = vcmp.gt.f32.partialorder %v563_v27, 0.0 }
  0xcb   : > { %v836_v30 = vsel %vm708_vm14, %v600_v22, %v772_v24  ;;  %v852_v31 = vsel %vm724_vm15, %v640_v23, %v788_v25 }
  0xcc   : > { %v1383_v32 = vpack.c.bf16 %v836_v30, %v835_v28  ;;  %v1423_v33 = vpack.c.bf16 %v852_v31, %v851_v29  ;;  %v805_v42 = vsel %vm677_vm0, %v523_v26, %v741_v34  ;;  %v821_v43 = vsel %vm693_vm1, %v563_v27, %v757_v35 }
  0xce   : > { %1471 = vst [vmem:[%s1665_s8 + $0x88] sm:$0xff] %v1383_v32  }
  0xcf   : > { %1479 = vst [vmem:[%s1665_s8 + $0xc8] sm:$0xff] %v1423_v33  }
  0xd0   : > { %v603_v36 = vpop.f32.mrf.mxu2  ;;  %v643_v37 = vpop.f32.mrf.mxu3 }
  0xd1   : > { %v525_v38 = vpop.f32.mrf.mxu0  ;;  %v565_v39 = vpop.f32.mrf.mxu1  ;;  %v773_v48 = vmul.f32 0.2, %v603_v36  ;;  %v789_v49 = vmul.f32 0.2, %v643_v37  ;;  %vm709_vm4 = vcmp.gt.f32.partialorder %v603_v36, 0.0  ;;  %vm725_vm5 = vcmp.gt.f32.partialorder %v643_v37, 0.0 }
  0xd2   : > { %vm678_vm2 = vcmp.gt.f32.partialorder %v525_v38, 0.0  ;;  %v742_v40 = vmul.f32 0.2, %v525_v38  ;;  %vm694_vm3 = vcmp.gt.f32.partialorder %v565_v39, 0.0  ;;  %v758_v41 = vmul.f32 0.2, %v565_v39 }
  0xd3   : > { %v837_v56 = vsel %vm709_vm4, %v603_v36, %v773_v48  ;;  %v853_v57 = vsel %vm725_vm5, %v643_v37, %v789_v49 }
  0xd4   : > { %v806_v44 = vsel %vm678_vm2, %v525_v38, %v742_v40  ;;  %v822_v45 = vsel %vm694_vm3, %v565_v39, %v758_v41 }
  0xd5   : > { %v1308_v46 = vpack.c.bf16 %v806_v44, %v805_v42  ;;  %v1348_v47 = vpack.c.bf16 %v822_v45, %v821_v43 }
  0xd7   : > { %1456 = vst [vmem:[%s1665_s8 + $0x10] sm:$0xff] %v1308_v46  }
  0xd8   : > { %1464 = vst [vmem:[%s1665_s8 + $0x50] sm:$0xff] %v1348_v47   ;;  %v605_v50 = vpop.f32.mrf.mxu2  ;;  %v645_v51 = vpop.f32.mrf.mxu3 }
  0xd9   : > { %vm710_vm6 = vcmp.gt.f32.partialorder %v605_v50, 0.0  ;;  %v774_v52 = vmul.f32 0.2, %v605_v50  ;;  %vm726_vm7 = vcmp.gt.f32.partialorder %v645_v51, 0.0  ;;  %v790_v53 = vmul.f32 0.2, %v645_v51  ;;  %v528_v54 = vpop.f32.mrf.mxu0  ;;  %v568_v55 = vpop.f32.mrf.mxu1 }
  0xda   : > { %v743_v62 = vmul.f32 0.2, %v528_v54  ;;  %v759_v63 = vmul.f32 0.2, %v568_v55  ;;  %vm679_vm8 = vcmp.gt.f32.partialorder %v528_v54, 0.0  ;;  %vm695_vm9 = vcmp.gt.f32.partialorder %v568_v55, 0.0 }
  0xdb   : > { %v838_v58 = vsel %vm710_vm6, %v605_v50, %v774_v52  ;;  %v854_v59 = vsel %vm726_vm7, %v645_v51, %v790_v53 }
  0xdc   : > { %v1388_v60 = vpack.c.bf16 %v838_v58, %v837_v56  ;;  %v1428_v61 = vpack.c.bf16 %v854_v59, %v853_v57  ;;  %v807_v6 = vsel %vm679_vm8, %v528_v54, %v743_v62  ;;  %v823_v7 = vsel %vm695_vm9, %v568_v55, %v759_v63 }
  0xde   : > { %1472 = vst [vmem:[%s1665_s8 + $0x90] sm:$0xff] %v1388_v60  }
  0xdf   : > { %1480 = vst [vmem:[%s1665_s8 + $0xd0] sm:$0xff] %v1428_v61  }
  0xe0   : > { %v608_v0 = vpop.f32.mrf.mxu2  ;;  %v648_v1 = vpop.f32.mrf.mxu3 }
  0xe1   : > { %v530_v2 = vpop.f32.mrf.mxu0  ;;  %v570_v3 = vpop.f32.mrf.mxu1  ;;  %v775_v12 = vmul.f32 0.2, %v608_v0  ;;  %v791_v13 = vmul.f32 0.2, %v648_v1  ;;  %vm711_vm12 = vcmp.gt.f32.partialorder %v608_v0, 0.0  ;;  %vm727_vm13 = vcmp.gt.f32.partialorder %v648_v1, 0.0 }
  0xe2   : > { %vm680_vm10 = vcmp.gt.f32.partialorder %v530_v2, 0.0  ;;  %v744_v4 = vmul.f32 0.2, %v530_v2  ;;  %vm696_vm11 = vcmp.gt.f32.partialorder %v570_v3, 0.0  ;;  %v760_v5 = vmul.f32 0.2, %v570_v3 }
  0xe3   : > { %v839_v20 = vsel %vm711_vm12, %v608_v0, %v775_v12  ;;  %v855_v21 = vsel %vm727_vm13, %v648_v1, %v791_v13 }
  0xe4   : > { %v808_v8 = vsel %vm680_vm10, %v530_v2, %v744_v4  ;;  %v824_v9 = vsel %vm696_vm11, %v570_v3, %v760_v5 }
  0xe5   : > { %v1313_v10 = vpack.c.bf16 %v808_v8, %v807_v6  ;;  %v1353_v11 = vpack.c.bf16 %v824_v9, %v823_v7 }
  0xe7   : > { %1457 = vst [vmem:[%s1665_s8 + $0x18] sm:$0xff] %v1313_v10  }
  0xe8   : > { %1465 = vst [vmem:[%s1665_s8 + $0x58] sm:$0xff] %v1353_v11   ;;  %v610_v14 = vpop.f32.mrf.mxu2  ;;  %v650_v15 = vpop.f32.mrf.mxu3 }
  0xe9   : > { %vm712_vm14 = vcmp.gt.f32.partialorder %v610_v14, 0.0  ;;  %v776_v16 = vmul.f32 0.2, %v610_v14  ;;  %vm728_vm15 = vcmp.gt.f32.partialorder %v650_v15, 0.0  ;;  %v792_v17 = vmul.f32 0.2, %v650_v15  ;;  %v533_v18 = vpop.f32.mrf.mxu0  ;;  %v573_v19 = vpop.f32.mrf.mxu1 }
  0xea   : > { %v745_v26 = vmul.f32 0.2, %v533_v18  ;;  %v761_v27 = vmul.f32 0.2, %v573_v19  ;;  %vm681_vm0 = vcmp.gt.f32.partialorder %v533_v18, 0.0  ;;  %vm697_vm1 = vcmp.gt.f32.partialorder %v573_v19, 0.0 }
  0xeb   : > { %v840_v22 = vsel %vm712_vm14, %v610_v14, %v776_v16  ;;  %v856_v23 = vsel %vm728_vm15, %v650_v15, %v792_v17 }
  0xec   : > { %v1393_v24 = vpack.c.bf16 %v840_v22, %v839_v20  ;;  %v1433_v25 = vpack.c.bf16 %v856_v23, %v855_v21  ;;  %v809_v34 = vsel %vm681_vm0, %v533_v18, %v745_v26  ;;  %v825_v35 = vsel %vm697_vm1, %v573_v19, %v761_v27 }
  0xee   : > { %1473 = vst [vmem:[%s1665_s8 + $0x98] sm:$0xff] %v1393_v24  }
  0xef   : > { %1481 = vst [vmem:[%s1665_s8 + $0xd8] sm:$0xff] %v1433_v25  }
  0xf0   : > { %v613_v28 = vpop.f32.mrf.mxu2  ;;  %v653_v29 = vpop.f32.mrf.mxu3 }
  0xf1   : > { %v535_v30 = vpop.f32.mrf.mxu0  ;;  %v575_v31 = vpop.f32.mrf.mxu1  ;;  %v777_v40 = vmul.f32 0.2, %v613_v28  ;;  %v793_v41 = vmul.f32 0.2, %v653_v29  ;;  %vm713_vm4 = vcmp.gt.f32.partialorder %v613_v28, 0.0  ;;  %vm729_vm5 = vcmp.gt.f32.partialorder %v653_v29, 0.0 }
  0xf2   : > { %vm682_vm2 = vcmp.gt.f32.partialorder %v535_v30, 0.0  ;;  %v746_v32 = vmul.f32 0.2, %v535_v30  ;;  %vm698_vm3 = vcmp.gt.f32.partialorder %v575_v31, 0.0  ;;  %v762_v33 = vmul.f32 0.2, %v575_v31 }
  0xf3   : > { %v841_v48 = vsel %vm713_vm4, %v613_v28, %v777_v40  ;;  %v857_v49 = vsel %vm729_vm5, %v653_v29, %v793_v41 }
  0xf4   : > { %v810_v36 = vsel %vm682_vm2, %v535_v30, %v746_v32  ;;  %v826_v37 = vsel %vm698_vm3, %v575_v31, %v762_v33 }
  0xf5   : > { %v1318_v38 = vpack.c.bf16 %v810_v36, %v809_v34  ;;  %v1358_v39 = vpack.c.bf16 %v826_v37, %v825_v35 }
  0xf7   : > { %1458 = vst [vmem:[%s1665_s8 + $0x20] sm:$0xff] %v1318_v38  }
  0xf8   : > { %1466 = vst [vmem:[%s1665_s8 + $0x60] sm:$0xff] %v1358_v39   ;;  %v615_v42 = vpop.f32.mrf.mxu2  ;;  %v655_v43 = vpop.f32.mrf.mxu3 }
  0xf9   : > { %vm714_vm6 = vcmp.gt.f32.partialorder %v615_v42, 0.0  ;;  %v778_v44 = vmul.f32 0.2, %v615_v42  ;;  %vm730_vm7 = vcmp.gt.f32.partialorder %v655_v43, 0.0  ;;  %v794_v45 = vmul.f32 0.2, %v655_v43  ;;  %v538_v46 = vpop.f32.mrf.mxu0  ;;  %v578_v47 = vpop.f32.mrf.mxu1 }
  0xfa   : > { %v747_v54 = vmul.f32 0.2, %v538_v46  ;;  %v763_v55 = vmul.f32 0.2, %v578_v47  ;;  %vm683_vm8 = vcmp.gt.f32.partialorder %v538_v46, 0.0  ;;  %vm699_vm9 = vcmp.gt.f32.partialorder %v578_v47, 0.0 }
  0xfb   : > { %v842_v50 = vsel %vm714_vm6, %v615_v42, %v778_v44  ;;  %v858_v51 = vsel %vm730_vm7, %v655_v43, %v794_v45 }
  0xfc   : > { %v1398_v52 = vpack.c.bf16 %v842_v50, %v841_v48  ;;  %v1438_v53 = vpack.c.bf16 %v858_v51, %v857_v49  ;;  %v811_v62 = vsel %vm683_vm8, %v538_v46, %v747_v54  ;;  %v827_v63 = vsel %vm699_vm9, %v578_v47, %v763_v55 }
  0xfe   : > { %1474 = vst [vmem:[%s1665_s8 + $0xa0] sm:$0xff] %v1398_v52  }
  0xff   : > { %1482 = vst [vmem:[%s1665_s8 + $0xe0] sm:$0xff] %v1438_v53  }
 0x100   : > { %v618_v56 = vpop.f32.mrf.mxu2  ;;  %v658_v57 = vpop.f32.mrf.mxu3 }
 0x101   : > { %v540_v58 = vpop.f32.mrf.mxu0  ;;  %v580_v59 = vpop.f32.mrf.mxu1  ;;  %v779_v4 = vmul.f32 0.2, %v618_v56  ;;  %v795_v5 = vmul.f32 0.2, %v658_v57  ;;  %vm715_vm12 = vcmp.gt.f32.partialorder %v618_v56, 0.0  ;;  %vm731_vm13 = vcmp.gt.f32.partialorder %v658_v57, 0.0 }
 0x102   : > { %vm684_vm10 = vcmp.gt.f32.partialorder %v540_v58, 0.0  ;;  %v748_v60 = vmul.f32 0.2, %v540_v58  ;;  %vm700_vm11 = vcmp.gt.f32.partialorder %v580_v59, 0.0  ;;  %v764_v61 = vmul.f32 0.2, %v580_v59 }
 0x103   : > { %v843_v12 = vsel %vm715_vm12, %v618_v56, %v779_v4  ;;  %v859_v13 = vsel %vm731_vm13, %v658_v57, %v795_v5 }
 0x104   : > { %v812_v0 = vsel %vm684_vm10, %v540_v58, %v748_v60  ;;  %v828_v1 = vsel %vm700_vm11, %v580_v59, %v764_v61 }
 0x105   : > { %v1323_v2 = vpack.c.bf16 %v812_v0, %v811_v62  ;;  %v1363_v3 = vpack.c.bf16 %v828_v1, %v827_v63 }
 0x107   : > { %1459 = vst [vmem:[%s1665_s8 + $0x28] sm:$0xff] %v1323_v2  }
 0x108   : > { %1467 = vst [vmem:[%s1665_s8 + $0x68] sm:$0xff] %v1363_v3   ;;  %v620_v6 = vpop.f32.mrf.mxu2  ;;  %v660_v7 = vpop.f32.mrf.mxu3 }
 0x109   : > { %vm716_vm14 = vcmp.gt.f32.partialorder %v620_v6, 0.0  ;;  %v780_v8 = vmul.f32 0.2, %v620_v6  ;;  %vm732_vm15 = vcmp.gt.f32.partialorder %v660_v7, 0.0  ;;  %v796_v9 = vmul.f32 0.2, %v660_v7  ;;  %v543_v10 = vpop.f32.mrf.mxu0  ;;  %v583_v11 = vpop.f32.mrf.mxu1 }
 0x10a   : > { %v749_v18 = vmul.f32 0.2, %v543_v10  ;;  %v765_v19 = vmul.f32 0.2, %v583_v11  ;;  %vm685_vm0 = vcmp.gt.f32.partialorder %v543_v10, 0.0  ;;  %vm701_vm1 = vcmp.gt.f32.partialorder %v583_v11, 0.0 }
 0x10b   : > { %v844_v14 = vsel %vm716_vm14, %v620_v6, %v780_v8  ;;  %v860_v15 = vsel %vm732_vm15, %v660_v7, %v796_v9 }
 0x10c   : > { %v1403_v16 = vpack.c.bf16 %v844_v14, %v843_v12  ;;  %v1443_v17 = vpack.c.bf16 %v860_v15, %v859_v13  ;;  %v813_v26 = vsel %vm685_vm0, %v543_v10, %v749_v18  ;;  %v829_v27 = vsel %vm701_vm1, %v583_v11, %v765_v19 }
 0x10e   : > { %1475 = vst [vmem:[%s1665_s8 + $0xa8] sm:$0xff] %v1403_v16  }
 0x10f   : > { %1483 = vst [vmem:[%s1665_s8 + $0xe8] sm:$0xff] %v1443_v17  }
 0x110   : > { %v623_v20 = vpop.f32.mrf.mxu2  ;;  %v663_v21 = vpop.f32.mrf.mxu3 }
 0x111   : > { %v545_v22 = vpop.f32.mrf.mxu0  ;;  %v585_v23 = vpop.f32.mrf.mxu1  ;;  %v781_v32 = vmul.f32 0.2, %v623_v20  ;;  %v797_v33 = vmul.f32 0.2, %v663_v21  ;;  %vm717_vm4 = vcmp.gt.f32.partialorder %v623_v20, 0.0  ;;  %vm733_vm5 = vcmp.gt.f32.partialorder %v663_v21, 0.0 }
 0x112   : > { %vm686_vm2 = vcmp.gt.f32.partialorder %v545_v22, 0.0  ;;  %v750_v24 = vmul.f32 0.2, %v545_v22  ;;  %vm702_vm3 = vcmp.gt.f32.partialorder %v585_v23, 0.0  ;;  %v766_v25 = vmul.f32 0.2, %v585_v23 }
 0x113   : > { %v845_v40 = vsel %vm717_vm4, %v623_v20, %v781_v32  ;;  %v861_v41 = vsel %vm733_vm5, %v663_v21, %v797_v33 }
 0x114   : > { %v814_v28 = vsel %vm686_vm2, %v545_v22, %v750_v24  ;;  %v830_v29 = vsel %vm702_vm3, %v585_v23, %v766_v25 }
 0x115   : > { %v1328_v30 = vpack.c.bf16 %v814_v28, %v813_v26  ;;  %v1368_v31 = vpack.c.bf16 %v830_v29, %v829_v27 }
 0x117   : > { %1460 = vst [vmem:[%s1665_s8 + $0x30] sm:$0xff] %v1328_v30  }
 0x118   : > { %1468 = vst [vmem:[%s1665_s8 + $0x70] sm:$0xff] %v1368_v31   ;;  %v625_v34 = vpop.f32.mrf.mxu2  ;;  %v665_v35 = vpop.f32.mrf.mxu3 }
 0x119   : > { %vm718_vm6 = vcmp.gt.f32.partialorder %v625_v34, 0.0  ;;  %v782_v36 = vmul.f32 0.2, %v625_v34  ;;  %vm734_vm7 = vcmp.gt.f32.partialorder %v665_v35, 0.0  ;;  %v798_v37 = vmul.f32 0.2, %v665_v35  ;;  %v548_v38 = vpop.f32.mrf.mxu0  ;;  %v588_v39 = vpop.f32.mrf.mxu1 }
 0x11a   : > { %v751_v46 = vmul.f32 0.2, %v548_v38  ;;  %v767_v47 = vmul.f32 0.2, %v588_v39  ;;  %vm687_vm8 = vcmp.gt.f32.partialorder %v548_v38, 0.0  ;;  %vm703_vm9 = vcmp.gt.f32.partialorder %v588_v39, 0.0 }
 0x11b   : > { %v846_v42 = vsel %vm718_vm6, %v625_v34, %v782_v36  ;;  %v862_v43 = vsel %vm734_vm7, %v665_v35, %v798_v37 }
 0x11c   : > { %v1408_v44 = vpack.c.bf16 %v846_v42, %v845_v40  ;;  %v1448_v45 = vpack.c.bf16 %v862_v43, %v861_v41  ;;  %v815_v54 = vsel %vm687_vm8, %v548_v38, %v751_v46  ;;  %v831_v55 = vsel %vm703_vm9, %v588_v39, %v767_v47 }
 0x11e   : > { %1476 = vst [vmem:[%s1665_s8 + $0xb0] sm:$0xff] %v1408_v44  }
 0x11f   : > { %1484 = vst [vmem:[%s1665_s8 + $0xf0] sm:$0xff] %v1448_v45  }
 0x120   : > { %v628_v48 = vpop.f32.mrf.mxu2  ;;  %v668_v49 = vpop.f32.mrf.mxu3 }
 0x121   : > { %v550_v50 = vpop.f32.mrf.mxu0  ;;  %v590_v51 = vpop.f32.mrf.mxu1  ;;  %v783_v60 = vmul.f32 0.2, %v628_v48  ;;  %v799_v61 = vmul.f32 0.2, %v668_v49  ;;  %vm719_vm12 = vcmp.gt.f32.partialorder %v628_v48, 0.0  ;;  %vm735_vm13 = vcmp.gt.f32.partialorder %v668_v49, 0.0 }
 0x122   : > { %vm688_vm10 = vcmp.gt.f32.partialorder %v550_v50, 0.0  ;;  %v752_v52 = vmul.f32 0.2, %v550_v50  ;;  %vm704_vm11 = vcmp.gt.f32.partialorder %v590_v51, 0.0  ;;  %v768_v53 = vmul.f32 0.2, %v590_v51 }
 0x123   : > { %v847_v2 = vsel %vm719_vm12, %v628_v48, %v783_v60  ;;  %v863_v3 = vsel %vm735_vm13, %v668_v49, %v799_v61 }
 0x124   : > { %v816_v56 = vsel %vm688_vm10, %v550_v50, %v752_v52  ;;  %v832_v57 = vsel %vm704_vm11, %v590_v51, %v768_v53 }
 0x125   : > { %v1333_v58 = vpack.c.bf16 %v816_v56, %v815_v54  ;;  %v1373_v59 = vpack.c.bf16 %v832_v57, %v831_v55 }
 0x127   : > { %1461 = vst [vmem:[%s1665_s8 + $0x38] sm:$0xff] %v1333_v58  }
 0x128   : > { %1469 = vst [vmem:[%s1665_s8 + $0x78] sm:$0xff] %v1373_v59   ;;  %v630_v62 = vpop.f32.mrf.mxu2  ;;  %v670_v63 = vpop.f32.mrf.mxu3 }
 0x129   : > { %vm720_vm14 = vcmp.gt.f32.partialorder %v630_v62, 0.0  ;;  %v784_v0 = vmul.f32 0.2, %v630_v62  ;;  %vm736_vm15 = vcmp.gt.f32.partialorder %v670_v63, 0.0  ;;  %v800_v1 = vmul.f32 0.2, %v670_v63 }
 0x12b   : > { %v848_v4 = vsel %vm720_vm14, %v630_v62, %v784_v0  ;;  %v864_v5 = vsel %vm736_vm15, %v670_v63, %v800_v1 }
 0x12c   : > { %v1413_v6 = vpack.c.bf16 %v848_v4, %v847_v2  ;;  %v1453_v7 = vpack.c.bf16 %v864_v5, %v863_v3 }
 0x12e   : > { %1477 = vst [vmem:[%s1665_s8 + $0xb8] sm:$0xff] %v1413_v6  }
 0x12f   : > { %1485 = vst [vmem:[%s1665_s8 + $0xf8] sm:$0xff] %v1453_v7  }
 0x130 PF: > { %s12_s11 = sadd.s32 1, %s1556_s11   ;;  %s1711_s9 = smov %s1552_s10 }
 0x131   : > { %p9_p5 = scmp.ge.s32.totalorder %s12_s11, 18   ;;  %s1712_s10 = smov %s1714_s12 }
 0x133   :  { %11 = sbr.rel (!%p9_p5) target bundleno = 2 (0x2), region = 61 }

// kernel: dc_discriminator_forward.10
= control target key start
LH: loop header
LB: loop body
LE: loop exit
PB: predicated region body
PF: predicated region fallthrough
CT: control target
= control target key end

     0   :  { %s1470_s15 = smov 0   ;;  %s1472_s16 = smov 0   ;;  %s2025_s0 = inlined_call_operand.vmem [shape: bf16[2048,128], index: 0, kind: input, shape index: {}]   ;;  %s2026_s1 = inlined_call_operand.vmem [shape: bf16[128,128], index: 1, kind: input, shape index: {}]   ;;  %s2027_s2 = inlined_call_operand.vmem [shape: f32[2048,128], index: 2, kind: output, shape index: {0}]   ;;  %s2028_s3 = inlined_call_operand.vmem [shape: f32[1,128], index: 3, kind: output, shape index: {1}]   ;;  %s2029_s4 = inlined_call_operand.vmem [shape: f32[1,128], index: 4, kind: output, shape index: {2}]  }
   0x1   :  { %s1474_s17 = smov 0  }
   0x2 LB: > { %s24_s18 = sadd.s32 1, %s1438_s16  ;;  %p1161_p0 = scmp.ge.s32.totalorder %s1442_s17, 1  ;;  %s1442_s17 = sphi %s1474_s17, %s15_s17   ;;  %s1438_s16 = sphi %s1472_s16, %s2079_s16   ;;  %s1434_s15 = sphi %s1470_s15, %s2078_s15  }
   0x3   : > { %p25_p1 = scmp.ge.s32.totalorder %s24_s18, 4  ;;  %p191_p2 = scmp.lt.s32.totalorder %s1442_s17, 5 }
   0x5   : > { %s2081_s18 = smov (%p25_p1, %s24_s18), 0  ;;  %p192_p3 = pnand %p1161_p0, %p191_p2 }
   0x7   : > { %195 = sbr.rel (%p192_p3) target bundleno = 446 (0x1be), region = 28 }
   0xc   : > { %v1370_v0 = vld [vmem:[%s2026_s1 + $0x38] sm:$0xff]  ;;  %v1369_v1 = vld [vmem:[%s2026_s1 + $0x30] sm:$0xff]  ;;  %v1368_v2 = vld [vmem:[%s2026_s1 + $0x28] sm:$0xff]  ;;  %s1162_s27 = sshll.u32 %s1434_s15, 6  ;;  %p1326_p5 = scmp.ne.s32.totalorder %s1434_s15, 0 }
   0xd   : > { %575 = vmatpush.bf16.msra.mxu0 %v1370_v0  ;;  %1371 = vmatpush.bf16.msra.mxu1 %v1370_v0  ;;  %v1367_v3 = vld [vmem:[%s2026_s1 + $0x20] sm:$0xff]  ;;  %v1366_v4 = vld [vmem:[%s2026_s1 + $0x18] sm:$0xff]  ;;  %p231_p4 = scmp.lt.s32.totalorder %s1162_s27, 255  ;;  %v1365_v5 = vld [vmem:[%s2026_s1 + $0x10] sm:$0xff] }
   0xe   : > { %1372 = vmatpush.bf16.msra.mxu2 %v1370_v0  ;;  %1373 = vmatpush.bf16.msra.mxu3 %v1370_v0  ;;  %v1364_v6 = vld [vmem:[%s2026_s1 + $0x8] sm:$0xff]  ;;  %v1363_v7 = vld [vmem:[%s2026_s1] sm:$0xff] }
   0xf   : > { %s2083_s27 = smov (!%p231_p4, %s1162_s27), 255 }
  0x10   : > { %s1163_s8 = sshll.u32 %s2083_s27, 2  ;;  %s1165_s14 = sshll.u32 %s2083_s27, 3 }
  0x11   : > { %576 = vmatpush.bf16.msra.mxu0 %v1369_v1  ;;  %1374 = vmatpush.bf16.msra.mxu1 %v1369_v1  ;;  %s1521_s13 = scalar_lea.vmem %s2025_s0, %s1163_s8  ;;  %s1559_s21 = scalar_lea.vmem %s2027_s2, %s1165_s14 }
  0x12   : > { %1375 = vmatpush.bf16.msra.mxu2 %v1369_v1  ;;  %1376 = vmatpush.bf16.msra.mxu3 %v1369_v1  ;;  %v1331_v8 = vld [vmem:[%s1521_s13] sm:$0xff]  ;;  %v1332_v12 = vld [vmem:[%s1521_s13 + $0x8] sm:$0xff]  ;;  %v1333_v16 = vld [vmem:[%s1521_s13 + $0x10] sm:$0xff] }
  0x13   : > { %v1339_v9 = vld [vmem:[%s1521_s13 + $0x40] sm:$0xff]  ;;  %v1340_v13 = vld [vmem:[%s1521_s13 + $0x48] sm:$0xff]  ;;  %v1341_v17 = vld [vmem:[%s1521_s13 + $0x50] sm:$0xff] }
  0x14   : > { %v1347_v10 = vld [vmem:[%s1521_s13 + $0x80] sm:$0xff]  ;;  %v1348_v14 = vld [vmem:[%s1521_s13 + $0x88] sm:$0xff]  ;;  %v1349_v18 = vld [vmem:[%s1521_s13 + $0x90] sm:$0xff] }
  0x15   : > { %577 = vmatpush.bf16.msra.mxu0 %v1368_v2  ;;  %1377 = vmatpush.bf16.msra.mxu1 %v1368_v2  ;;  %v1355_v11 = vld [vmem:[%s1521_s13 + $0xc0] sm:$0xff]  ;;  %v1356_v15 = vld [vmem:[%s1521_s13 + $0xc8] sm:$0xff]  ;;  %v1357_v19 = vld [vmem:[%s1521_s13 + $0xd0] sm:$0xff] }
  0x16   : > { %1378 = vmatpush.bf16.msra.mxu2 %v1368_v2  ;;  %1379 = vmatpush.bf16.msra.mxu3 %v1368_v2  ;;  %v1334_v20 = vld [vmem:[%s1521_s13 + $0x18] sm:$0xff]  ;;  %v1335_v24 = vld [vmem:[%s1521_s13 + $0x20] sm:$0xff]  ;;  %v1336_v28 = vld [vmem:[%s1521_s13 + $0x28] sm:$0xff] }
  0x17   : > { %v1342_v21 = vld [vmem:[%s1521_s13 + $0x58] sm:$0xff]  ;;  %v1343_v25 = vld [vmem:[%s1521_s13 + $0x60] sm:$0xff]  ;;  %v1344_v29 = vld [vmem:[%s1521_s13 + $0x68] sm:$0xff] }
  0x18   : > { %v1350_v22 = vld [vmem:[%s1521_s13 + $0x98] sm:$0xff]  ;;  %v1351_v26 = vld [vmem:[%s1521_s13 + $0xa0] sm:$0xff]  ;;  %v1352_v30 = vld [vmem:[%s1521_s13 + $0xa8] sm:$0xff] }
  0x19   : > { %578 = vmatpush.bf16.msra.mxu0 %v1367_v3  ;;  %1380 = vmatpush.bf16.msra.mxu1 %v1367_v3  ;;  %v1358_v23 = vld [vmem:[%s1521_s13 + $0xd8] sm:$0xff]  ;;  %v1359_v27 = vld [vmem:[%s1521_s13 + $0xe0] sm:$0xff]  ;;  %v1360_v31 = vld [vmem:[%s1521_s13 + $0xe8] sm:$0xff] }
  0x1a   : > { %1381 = vmatpush.bf16.msra.mxu2 %v1367_v3  ;;  %1382 = vmatpush.bf16.msra.mxu3 %v1367_v3  ;;  %v1337_v32 = vld [vmem:[%s1521_s13 + $0x30] sm:$0xff]  ;;  %v1338_v36 = vld [vmem:[%s1521_s13 + $0x38] sm:$0xff] }
  0x1b   : > { %v1345_v33 = vld [vmem:[%s1521_s13 + $0x70] sm:$0xff]  ;;  %v1346_v37 = vld [vmem:[%s1521_s13 + $0x78] sm:$0xff] }
  0x1c   : > { %v1353_v34 = vld [vmem:[%s1521_s13 + $0xb0] sm:$0xff]  ;;  %v1354_v38 = vld [vmem:[%s1521_s13 + $0xb8] sm:$0xff] }
  0x1d   : > { %579 = vmatpush.bf16.msra.mxu0 %v1366_v4  ;;  %1383 = vmatpush.bf16.msra.mxu1 %v1366_v4  ;;  %v1361_v35 = vld [vmem:[%s1521_s13 + $0xf0] sm:$0xff]  ;;  %v1362_v39 = vld [vmem:[%s1521_s13 + $0xf8] sm:$0xff] }
  0x1e   : > { %1384 = vmatpush.bf16.msra.mxu2 %v1366_v4  ;;  %1385 = vmatpush.bf16.msra.mxu3 %v1366_v4 }
  0x21   : > { %580 = vmatpush.bf16.msra.mxu0 %v1365_v5  ;;  %1386 = vmatpush.bf16.msra.mxu1 %v1365_v5 }
  0x22   : > { %1387 = vmatpush.bf16.msra.mxu2 %v1365_v5  ;;  %1388 = vmatpush.bf16.msra.mxu3 %v1365_v5 }
  0x25   : > { %581 = vmatpush.bf16.msra.mxu0 %v1364_v6  ;;  %1389 = vmatpush.bf16.msra.mxu1 %v1364_v6 }
  0x26   : > { %1390 = vmatpush.bf16.msra.mxu2 %v1364_v6  ;;  %1391 = vmatpush.bf16.msra.mxu3 %v1364_v6 }
  0x29   : > { %582 = vmatpush.bf16.msra.mxu0 %v1363_v7  ;;  %1392 = vmatpush.bf16.msra.mxu1 %v1363_v7 }
  0x2a   : > { %1393 = vmatpush.bf16.msra.mxu2 %v1363_v7  ;;  %1394 = vmatpush.bf16.msra.mxu3 %v1363_v7 }
  0x2c   : > { %583 = vmatmul.bf16.vlgmr.msra.gmra.mxu0 %v1331_v8  ;;  %623 = vmatmul.bf16.vlgmr.msra.gmra.mxu1 %v1339_v9 }
  0x2d   : > { %663 = vmatmul.bf16.vlgmr.msra.gmra.mxu2 %v1347_v10  ;;  %703 = vmatmul.bf16.vlgmr.msra.gmra.mxu3 %v1355_v11 }
  0x3c   : > { %588 = vmatmul.bf16.gmra.mxu0 %v1332_v12  ;;  %628 = vmatmul.bf16.gmra.mxu1 %v1340_v13 }
  0x3d   : > { %668 = vmatmul.bf16.gmra.mxu2 %v1348_v14  ;;  %708 = vmatmul.bf16.gmra.mxu3 %v1356_v15 }
  0x4c   : > { %593 = vmatmul.bf16.gmra.mxu0 %v1333_v16  ;;  %633 = vmatmul.bf16.gmra.mxu1 %v1341_v17 }
  0x4d   : > { %673 = vmatmul.bf16.gmra.mxu2 %v1349_v18  ;;  %713 = vmatmul.bf16.gmra.mxu3 %v1357_v19 }
  0x5c   : > { %598 = vmatmul.bf16.gmra.mxu0 %v1334_v20  ;;  %638 = vmatmul.bf16.gmra.mxu1 %v1342_v21 }
  0x5d   : > { %678 = vmatmul.bf16.gmra.mxu2 %v1350_v22  ;;  %718 = vmatmul.bf16.gmra.mxu3 %v1358_v23 }
  0x6c   : > { %603 = vmatmul.bf16.gmra.mxu0 %v1335_v24  ;;  %643 = vmatmul.bf16.gmra.mxu1 %v1343_v25 }
  0x6d   : > { %683 = vmatmul.bf16.gmra.mxu2 %v1351_v26  ;;  %723 = vmatmul.bf16.gmra.mxu3 %v1359_v27 }
  0x7c   : > { %608 = vmatmul.bf16.gmra.mxu0 %v1336_v28  ;;  %648 = vmatmul.bf16.gmra.mxu1 %v1344_v29 }
  0x7d   : > { %688 = vmatmul.bf16.gmra.mxu2 %v1352_v30  ;;  %728 = vmatmul.bf16.gmra.mxu3 %v1360_v31 }
  0x8c   : > { %613 = vmatmul.bf16.gmra.mxu0 %v1337_v32  ;;  %653 = vmatmul.bf16.gmra.mxu1 %v1345_v33 }
  0x8d   : > { %693 = vmatmul.bf16.gmra.mxu2 %v1353_v34  ;;  %733 = vmatmul.bf16.gmra.mxu3 %v1361_v35 }
  0x9c   : > { %618 = vmatmul.bf16.gmra.mxu0 %v1338_v36  ;;  %658 = vmatmul.bf16.gmra.mxu1 %v1346_v37 }
  0x9d   : > { %698 = vmatmul.bf16.gmra.mxu2 %v1354_v38  ;;  %738 = vmatmul.bf16.gmra.mxu3 %v1362_v39 }
  0xa9   : > { %v1561_v40 = vpop.f32.mrf.mxu0  ;;  %v1563_v41 = vpop.f32.mrf.mxu1 }
  0xaa   : > { %744 = vst [vmem:[%s1559_s21] sm:$0xff] %v1561_v40 }
  0xab   : > { %760 = vst [vmem:[%s1559_s21 + $0x80] sm:$0xff] %v1563_v41 }
  0xb0   : > { %v1569_v42 = vpop.f32.mrf.mxu2  ;;  %v1571_v43 = vpop.f32.mrf.mxu3 }
  0xb1   : > { %776 = vst [vmem:[%s1559_s21 + $0x100] sm:$0xff] %v1569_v42  ;;  %v1575_v44 = vpop.f32.mrf.mxu0  ;;  %v1577_v45 = vpop.f32.mrf.mxu1 }
  0xb2   : > { %792 = vst [vmem:[%s1559_s21 + $0x180] sm:$0xff] %v1571_v43 }
  0xb3   : > { %745 = vst [vmem:[%s1559_s21 + $0x8] sm:$0xff] %v1575_v44 }
  0xb4   : > { %761 = vst [vmem:[%s1559_s21 + $0x88] sm:$0xff] %v1577_v45 }
  0xb8   : > { %v1585_v46 = vpop.f32.mrf.mxu2  ;;  %v1587_v47 = vpop.f32.mrf.mxu3 }
  0xb9   : > { %777 = vst [vmem:[%s1559_s21 + $0x108] sm:$0xff] %v1585_v46  ;;  %v1591_v48 = vpop.f32.mrf.mxu0  ;;  %v1593_v49 = vpop.f32.mrf.mxu1 }
  0xba   : > { %793 = vst [vmem:[%s1559_s21 + $0x188] sm:$0xff] %v1587_v47 }
  0xbb   : > { %746 = vst [vmem:[%s1559_s21 + $0x10] sm:$0xff] %v1591_v48 }
  0xbc   : > { %762 = vst [vmem:[%s1559_s21 + $0x90] sm:$0xff] %v1593_v49 }
  0xc0   : > { %v1601_v50 = vpop.f32.mrf.mxu2  ;;  %v1603_v51 = vpop.f32.mrf.mxu3 }
  0xc1   : > { %778 = vst [vmem:[%s1559_s21 + $0x110] sm:$0xff] %v1601_v50  ;;  %v1607_v52 = vpop.f32.mrf.mxu0  ;;  %v1609_v53 = vpop.f32.mrf.mxu1 }
  0xc2   : > { %794 = vst [vmem:[%s1559_s21 + $0x190] sm:$0xff] %v1603_v51 }
  0xc3   : > { %747 = vst [vmem:[%s1559_s21 + $0x18] sm:$0xff] %v1607_v52 }
  0xc4   : > { %763 = vst [vmem:[%s1559_s21 + $0x98] sm:$0xff] %v1609_v53 }
  0xc8   : > { %v1617_v54 = vpop.f32.mrf.mxu2  ;;  %v1619_v55 = vpop.f32.mrf.mxu3 }
  0xc9   : > { %779 = vst [vmem:[%s1559_s21 + $0x118] sm:$0xff] %v1617_v54  ;;  %v1623_v56 = vpop.f32.mrf.mxu0  ;;  %v1625_v57 = vpop.f32.mrf.mxu1 }
  0xca   : > { %795 = vst [vmem:[%s1559_s21 + $0x198] sm:$0xff] %v1619_v55 }
  0xcb   : > { %748 = vst [vmem:[%s1559_s21 + $0x20] sm:$0xff] %v1623_v56 }
  0xcc   : > { %764 = vst [vmem:[%s1559_s21 + $0xa0] sm:$0xff] %v1625_v57 }
  0xd0   : > { %v1633_v58 = vpop.f32.mrf.mxu2  ;;  %v1635_v59 = vpop.f32.mrf.mxu3 }
  0xd1   : > { %2054 = vst [vmem:[#allocation2_spill] sm:$0xff] %v1635_v59  ;;  %v1639_v60 = vpop.f32.mrf.mxu0  ;;  %v1641_v61 = vpop.f32.mrf.mxu1 }
  0xd2   : > { %780 = vst [vmem:[%s1559_s21 + $0x120] sm:$0xff] %v1633_v58 }
  0xd3   : > { %796 = vst [vmem:[%s1559_s21 + $0x1a0] sm:$0xff] %v1635_v59 }
  0xd4   : > { %749 = vst [vmem:[%s1559_s21 + $0x28] sm:$0xff] %v1639_v60 }
  0xd5   : > { %765 = vst [vmem:[%s1559_s21 + $0xa8] sm:$0xff] %v1641_v61 }
  0xd8   : > { %v1649_v62 = vpop.f32.mrf.mxu2  ;;  %v1651_v63 = vpop.f32.mrf.mxu3 }
  0xd9   : > { %2055 = vst [vmem:[#allocation3_spill] sm:$0xff] %v1651_v63  ;;  %v1655_v0 = vpop.f32.mrf.mxu0  ;;  %v1657_v1 = vpop.f32.mrf.mxu1 }
  0xda   : > { %781 = vst [vmem:[%s1559_s21 + $0x128] sm:$0xff] %v1649_v62 }
  0xdb   : > { %797 = vst [vmem:[%s1559_s21 + $0x1a8] sm:$0xff] %v1651_v63 }
  0xdc   : > { %750 = vst [vmem:[%s1559_s21 + $0x30] sm:$0xff] %v1655_v0 }
  0xdd   : > { %766 = vst [vmem:[%s1559_s21 + $0xb0] sm:$0xff] %v1657_v1 }
  0xe0   : > { %v1665_v2 = vpop.f32.mrf.mxu2  ;;  %v1667_v3 = vpop.f32.mrf.mxu3 }
  0xe1   : > { %2056 = vst [vmem:[#allocation4_spill] sm:$0xff] %v1667_v3  ;;  %v1671_v4 = vpop.f32.mrf.mxu0  ;;  %v1673_v5 = vpop.f32.mrf.mxu1 }
  0xe2   : > { %782 = vst [vmem:[%s1559_s21 + $0x130] sm:$0xff] %v1665_v2 }
  0xe3   : > { %798 = vst [vmem:[%s1559_s21 + $0x1b0] sm:$0xff] %v1667_v3 }
  0xe4   : > { %751 = vst [vmem:[%s1559_s21 + $0x38] sm:$0xff] %v1671_v4 }
  0xe5   : > { %767 = vst [vmem:[%s1559_s21 + $0xb8] sm:$0xff] %v1673_v5 }
  0xe8   : > { %v1681_v6 = vpop.f32.mrf.mxu2  ;;  %v1683_v7 = vpop.f32.mrf.mxu3 }
  0xe9   : > { %2057 = vst [vmem:[#allocation5_spill] sm:$0xff] %v1683_v7  ;;  %v1687_v8 = vpop.f32.mrf.mxu0  ;;  %v1689_v9 = vpop.f32.mrf.mxu1 }
  0xea   : > { %783 = vst [vmem:[%s1559_s21 + $0x138] sm:$0xff] %v1681_v6 }
  0xeb   : > { %799 = vst [vmem:[%s1559_s21 + $0x1b8] sm:$0xff] %v1683_v7 }
  0xec   : > { %752 = vst [vmem:[%s1559_s21 + $0x40] sm:$0xff] %v1687_v8 }
  0xed   : > { %768 = vst [vmem:[%s1559_s21 + $0xc0] sm:$0xff] %v1689_v9 }
  0xf0   : > { %v1697_v10 = vpop.f32.mrf.mxu2  ;;  %v1699_v11 = vpop.f32.mrf.mxu3 }
  0xf1   : > { %2058 = vst [vmem:[#allocation6_spill] sm:$0xff] %v1699_v11  ;;  %v1703_v12 = vpop.f32.mrf.mxu0  ;;  %v1705_v13 = vpop.f32.mrf.mxu1 }
  0xf2   : > { %784 = vst [vmem:[%s1559_s21 + $0x140] sm:$0xff] %v1697_v10 }
  0xf3   : > { %800 = vst [vmem:[%s1559_s21 + $0x1c0] sm:$0xff] %v1699_v11 }
  0xf4   : > { %753 = vst [vmem:[%s1559_s21 + $0x48] sm:$0xff] %v1703_v12 }
  0xf5   : > { %769 = vst [vmem:[%s1559_s21 + $0xc8] sm:$0xff] %v1705_v13 }
  0xf8   : > { %v1713_v14 = vpop.f32.mrf.mxu2  ;;  %v1715_v15 = vpop.f32.mrf.mxu3 }
  0xf9   : > { %2059 = vst [vmem:[#allocation7_spill] sm:$0xff] %v1715_v15  ;;  %v1719_v16 = vpop.f32.mrf.mxu0  ;;  %v1721_v17 = vpop.f32.mrf.mxu1 }
  0xfa   : > { %785 = vst [vmem:[%s1559_s21 + $0x148] sm:$0xff] %v1713_v14 }
  0xfb   : > { %801 = vst [vmem:[%s1559_s21 + $0x1c8] sm:$0xff] %v1715_v15 }
  0xfc   : > { %754 = vst [vmem:[%s1559_s21 + $0x50] sm:$0xff] %v1719_v16 }
  0xfd   : > { %770 = vst [vmem:[%s1559_s21 + $0xd0] sm:$0xff] %v1721_v17 }
 0x100   : > { %v1729_v18 = vpop.f32.mrf.mxu2  ;;  %v1731_v19 = vpop.f32.mrf.mxu3 }
 0x101   : > { %2060 = vst [vmem:[#allocation8_spill] sm:$0xff] %v1731_v19  ;;  %v1735_v20 = vpop.f32.mrf.mxu0  ;;  %v1737_v21 = vpop.f32.mrf.mxu1 }
 0x102   : > { %786 = vst [vmem:[%s1559_s21 + $0x150] sm:$0xff] %v1729_v18 }
 0x103   : > { %802 = vst [vmem:[%s1559_s21 + $0x1d0] sm:$0xff] %v1731_v19 }
 0x104   : > { %755 = vst [vmem:[%s1559_s21 + $0x58] sm:$0xff] %v1735_v20 }
 0x105   : > { %771 = vst [vmem:[%s1559_s21 + $0xd8] sm:$0xff] %v1737_v21 }
 0x108   : > { %v1745_v22 = vpop.f32.mrf.mxu2  ;;  %v1747_v23 = vpop.f32.mrf.mxu3 }
 0x109   : > { %2061 = vst [vmem:[#allocation9_spill] sm:$0xff] %v1747_v23  ;;  %v1751_v24 = vpop.f32.mrf.mxu0  ;;  %v1753_v25 = vpop.f32.mrf.mxu1 }
 0x10a   : > { %787 = vst [vmem:[%s1559_s21 + $0x158] sm:$0xff] %v1745_v22 }
 0x10b   : > { %803 = vst [vmem:[%s1559_s21 + $0x1d8] sm:$0xff] %v1747_v23 }
 0x10c   : > { %756 = vst [vmem:[%s1559_s21 + $0x60] sm:$0xff] %v1751_v24 }
 0x10d   : > { %772 = vst [vmem:[%s1559_s21 + $0xe0] sm:$0xff] %v1753_v25 }
 0x110   : > { %v1761_v26 = vpop.f32.mrf.mxu2  ;;  %v1763_v27 = vpop.f32.mrf.mxu3 }
 0x111   : > { %2062 = vst [vmem:[#allocation10_spill] sm:$0xff] %v1763_v27  ;;  %v1767_v28 = vpop.f32.mrf.mxu0  ;;  %v1769_v29 = vpop.f32.mrf.mxu1 }
 0x112   : > { %788 = vst [vmem:[%s1559_s21 + $0x160] sm:$0xff] %v1761_v26 }
 0x113   : > { %804 = vst [vmem:[%s1559_s21 + $0x1e0] sm:$0xff] %v1763_v27 }
 0x114   : > { %757 = vst [vmem:[%s1559_s21 + $0x68] sm:$0xff] %v1767_v28 }
 0x115   : > { %773 = vst [vmem:[%s1559_s21 + $0xe8] sm:$0xff] %v1769_v29 }
 0x118   : > { %v1777_v30 = vpop.f32.mrf.mxu2  ;;  %v1779_v31 = vpop.f32.mrf.mxu3 }
 0x119   : > { %2063 = vst [vmem:[#allocation11_spill] sm:$0xff] %v1779_v31  ;;  %v619_v32 = vpop.f32.mrf.mxu0  ;;  %v1783_v33 = vpop.f32.mrf.mxu1 }
 0x11a   : > { %789 = vst [vmem:[%s1559_s21 + $0x168] sm:$0xff] %v1777_v30 }
 0x11b   : > { %805 = vst [vmem:[%s1559_s21 + $0x1e8] sm:$0xff] %v1779_v31 }
 0x11c   : > { %758 = vst [vmem:[%s1559_s21 + $0x70] sm:$0xff] %v619_v32 }
 0x11d   : > { %774 = vst [vmem:[%s1559_s21 + $0xf0] sm:$0xff] %v1783_v33 }
 0x120   : > { %v1790_v34 = vpop.f32.mrf.mxu2  ;;  %v1792_v35 = vpop.f32.mrf.mxu3 }
 0x121   : > { %2064 = vst [vmem:[#allocation12_spill] sm:$0xff] %v1792_v35  ;;  %v621_v36 = vpop.f32.mrf.mxu0  ;;  %v1796_v37 = vpop.f32.mrf.mxu1 }
 0x122   : > { %790 = vst [vmem:[%s1559_s21 + $0x170] sm:$0xff] %v1790_v34 }
 0x123   : > { %806 = vst [vmem:[%s1559_s21 + $0x1f0] sm:$0xff] %v1792_v35 }
 0x124   : > { %759 = vst [vmem:[%s1559_s21 + $0x78] sm:$0xff] %v621_v36 }
 0x125   : > { %775 = vst [vmem:[%s1559_s21 + $0xf8] sm:$0xff] %v1796_v37 }
 0x127   : > { %811 = sbr.rel (%p1326_p5) target bundleno = 303 (0x12f), region = 32 }
 0x128   : > { %v1803_v38 = vpop.f32.mrf.mxu2  ;;  %v1805_v39 = vpop.f32.mrf.mxu3 }
 0x129   : > { %2065 = vst [vmem:[#allocation13_spill] sm:$0xff] %v1805_v39 }
 0x12a   : > { %791 = vst [vmem:[%s1559_s21 + $0x178] sm:$0xff] %v1803_v38 }
 0x12b   : > { %807 = vst [vmem:[%s1559_s21 + $0x1f8] sm:$0xff] %v1805_v39 }
 0x12c   : > { %v1444_v31 = vmov 0.0  }
 0x12d   : > { %812 = vst [vmem:[%s2028_s3] sm:$0x1] %v1444_v31 }
 0x12e   : > { %813 = vst [vmem:[%s2029_s4] sm:$0x1] %v1444_v31 }
 0x12f PF: > { %v815_v35 = vadd.f32 %v1575_v44, %v1561_v40  ;;  %v887_v27 = vmul.f32 %v1561_v40, %v1561_v40  ;;  %v888_v39 = vmul.f32 %v1575_v44, %v1575_v44  ;;  %v889_v19 = vmul.f32 %v1591_v48, %v1591_v48 }
 0x130   : > { %v890_v31 = vmul.f32 %v1607_v52, %v1607_v52  ;;  %v891_v3 = vmul.f32 %v1623_v56, %v1623_v56  ;;  %v892_v44 = vmul.f32 %v1639_v60, %v1639_v60 }
 0x131   : > { %v816_v23 = vadd.f32 %v815_v35, %v1591_v48  ;;  %v951_v11 = vadd.f32 %v888_v39, %v887_v27 }
 0x133   : > { %v817_v15 = vadd.f32 %v816_v23, %v1607_v52  ;;  %v952_v40 = vadd.f32 %v951_v11, %v889_v19  ;;  %v893_v23 = vmul.f32 %v1655_v0, %v1655_v0 }
 0x135   : > { %v818_v7 = vadd.f32 %v817_v15, %v1623_v56  ;;  %v953_v35 = vadd.f32 %v952_v40, %v890_v31  ;;  %v894_v15 = vmul.f32 %v1671_v4, %v1671_v4  ;;  %v899_v40 = vmul.f32 %v1751_v24, %v1751_v24 }
 0x137   : > { %v819_v63 = vadd.f32 %v818_v7, %v1639_v60  ;;  %v954_v59 = vadd.f32 %v953_v35, %v891_v3  ;;  %v895_v7 = vmul.f32 %v1687_v8, %v1687_v8  ;;  %v897_v3 = vmul.f32 %v1719_v16, %v1719_v16 }
 0x138   : > { %v900_v35 = vmul.f32 %v1767_v28, %v1767_v28 }
 0x139   : > { %v820_v48 = vadd.f32 %v819_v63, %v1655_v0  ;;  %v955_v27 = vadd.f32 %v954_v59, %v892_v44  ;;  %v896_v63 = vmul.f32 %v1703_v12, %v1703_v12 }
 0x13b   : > { %v821_v52 = vadd.f32 %v820_v48, %v1671_v4  ;;  %v956_v11 = vadd.f32 %v955_v27, %v893_v23  ;;  %v898_v4 = vmul.f32 %v1735_v20, %v1735_v20  ;;  %v901_v23 = vmul.f32 %v619_v32, %v619_v32 }
 0x13c   : > { %v902_v27 = vmul.f32 %v621_v36, %v621_v36 }
 0x13d   : > { %v822_v56 = vadd.f32 %v821_v52, %v1687_v8  ;;  %v957_v19 = vadd.f32 %v956_v11, %v894_v15 }
 0x13f   : > { %v823_v60 = vadd.f32 %v822_v56, %v1703_v12  ;;  %v958_v39 = vadd.f32 %v957_v19, %v895_v7  ;;  %v903_v7 = vmul.f32 %v1563_v41, %v1563_v41 }
 0x141   : > { %v824_v0 = vadd.f32 %v823_v60, %v1719_v16  ;;  %v959_v31 = vadd.f32 %v958_v39, %v896_v63  ;;  %v904_v60 = vmul.f32 %v1577_v45, %v1577_v45  ;;  %v907_v39 = vmul.f32 %v1625_v57, %v1625_v57 }
 0x143   : > { %v825_v59 = vadd.f32 %v824_v0, %v1735_v20  ;;  %v960_v44 = vadd.f32 %v959_v31, %v897_v3  ;;  %v906_v0 = vmul.f32 %v1609_v53, %v1609_v53 }
 0x145   : > { %v826_v8 = vadd.f32 %v825_v59, %v1751_v24  ;;  %v961_v48 = vadd.f32 %v960_v44, %v898_v4  ;;  %v908_v4 = vmul.f32 %v1641_v61, %v1641_v61  ;;  %v910_v44 = vmul.f32 %v1673_v5, %v1673_v5 }
 0x147   : > { %v827_v12 = vadd.f32 %v826_v8, %v1767_v28  ;;  %v962_v52 = vadd.f32 %v961_v48, %v899_v40  ;;  %v909_v8 = vmul.f32 %v1657_v1, %v1657_v1 }
 0x149   : > { %v828_v16 = vadd.f32 %v827_v12, %v619_v32  ;;  %v963_v56 = vadd.f32 %v962_v52, %v900_v35  ;;  %v905_v32 = vmul.f32 %v1593_v49, %v1593_v49  ;;  %v911_v35 = vmul.f32 %v1689_v9, %v1689_v9 }
 0x14a   : > { %v913_v52 = vmul.f32 %v1721_v17, %v1721_v17 }
 0x14b   : > { %v829_v15 = vadd.f32 %v828_v16, %v621_v36  ;;  %v964_v11 = vadd.f32 %v963_v56, %v901_v23  ;;  %v912_v16 = vmul.f32 %v1705_v13, %v1705_v13 }
 0x14d   : > { %v830_v20 = vadd.f32 %v829_v15, %v1563_v41  ;;  %v965_v63 = vadd.f32 %v964_v11, %v902_v27  ;;  %v914_v27 = vmul.f32 %v1737_v21, %v1737_v21  ;;  %v916_v11 = vmul.f32 %v1769_v29, %v1769_v29 }
 0x14f   : > { %v831_v24 = vadd.f32 %v830_v20, %v1577_v45  ;;  %v966_v19 = vadd.f32 %v965_v63, %v903_v7  ;;  %v915_v20 = vmul.f32 %v1753_v25, %v1753_v25 }
 0x151   : > { %v832_v28 = vadd.f32 %v831_v24, %v1593_v49  ;;  %v967_v3 = vadd.f32 %v966_v19, %v904_v60  ;;  %v917_v60 = vmul.f32 %v1783_v33, %v1783_v33  ;;  %v919_v19 = vmul.f32 %v1569_v42, %v1569_v42 }
 0x153   : > { %v833_v36 = vadd.f32 %v832_v28, %v1609_v53  ;;  %v968_v59 = vadd.f32 %v967_v3, %v905_v32  ;;  %v918_v28 = vmul.f32 %v1796_v37, %v1796_v37 }
 0x155   : > { %v834_v41 = vadd.f32 %v833_v36, %v1625_v57  ;;  %v969_v31 = vadd.f32 %v968_v59, %v906_v0  ;;  %v920_v0 = vmul.f32 %v1585_v46, %v1585_v46  ;;  %v922_v59 = vmul.f32 %v1617_v54, %v1617_v54 }
 0x157   : > { %v835_v45 = vadd.f32 %v834_v41, %v1641_v61  ;;  %v970_v40 = vadd.f32 %v969_v31, %v907_v39  ;;  %v921_v41 = vmul.f32 %v1601_v50, %v1601_v50 }
 0x159   : > { %v836_v49 = vadd.f32 %v835_v45, %v1657_v1  ;;  %v971_v12 = vadd.f32 %v970_v40, %v908_v4  ;;  %v923_v4 = vmul.f32 %v1633_v58, %v1633_v58  ;;  %v925_v40 = vmul.f32 %v1665_v2, %v1665_v2 }
 0x15b   : > { %v837_v53 = vadd.f32 %v836_v49, %v1673_v5  ;;  %v972_v48 = vadd.f32 %v971_v12, %v909_v8  ;;  %v924_v49 = vmul.f32 %v1649_v62, %v1649_v62 }
 0x15d   : > { %v838_v57 = vadd.f32 %v837_v53, %v1689_v9  ;;  %v973_v23 = vadd.f32 %v972_v48, %v910_v44  ;;  %v926_v44 = vmul.f32 %v1681_v6, %v1681_v6  ;;  %v928_v48 = vmul.f32 %v1713_v14, %v1713_v14 }
 0x15f   : > { %v839_v61 = vadd.f32 %v838_v57, %v1705_v13  ;;  %v974_v15 = vadd.f32 %v973_v23, %v911_v35  ;;  %v927_v57 = vmul.f32 %v1697_v10, %v1697_v10 }
 0x161   : > { %v840_v1 = vadd.f32 %v839_v61, %v1721_v17  ;;  %v975_v56 = vadd.f32 %v974_v15, %v912_v16  ;;  %v929_v16 = vmul.f32 %v1729_v18, %v1729_v18  ;;  %v931_v15 = vmul.f32 %v1761_v26, %v1761_v26 }
 0x163   : > { %v841_v5 = vadd.f32 %v840_v1, %v1737_v21  ;;  %v976_v7 = vadd.f32 %v975_v56, %v913_v52  ;;  %v930_v1 = vmul.f32 %v1745_v22, %v1745_v22 }
 0x165   : > { %v842_v9 = vadd.f32 %v841_v5, %v1753_v25  ;;  %v977_v24 = vadd.f32 %v976_v7, %v914_v27  ;;  %v932_v27 = vmul.f32 %v1777_v30, %v1777_v30  ;;  %v934_v7 = vmul.f32 %v1803_v38, %v1803_v38 }
 0x167   : > { %v843_v13 = vadd.f32 %v842_v9, %v1769_v29  ;;  %v978_v63 = vadd.f32 %v977_v24, %v915_v20  ;;  %v933_v9 = vmul.f32 %v1790_v34, %v1790_v34 }
 0x169   : > { %v844_v17 = vadd.f32 %v843_v13, %v1783_v33  ;;  %v979_v32 = vadd.f32 %v978_v63, %v916_v11  ;;  %v935_v11 = vmul.f32 %v1571_v43, %v1571_v43  ;;  %v937_v63 = vmul.f32 %v1603_v51, %v1603_v51 }
 0x16b   : > { %v845_v21 = vadd.f32 %v844_v17, %v1796_v37  ;;  %v980_v36 = vadd.f32 %v979_v32, %v917_v60  ;;  %v936_v17 = vmul.f32 %v1587_v47, %v1587_v47 }
 0x16d   : > { %v846_v25 = vadd.f32 %v845_v21, %v1569_v42  ;;  %v981_v3 = vadd.f32 %v980_v36, %v918_v28  ;;  %v938_v28 = vmul.f32 %v1619_v55, %v1619_v55 }
 0x16f   : > { %v847_v29 = vadd.f32 %v846_v25, %v1585_v46  ;;  %v982_v39 = vadd.f32 %v981_v3, %v919_v19 }
 0x171   : > { %v848_v33 = vadd.f32 %v847_v29, %v1601_v50  ;;  %v983_v45 = vadd.f32 %v982_v39, %v920_v0 }
 0x173   : > { %v849_v37 = vadd.f32 %v848_v33, %v1617_v54  ;;  %v984_v31 = vadd.f32 %v983_v45, %v921_v41 }
 0x175   : > { %v850_v42 = vadd.f32 %v849_v37, %v1633_v58  ;;  %v985_v8 = vadd.f32 %v984_v31, %v922_v59 }
 0x177   : > { %v851_v46 = vadd.f32 %v850_v42, %v1649_v62  ;;  %v986_v53 = vadd.f32 %v985_v8, %v923_v4  ;;  %v2070_v42 = vld [vmem:[#allocation6_spill] sm:$0xff] }
 0x178   : > { %v943_v31 = vmul.f32 %v2070_v42, %v2070_v42 }
 0x179   : > { %v852_v50 = vadd.f32 %v851_v46, %v1665_v2  ;;  %v987_v12 = vadd.f32 %v986_v53, %v924_v49  ;;  %v2071_v49 = vld [vmem:[#allocation7_spill] sm:$0xff]  ;;  %v2072_v53 = vld [vmem:[#allocation8_spill] sm:$0xff] }
 0x17b   : > { %v853_v54 = vadd.f32 %v852_v50, %v1681_v6  ;;  %v988_v35 = vadd.f32 %v987_v12, %v925_v40  ;;  %v944_v50 = vmul.f32 %v2071_v49, %v2071_v49 }
 0x17d   : > { %v854_v58 = vadd.f32 %v853_v54, %v1697_v10  ;;  %v989_v61 = vadd.f32 %v988_v35, %v926_v44  ;;  %v945_v44 = vmul.f32 %v2072_v53, %v2072_v53 }
 0x17f   : > { %v855_v62 = vadd.f32 %v854_v58, %v1713_v14  ;;  %v990_v23 = vadd.f32 %v989_v61, %v927_v57  ;;  %v2073_v58 = vld [vmem:[#allocation9_spill] sm:$0xff] }
 0x180   : > { %v946_v35 = vmul.f32 %v2073_v58, %v2073_v58 }
 0x181   : > { %v856_v2 = vadd.f32 %v855_v62, %v1729_v18  ;;  %v991_v52 = vadd.f32 %v990_v23, %v928_v48  ;;  %v2074_v48 = vld [vmem:[#allocation10_spill] sm:$0xff]  ;;  %v2075_v23 = vld [vmem:[#allocation11_spill] sm:$0xff] }
 0x183   : > { %v857_v6 = vadd.f32 %v856_v2, %v1745_v22  ;;  %v992_v5 = vadd.f32 %v991_v52, %v929_v16  ;;  %v947_v2 = vmul.f32 %v2074_v48, %v2074_v48 }
 0x185   : > { %v858_v10 = vadd.f32 %v857_v6, %v1761_v26  ;;  %v993_v56 = vadd.f32 %v992_v5, %v930_v1  ;;  %v948_v1 = vmul.f32 %v2075_v23, %v2075_v23 }
 0x187   : > { %v859_v14 = vadd.f32 %v858_v10, %v1777_v30  ;;  %v994_v20 = vadd.f32 %v993_v56, %v931_v15  ;;  %v2076_v10 = vld [vmem:[#allocation12_spill] sm:$0xff] }
 0x188   : > { %v949_v5 = vmul.f32 %v2076_v10, %v2076_v10 }
 0x189   : > { %v860_v18 = vadd.f32 %v859_v14, %v1790_v34  ;;  %v995_v13 = vadd.f32 %v994_v20, %v932_v27  ;;  %v2077_v27 = vld [vmem:[#allocation13_spill] sm:$0xff] }
 0x18b   : > { %v861_v22 = vadd.f32 %v860_v18, %v1803_v38  ;;  %v996_v24 = vadd.f32 %v995_v13, %v933_v9  ;;  %v950_v18 = vmul.f32 %v2077_v27, %v2077_v27 }
 0x18d   : > { %v862_v26 = vadd.f32 %v861_v22, %v1571_v43  ;;  %v997_v60 = vadd.f32 %v996_v24, %v934_v7  ;;  %v2066_v43 = vld [vmem:[#allocation2_spill] sm:$0xff] }
 0x18e   : > { %v939_v19 = vmul.f32 %v2066_v43, %v2066_v43 }
 0x18f   : > { %v863_v30 = vadd.f32 %v862_v26, %v1587_v47  ;;  %v998_v21 = vadd.f32 %v997_v60, %v935_v11  ;;  %v2067_v47 = vld [vmem:[#allocation3_spill] sm:$0xff]  ;;  %v814_v60 = vld [vmem:[%s2028_s3] sm:$0x1] }
 0x190   : > { %v940_v0 = vmul.f32 %v2067_v47, %v2067_v47 }
 0x191   : > { %v864_v34 = vadd.f32 %v863_v30, %v1603_v51  ;;  %v999_v32 = vadd.f32 %v998_v21, %v936_v17  ;;  %v2068_v51 = vld [vmem:[#allocation4_spill] sm:$0xff] }
 0x192   : > { %v941_v41 = vmul.f32 %v2068_v51, %v2068_v51 }
 0x193   : > { %v865_v38 = vadd.f32 %v864_v34, %v1619_v55  ;;  %v1000_v36 = vadd.f32 %v999_v32, %v937_v63  ;;  %v2069_v55 = vld [vmem:[#allocation5_spill] sm:$0xff]  ;;  %v886_v32 = vld [vmem:[%s2029_s4] sm:$0x1] }
 0x194   : > { %v942_v59 = vmul.f32 %v2069_v55, %v2069_v55 }
 0x195   : > { %v866_v25 = vadd.f32 %v865_v38, %v2066_v43  ;;  %v1001_v3 = vadd.f32 %v1000_v36, %v938_v28 }
 0x197   : > { %v867_v29 = vadd.f32 %v866_v25, %v2067_v47  ;;  %v1002_v39 = vadd.f32 %v1001_v3, %v939_v19 }
 0x199   : > { %v868_v33 = vadd.f32 %v867_v29, %v2068_v51  ;;  %v1003_v45 = vadd.f32 %v1002_v39, %v940_v0 }
 0x19b   : > { %v869_v37 = vadd.f32 %v868_v33, %v2069_v55  ;;  %v1004_v46 = vadd.f32 %v1003_v45, %v941_v41 }
 0x19d   : > { %v870_v4 = vadd.f32 %v869_v37, %v2070_v42  ;;  %v1005_v40 = vadd.f32 %v1004_v46, %v942_v59 }
 0x19f   : > { %v871_v8 = vadd.f32 %v870_v4, %v2071_v49  ;;  %v1006_v12 = vadd.f32 %v1005_v40, %v943_v31 }
 0x1a1   : > { %v872_v54 = vadd.f32 %v871_v8, %v2072_v53  ;;  %v1007_v62 = vadd.f32 %v1006_v12, %v944_v50 }
 0x1a3   : > { %v873_v57 = vadd.f32 %v872_v54, %v2073_v58  ;;  %v1008_v16 = vadd.f32 %v1007_v62, %v945_v44 }
 0x1a5   : > { %v874_v61 = vadd.f32 %v873_v57, %v2074_v48  ;;  %v1009_v52 = vadd.f32 %v1008_v16, %v946_v35 }
 0x1a7   : > { %v875_v6 = vadd.f32 %v874_v61, %v2075_v23  ;;  %v1010_v14 = vadd.f32 %v1009_v52, %v947_v2 }
 0x1a9   : > { %v876_v15 = vadd.f32 %v875_v6, %v2076_v10  ;;  %v1011_v9 = vadd.f32 %v1010_v14, %v948_v1 }
 0x1ab   : > { %v877_v56 = vadd.f32 %v876_v15, %v2077_v27  ;;  %v1012_v22 = vadd.f32 %v1011_v9, %v949_v5 }
 0x1ad   : > { %v878_v20 = vrot.slane %v877_v56, 4  ;;  %v1013_v13 = vadd.f32 %v1012_v22, %v950_v18 }
 0x1af   : > { %v879_v7 = vadd.f32 %v878_v20, %v877_v56  ;;  %v1014_v11 = vrot.slane %v1013_v13, 4 }
 0x1b1   : > { %v880_v26 = vrot.slane %v879_v7, 2  ;;  %v1015_v30 = vadd.f32 %v1014_v11, %v1013_v13 }
 0x1b3   : > { %v881_v24 = vadd.f32 %v880_v26, %v879_v7  ;;  %v1016_v34 = vrot.slane %v1015_v30, 2 }
 0x1b5   : > { %v882_v17 = vrot.slane %v881_v24, 1  ;;  %v1017_v21 = vadd.f32 %v1016_v34, %v1015_v30 }
 0x1b7   : > { %v883_v63 = vadd.f32 %v882_v17, %v881_v24  ;;  %v1018_v28 = vrot.slane %v1017_v21, 1 }
 0x1b9   : > { %v884_v38 = vadd.f32 %v883_v63, %v814_v60  ;;  %v1019_v43 = vadd.f32 %v1018_v28, %v1017_v21 }
 0x1bb   : > { %885 = vst [vmem:[%s2028_s3] sm:$0x1] %v884_v38  ;;  %v1020_v25 = vadd.f32 %v1019_v43, %v886_v32 }
 0x1bd   : > { %1021 = vst [vmem:[%s2029_s4] sm:$0x1] %v1020_v25 }
 0x1be PF: > { %s15_s17 = sadd.s32 1, %s1442_s17   ;;  %s2078_s15 = smov %s1438_s16 }
 0x1bf   : > { %p12_p6 = scmp.ge.s32.totalorder %s15_s17, 6   ;;  %s2079_s16 = smov %s2081_s18 }
 0x1c1   :  { %14 = sbr.rel (!%p12_p6) target bundleno = 2 (0x2), region = 89 }

// kernel: dc_discriminator_forward.11
= control target key start
LH: loop header
LB: loop body
LE: loop exit
PB: predicated region body
PF: predicated region fallthrough
CT: control target
= control target key end

     0   :  { %s990_s12 = smov 0   ;;  %s1250_s0 = inlined_call_operand.vmem [shape: f32[2048,128], index: 0, kind: input, shape index: {}]   ;;  %s1251_s1 = inlined_call_operand.vmem [shape: f32[1,128], index: 1, kind: input, shape index: {}]   ;;  %s1252_s2 = inlined_call_operand.vmem [shape: f32[1,128], index: 2, kind: input, shape index: {}]   ;;  %s1253_s3 = inlined_call_operand.vmem [shape: bf16[2048,128], index: 3, kind: output, shape index: {}]  }
   0x1 LB: > { %s750_s13 = sadd.s32 4294967295, %s968_s12   ;;  %p754_p0 = scmp.ge.s32.totalorder %s968_s12, 1  ;;  %s968_s12 = sphi %s990_s12, %s13_s12  }
   0x2   : > { %p138_p1 = scmp.lt.s32.totalorder %s968_s12, 5 }
   0x4   : > { %p139_p2 = pnand %p754_p0, %p138_p1 }
   0x5   : > { %s755_s14 = sshll.u32 (!%p139_p2), %s750_s13, 6 }
   0x6   : > { %142 = sbr.rel (%p139_p2) target bundleno = 109 (0x6d), region = 32  ;;  %p163_p3 = scmp.lt.s32.totalorder (!%p139_p2), %s755_s14, 255 }
   0xb   : > { %s1255_s14 = smov (!%p163_p3, %s755_s14), 255  ;;  %v1003_v0 = vld [vmem:[%s1251_s1] ss:$0 sm:$0xff] }
   0xc   : > { %s756_s17 = sshll.u32 %s1255_s14, 3  ;;  %v1014_v1 = vld [vmem:[%s1252_s2] ss:$0 sm:$0xff]  ;;  %s758_s23 = sshll.u32 %s1255_s14, 2 }
   0xd   : > { %s1009_s20 = scalar_lea.vmem %s1250_s0, %s756_s17  ;;  %s1042_s26 = scalar_lea.vmem %s1253_s3, %s758_s23 }
   0xe   : > { %v174_v2 = vld [vmem:[%s1009_s20] sm:$0xff]  ;;  %v175_v3 = vld [vmem:[%s1009_s20 + $0x8] sm:$0xff]  ;;  %v176_v4 = vld [vmem:[%s1009_s20 + $0x10] sm:$0xff] }
   0xf   : > { %v242_v5 = vmul.f32 %v1003_v0, %v174_v2  ;;  %v243_v6 = vmul.f32 %v1003_v0, %v175_v3  ;;  %v177_v7 = vld [vmem:[%s1009_s20 + $0x18] sm:$0xff]  ;;  %v244_v8 = vmul.f32 %v1003_v0, %v176_v4  ;;  %v178_v9 = vld [vmem:[%s1009_s20 + $0x20] sm:$0xff]  ;;  %v179_v10 = vld [vmem:[%s1009_s20 + $0x28] sm:$0xff] }
  0x10   : > { %v245_v11 = vmul.f32 %v1003_v0, %v177_v7  ;;  %v246_v12 = vmul.f32 %v1003_v0, %v178_v9  ;;  %v247_v13 = vmul.f32 %v1003_v0, %v179_v10  ;;  %v180_v14 = vld [vmem:[%s1009_s20 + $0x30] sm:$0xff]  ;;  %v181_v15 = vld [vmem:[%s1009_s20 + $0x38] sm:$0xff]  ;;  %v182_v30 = vld [vmem:[%s1009_s20 + $0x40] sm:$0xff] }
  0x11   : > { %v310_v16 = vadd.f32 %v1014_v1, %v242_v5  ;;  %v311_v17 = vadd.f32 %v1014_v1, %v243_v6  ;;  %v312_v18 = vadd.f32 %v1014_v1, %v244_v8  ;;  %v248_v19 = vmul.f32 %v1003_v0, %v180_v14  ;;  %v183_v31 = vld [vmem:[%s1009_s20 + $0x48] sm:$0xff]  ;;  %v184_v32 = vld [vmem:[%s1009_s20 + $0x50] sm:$0xff]  ;;  %v185_v44 = vld [vmem:[%s1009_s20 + $0x58] sm:$0xff] }
  0x12   : > { %v313_v20 = vadd.f32 %v1014_v1, %v245_v11  ;;  %v314_v21 = vadd.f32 %v1014_v1, %v246_v12  ;;  %v315_v22 = vadd.f32 %v1014_v1, %v247_v13  ;;  %v249_v23 = vmul.f32 %v1003_v0, %v181_v15  ;;  %v186_v46 = vld [vmem:[%s1009_s20 + $0x60] sm:$0xff]  ;;  %v187_v56 = vld [vmem:[%s1009_s20 + $0x68] sm:$0xff]  ;;  %v188_v60 = vld [vmem:[%s1009_s20 + $0x70] sm:$0xff] }
  0x13   : > { %vm374_vm0 = vcmp.gt.f32.partialorder %v310_v16, 0.0  ;;  %vm375_vm1 = vcmp.gt.f32.partialorder %v311_v17, 0.0  ;;  %v438_v24 = vmul.f32 0.2, %v310_v16  ;;  %v439_v25 = vmul.f32 0.2, %v311_v17 }
  0x14   : > { %vm376_vm2 = vcmp.gt.f32.partialorder %v312_v18, 0.0  ;;  %vm377_vm3 = vcmp.gt.f32.partialorder %v313_v20, 0.0  ;;  %v440_v26 = vmul.f32 0.2, %v312_v18  ;;  %v441_v27 = vmul.f32 0.2, %v313_v20 }
  0x15   : > { %v502_v28 = vsel %vm374_vm0, %v310_v16, %v438_v24  ;;  %v503_v29 = vsel %vm375_vm1, %v311_v17, %v439_v25  ;;  %vm378_vm4 = vcmp.gt.f32.partialorder %v314_v21, 0.0  ;;  %vm379_vm5 = vcmp.gt.f32.partialorder %v315_v22, 0.0  ;;  %v189_v6 = vld [vmem:[%s1009_s20 + $0x78] sm:$0xff]  ;;  %v190_v10 = vld [vmem:[%s1009_s20 + $0x80] sm:$0xff] }
  0x16   : > { %v764_v33 = vpack.c.bf16 %v503_v29, %v502_v28  ;;  %v504_v34 = vsel %vm376_vm2, %v312_v18, %v440_v26  ;;  %v505_v35 = vsel %vm377_vm3, %v313_v20, %v441_v27  ;;  %v442_v36 = vmul.f32 0.2, %v314_v21  ;;  %v191_v18 = vld [vmem:[%s1009_s20 + $0x88] sm:$0xff]  ;;  %v193_v26 = vld [vmem:[%s1009_s20 + $0x98] sm:$0xff] }
  0x17   : > { %v769_v37 = vpack.c.bf16 %v505_v35, %v504_v34  ;;  %v443_v38 = vmul.f32 0.2, %v315_v22  ;;  %v316_v39 = vadd.f32 %v1014_v1, %v248_v19  ;;  %v317_v40 = vadd.f32 %v1014_v1, %v249_v23  ;;  %v192_v19 = vld [vmem:[%s1009_s20 + $0x90] sm:$0xff] }
  0x18   : > { %765 = vst [vmem:[%s1042_s26] sm:$0xff] %v764_v33   ;;  %v506_v41 = vsel %vm378_vm4, %v314_v21, %v442_v36  ;;  %v250_v42 = vmul.f32 %v1003_v0, %v182_v30  ;;  %v251_v43 = vmul.f32 %v1003_v0, %v183_v31  ;;  %v252_v45 = vmul.f32 %v1003_v0, %v184_v32  ;;  %v194_v31 = vld [vmem:[%s1009_s20 + $0xa0] sm:$0xff]  ;;  %v195_v32 = vld [vmem:[%s1009_s20 + $0xa8] sm:$0xff] }
  0x19   : > { %921 = vst [vmem:[%s1042_s26 + $0x8] sm:$0xff] %v769_v37   ;;  %v507_v47 = vsel %vm379_vm5, %v315_v22, %v443_v38  ;;  %vm380_vm6 = vcmp.gt.f32.partialorder %v316_v39, 0.0  ;;  %vm381_vm7 = vcmp.gt.f32.partialorder %v317_v40, 0.0  ;;  %v444_v48 = vmul.f32 0.2, %v316_v39 }
  0x1a   : > { %v774_v49 = vpack.c.bf16 %v507_v47, %v506_v41  ;;  %v445_v50 = vmul.f32 0.2, %v317_v40  ;;  %v318_v51 = vadd.f32 %v1014_v1, %v250_v42  ;;  %v319_v52 = vadd.f32 %v1014_v1, %v251_v43  ;;  %v196_v43 = vld [vmem:[%s1009_s20 + $0xb0] sm:$0xff] }
  0x1b   : > { %v508_v53 = vsel %vm380_vm6, %v316_v39, %v444_v48  ;;  %v253_v54 = vmul.f32 %v1003_v0, %v185_v44  ;;  %v320_v55 = vadd.f32 %v1014_v1, %v252_v45  ;;  %v254_v57 = vmul.f32 %v1003_v0, %v186_v46  ;;  %v197_v44 = vld [vmem:[%s1009_s20 + $0xb8] sm:$0xff] }
  0x1c   : > { %922 = vst [vmem:[%s1042_s26 + $0x10] sm:$0xff] %v774_v49   ;;  %v509_v58 = vsel %vm381_vm7, %v317_v40, %v445_v50  ;;  %vm382_vm8 = vcmp.gt.f32.partialorder %v318_v51, 0.0  ;;  %vm383_vm9 = vcmp.gt.f32.partialorder %v319_v52, 0.0  ;;  %v446_v59 = vmul.f32 0.2, %v318_v51 }
  0x1d   : > { %v779_v61 = vpack.c.bf16 %v509_v58, %v508_v53  ;;  %v447_v62 = vmul.f32 0.2, %v319_v52  ;;  %v321_v63 = vadd.f32 %v1014_v1, %v253_v54  ;;  %vm384_vm10 = vcmp.gt.f32.partialorder %v320_v55, 0.0 }
  0x1e   : > { %v510_v2 = vsel %vm382_vm8, %v318_v51, %v446_v59  ;;  %v448_v3 = vmul.f32 0.2, %v320_v55  ;;  %v255_v4 = vmul.f32 %v1003_v0, %v187_v56  ;;  %v322_v5 = vadd.f32 %v1014_v1, %v254_v57  ;;  %v199_v59 = vld [vmem:[%s1009_s20 + $0xc8] sm:$0xff] }
  0x1f   : > { %923 = vst [vmem:[%s1042_s26 + $0x18] sm:$0xff] %v779_v61   ;;  %v511_v7 = vsel %vm383_vm9, %v319_v52, %v447_v62  ;;  %vm385_vm11 = vcmp.gt.f32.partialorder %v321_v63, 0.0  ;;  %v449_v8 = vmul.f32 0.2, %v321_v63  ;;  %v256_v9 = vmul.f32 %v1003_v0, %v188_v60 }
  0x20   : > { %v784_v11 = vpack.c.bf16 %v511_v7, %v510_v2  ;;  %v512_v12 = vsel %vm384_vm10, %v320_v55, %v448_v3  ;;  %v323_v13 = vadd.f32 %v1014_v1, %v255_v4  ;;  %vm386_vm12 = vcmp.gt.f32.partialorder %v322_v5, 0.0  ;;  %v198_v55 = vld [vmem:[%s1009_s20 + $0xc0] sm:$0xff]  ;;  %v200_v4 = vld [vmem:[%s1009_s20 + $0xd0] sm:$0xff] }
  0x21   : > { %v513_v14 = vsel %vm385_vm11, %v321_v63, %v449_v8  ;;  %v450_v15 = vmul.f32 0.2, %v322_v5  ;;  %v257_v16 = vmul.f32 %v1003_v0, %v189_v6  ;;  %v324_v17 = vadd.f32 %v1014_v1, %v256_v9  ;;  %v201_v9 = vld [vmem:[%s1009_s20 + $0xd8] sm:$0xff] }
  0x22   : > { %924 = vst [vmem:[%s1042_s26 + $0x20] sm:$0xff] %v784_v11   ;;  %v789_v20 = vpack.c.bf16 %v513_v14, %v512_v12  ;;  %vm387_vm13 = vcmp.gt.f32.partialorder %v323_v13, 0.0  ;;  %v451_v21 = vmul.f32 0.2, %v323_v13  ;;  %v258_v22 = vmul.f32 %v1003_v0, %v190_v10  ;;  %v202_v10 = vld [vmem:[%s1009_s20 + $0xe0] sm:$0xff]  ;;  %v203_v11 = vld [vmem:[%s1009_s20 + $0xe8] sm:$0xff] }
  0x23   : > { %v514_v23 = vsel %vm386_vm12, %v322_v5, %v450_v15  ;;  %v325_v24 = vadd.f32 %v1014_v1, %v257_v16  ;;  %vm388_vm14 = vcmp.gt.f32.partialorder %v324_v17, 0.0  ;;  %v452_v25 = vmul.f32 0.2, %v324_v17 }
  0x24   : > { %925 = vst [vmem:[%s1042_s26 + $0x28] sm:$0xff] %v789_v20   ;;  %v515_v27 = vsel %vm387_vm13, %v323_v13, %v451_v21  ;;  %v259_v28 = vmul.f32 %v1003_v0, %v191_v18  ;;  %v326_v29 = vadd.f32 %v1014_v1, %v258_v22  ;;  %v260_v30 = vmul.f32 %v1003_v0, %v192_v19  ;;  %v204_v22 = vld [vmem:[%s1009_s20 + $0xf0] sm:$0xff] }
  0x25   : > { %v794_v33 = vpack.c.bf16 %v515_v27, %v514_v23  ;;  %vm389_vm15 = vcmp.gt.f32.partialorder %v325_v24, 0.0  ;;  %v453_v34 = vmul.f32 0.2, %v325_v24  ;;  %v516_v35 = vsel %vm388_vm14, %v324_v17, %v452_v25 }
  0x26   : > { %v327_v36 = vadd.f32 %v1014_v1, %v259_v28  ;;  %vm390_vm0 = vcmp.gt.f32.partialorder %v326_v29, 0.0  ;;  %v454_v37 = vmul.f32 0.2, %v326_v29  ;;  %v261_v38 = vmul.f32 %v1003_v0, %v193_v26 }
  0x27   : > { %926 = vst [vmem:[%s1042_s26 + $0x30] sm:$0xff] %v794_v33   ;;  %v517_v39 = vsel %vm389_vm15, %v325_v24, %v453_v34  ;;  %v328_v40 = vadd.f32 %v1014_v1, %v260_v30  ;;  %v262_v41 = vmul.f32 %v1003_v0, %v194_v31  ;;  %v263_v42 = vmul.f32 %v1003_v0, %v195_v32  ;;  %v205_v32 = vld [vmem:[%s1009_s20 + $0xf8] sm:$0xff]  ;;  %v206_v34 = vld [vmem:[%s1009_s20 + $0x100] sm:$0xff] }
  0x28   : > { %v799_v45 = vpack.c.bf16 %v517_v39, %v516_v35  ;;  %vm391_vm1 = vcmp.gt.f32.partialorder %v327_v36, 0.0  ;;  %v455_v46 = vmul.f32 0.2, %v327_v36  ;;  %v518_v47 = vsel %vm390_vm0, %v326_v29, %v454_v37  ;;  %v207_v37 = vld [vmem:[%s1009_s20 + $0x108] sm:$0xff] }
  0x29   : > { %v329_v48 = vadd.f32 %v1014_v1, %v261_v38  ;;  %vm392_vm2 = vcmp.gt.f32.partialorder %v328_v40, 0.0  ;;  %v456_v49 = vmul.f32 0.2, %v328_v40  ;;  %v330_v50 = vadd.f32 %v1014_v1, %v262_v41 }
  0x2a   : > { %927 = vst [vmem:[%s1042_s26 + $0x38] sm:$0xff] %v799_v45   ;;  %v519_v51 = vsel %vm391_vm1, %v327_v36, %v455_v46  ;;  %v331_v52 = vadd.f32 %v1014_v1, %v263_v42  ;;  %v264_v53 = vmul.f32 %v1003_v0, %v196_v43  ;;  %v265_v54 = vmul.f32 %v1003_v0, %v197_v44 }
  0x2b   : > { %v804_v56 = vpack.c.bf16 %v519_v51, %v518_v47  ;;  %vm393_vm3 = vcmp.gt.f32.partialorder %v329_v48, 0.0  ;;  %v457_v57 = vmul.f32 0.2, %v329_v48  ;;  %v520_v58 = vsel %vm392_vm2, %v328_v40, %v456_v49 }
  0x2c   : > { %vm394_vm4 = vcmp.gt.f32.partialorder %v330_v50, 0.0  ;;  %vm395_vm5 = vcmp.gt.f32.partialorder %v331_v52, 0.0  ;;  %v458_v60 = vmul.f32 0.2, %v330_v50  ;;  %v459_v61 = vmul.f32 0.2, %v331_v52 }
  0x2d   : > { %928 = vst [vmem:[%s1042_s26 + $0x40] sm:$0xff] %v804_v56   ;;  %v521_v62 = vsel %vm393_vm3, %v329_v48, %v457_v57  ;;  %v332_v63 = vadd.f32 %v1014_v1, %v264_v53  ;;  %v333_v2 = vadd.f32 %v1014_v1, %v265_v54  ;;  %v266_v3 = vmul.f32 %v1003_v0, %v198_v55  ;;  %v208_v48 = vld [vmem:[%s1009_s20 + $0x110] sm:$0xff]  ;;  %v209_v53 = vld [vmem:[%s1009_s20 + $0x118] sm:$0xff] }
  0x2e   : > { %v809_v5 = vpack.c.bf16 %v521_v62, %v520_v58  ;;  %v522_v6 = vsel %vm394_vm4, %v330_v50, %v458_v60  ;;  %v523_v7 = vsel %vm395_vm5, %v331_v52, %v459_v61  ;;  %v267_v8 = vmul.f32 %v1003_v0, %v199_v59  ;;  %v210_v60 = vld [vmem:[%s1009_s20 + $0x120] sm:$0xff] }
  0x2f   : > { %v814_v12 = vpack.c.bf16 %v523_v7, %v522_v6  ;;  %vm396_vm6 = vcmp.gt.f32.partialorder %v332_v63, 0.0  ;;  %vm397_vm7 = vcmp.gt.f32.partialorder %v333_v2, 0.0  ;;  %v460_v13 = vmul.f32 0.2, %v332_v63 }
  0x30   : > { %929 = vst [vmem:[%s1042_s26 + $0x48] sm:$0xff] %v809_v5   ;;  %v461_v14 = vmul.f32 0.2, %v333_v2  ;;  %v334_v15 = vadd.f32 %v1014_v1, %v266_v3  ;;  %v335_v16 = vadd.f32 %v1014_v1, %v267_v8  ;;  %v268_v17 = vmul.f32 %v1003_v0, %v200_v4 }
  0x31   : > { %930 = vst [vmem:[%s1042_s26 + $0x50] sm:$0xff] %v814_v12   ;;  %v524_v18 = vsel %vm396_vm6, %v332_v63, %v460_v13  ;;  %v269_v19 = vmul.f32 %v1003_v0, %v201_v9  ;;  %v270_v20 = vmul.f32 %v1003_v0, %v202_v10  ;;  %v271_v21 = vmul.f32 %v1003_v0, %v203_v11  ;;  %v212_v10 = vld [vmem:[%s1009_s20 + $0x130] sm:$0xff]  ;;  %v213_v11 = vld [vmem:[%s1009_s20 + $0x138] sm:$0xff] }
  0x32   : > { %v525_v23 = vsel %vm397_vm7, %v333_v2, %v461_v14  ;;  %vm398_vm8 = vcmp.gt.f32.partialorder %v334_v15, 0.0  ;;  %vm399_vm9 = vcmp.gt.f32.partialorder %v335_v16, 0.0  ;;  %v462_v24 = vmul.f32 0.2, %v334_v15  ;;  %v211_v2 = vld [vmem:[%s1009_s20 + $0x128] sm:$0xff] }
  0x33   : > { %v819_v25 = vpack.c.bf16 %v525_v23, %v524_v18  ;;  %v463_v26 = vmul.f32 0.2, %v335_v16  ;;  %v336_v27 = vadd.f32 %v1014_v1, %v268_v17  ;;  %v337_v28 = vadd.f32 %v1014_v1, %v269_v19  ;;  %v215_v23 = vld [vmem:[%s1009_s20 + $0x148] sm:$0xff] }
  0x34   : > { %v526_v29 = vsel %vm398_vm8, %v334_v15, %v462_v24  ;;  %v338_v30 = vadd.f32 %v1014_v1, %v270_v20  ;;  %v339_v31 = vadd.f32 %v1014_v1, %v271_v21  ;;  %v272_v33 = vmul.f32 %v1003_v0, %v204_v22  ;;  %v214_v15 = vld [vmem:[%s1009_s20 + $0x140] sm:$0xff] }
  0x35   : > { %931 = vst [vmem:[%s1042_s26 + $0x58] sm:$0xff] %v819_v25   ;;  %v527_v35 = vsel %vm399_vm9, %v335_v16, %v463_v26  ;;  %vm400_vm10 = vcmp.gt.f32.partialorder %v336_v27, 0.0  ;;  %vm401_vm11 = vcmp.gt.f32.partialorder %v337_v28, 0.0  ;;  %v464_v36 = vmul.f32 0.2, %v336_v27 }
  0x36   : > { %v824_v38 = vpack.c.bf16 %v527_v35, %v526_v29  ;;  %v465_v39 = vmul.f32 0.2, %v337_v28  ;;  %vm402_vm12 = vcmp.gt.f32.partialorder %v338_v30, 0.0  ;;  %vm403_vm13 = vcmp.gt.f32.partialorder %v339_v31, 0.0  ;;  %v217_v35 = vld [vmem:[%s1009_s20 + $0x158] sm:$0xff] }
  0x37   : > { %v528_v40 = vsel %vm400_vm10, %v336_v27, %v464_v36  ;;  %v466_v41 = vmul.f32 0.2, %v338_v30  ;;  %v467_v42 = vmul.f32 0.2, %v339_v31  ;;  %v273_v43 = vmul.f32 %v1003_v0, %v205_v32  ;;  %v216_v27 = vld [vmem:[%s1009_s20 + $0x150] sm:$0xff] }
  0x38   : > { %932 = vst [vmem:[%s1042_s26 + $0x60] sm:$0xff] %v824_v38   ;;  %v529_v44 = vsel %vm401_vm11, %v337_v28, %v465_v39  ;;  %v340_v45 = vadd.f32 %v1014_v1, %v272_v33  ;;  %v274_v46 = vmul.f32 %v1003_v0, %v206_v34  ;;  %v275_v47 = vmul.f32 %v1003_v0, %v207_v37 }
  0x39   : > { %v829_v49 = vpack.c.bf16 %v529_v44, %v528_v40  ;;  %v530_v50 = vsel %vm402_vm12, %v338_v30, %v466_v41  ;;  %v531_v51 = vsel %vm403_vm13, %v339_v31, %v467_v42  ;;  %v341_v52 = vadd.f32 %v1014_v1, %v273_v43  ;;  %v218_v42 = vld [vmem:[%s1009_s20 + $0x160] sm:$0xff] }
  0x3a   : > { %v834_v54 = vpack.c.bf16 %v531_v51, %v530_v50  ;;  %vm404_vm14 = vcmp.gt.f32.partialorder %v340_v45, 0.0  ;;  %v468_v55 = vmul.f32 0.2, %v340_v45  ;;  %v342_v56 = vadd.f32 %v1014_v1, %v274_v46  ;;  %v219_v46 = vld [vmem:[%s1009_s20 + $0x168] sm:$0xff] }
  0x3b   : > { %933 = vst [vmem:[%s1042_s26 + $0x68] sm:$0xff] %v829_v49   ;;  %vm405_vm15 = vcmp.gt.f32.partialorder %v341_v52, 0.0  ;;  %v469_v57 = vmul.f32 0.2, %v341_v52  ;;  %v343_v58 = vadd.f32 %v1014_v1, %v275_v47  ;;  %v276_v59 = vmul.f32 %v1003_v0, %v208_v48 }
  0x3c   : > { %934 = vst [vmem:[%s1042_s26 + $0x70] sm:$0xff] %v834_v54   ;;  %v532_v61 = vsel %vm404_vm14, %v340_v45, %v468_v55  ;;  %vm406_vm0 = vcmp.gt.f32.partialorder %v342_v56, 0.0  ;;  %v470_v62 = vmul.f32 0.2, %v342_v56  ;;  %v277_v63 = vmul.f32 %v1003_v0, %v209_v53  ;;  %v220_v54 = vld [vmem:[%s1009_s20 + $0x170] sm:$0xff]  ;;  %v221_v55 = vld [vmem:[%s1009_s20 + $0x178] sm:$0xff] }
  0x3d   : > { %v533_v3 = vsel %vm405_vm15, %v341_v52, %v469_v57  ;;  %vm407_vm1 = vcmp.gt.f32.partialorder %v343_v58, 0.0  ;;  %v471_v4 = vmul.f32 0.2, %v343_v58  ;;  %v344_v5 = vadd.f32 %v1014_v1, %v276_v59  ;;  %v222_v59 = vld [vmem:[%s1009_s20 + $0x180] sm:$0xff] }
  0x3e   : > { %v839_v6 = vpack.c.bf16 %v533_v3, %v532_v61  ;;  %v534_v7 = vsel %vm406_vm0, %v342_v56, %v470_v62  ;;  %v345_v8 = vadd.f32 %v1014_v1, %v277_v63  ;;  %v278_v9 = vmul.f32 %v1003_v0, %v210_v60 }
  0x3f   : > { %v535_v12 = vsel %vm407_vm1, %v343_v58, %v471_v4  ;;  %vm408_vm2 = vcmp.gt.f32.partialorder %v344_v5, 0.0  ;;  %v472_v13 = vmul.f32 0.2, %v344_v5  ;;  %v279_v14 = vmul.f32 %v1003_v0, %v211_v2 }
  0x40   : > { %935 = vst [vmem:[%s1042_s26 + $0x78] sm:$0xff] %v839_v6   ;;  %v844_v16 = vpack.c.bf16 %v535_v12, %v534_v7  ;;  %vm409_vm3 = vcmp.gt.f32.partialorder %v345_v8, 0.0  ;;  %v473_v17 = vmul.f32 0.2, %v345_v8  ;;  %v346_v18 = vadd.f32 %v1014_v1, %v278_v9  ;;  %v224_v9 = vld [vmem:[%s1009_s20 + $0x190] sm:$0xff] }
  0x41   : > { %v536_v19 = vsel %vm408_vm2, %v344_v5, %v472_v13  ;;  %v347_v20 = vadd.f32 %v1014_v1, %v279_v14  ;;  %v280_v21 = vmul.f32 %v1003_v0, %v212_v10  ;;  %v281_v22 = vmul.f32 %v1003_v0, %v213_v11  ;;  %v223_v5 = vld [vmem:[%s1009_s20 + $0x188] sm:$0xff] }
  0x42   : > { %936 = vst [vmem:[%s1042_s26 + $0x80] sm:$0xff] %v844_v16   ;;  %v537_v24 = vsel %vm409_vm3, %v345_v8, %v473_v17  ;;  %vm410_vm4 = vcmp.gt.f32.partialorder %v346_v18, 0.0  ;;  %v474_v25 = vmul.f32 0.2, %v346_v18  ;;  %v282_v26 = vmul.f32 %v1003_v0, %v214_v15  ;;  %v225_v17 = vld [vmem:[%s1009_s20 + $0x198] sm:$0xff] }
  0x43   : > { %v849_v28 = vpack.c.bf16 %v537_v24, %v536_v19  ;;  %vm411_vm5 = vcmp.gt.f32.partialorder %v347_v20, 0.0  ;;  %v475_v29 = vmul.f32 0.2, %v347_v20  ;;  %v348_v30 = vadd.f32 %v1014_v1, %v280_v21  ;;  %v226_v24 = vld [vmem:[%s1009_s20 + $0x1a0] sm:$0xff] }
  0x44   : > { %v538_v31 = vsel %vm410_vm4, %v346_v18, %v474_v25  ;;  %v349_v32 = vadd.f32 %v1014_v1, %v281_v22  ;;  %v283_v33 = vmul.f32 %v1003_v0, %v215_v23  ;;  %v350_v34 = vadd.f32 %v1014_v1, %v282_v26 }
  0x45   : > { %937 = vst [vmem:[%s1042_s26 + $0x88] sm:$0xff] %v849_v28   ;;  %v539_v36 = vsel %vm411_vm5, %v347_v20, %v475_v29  ;;  %vm412_vm6 = vcmp.gt.f32.partialorder %v348_v30, 0.0  ;;  %v476_v37 = vmul.f32 0.2, %v348_v30  ;;  %v284_v38 = vmul.f32 %v1003_v0, %v216_v27  ;;  %v227_v28 = vld [vmem:[%s1009_s20 + $0x1a8] sm:$0xff] }
  0x46   : > { %v854_v39 = vpack.c.bf16 %v539_v36, %v538_v31  ;;  %vm413_vm7 = vcmp.gt.f32.partialorder %v349_v32, 0.0  ;;  %v477_v40 = vmul.f32 0.2, %v349_v32  ;;  %v351_v41 = vadd.f32 %v1014_v1, %v283_v33  ;;  %v228_v36 = vld [vmem:[%s1009_s20 + $0x1b0] sm:$0xff] }
  0x47   : > { %v540_v43 = vsel %vm412_vm6, %v348_v30, %v476_v37  ;;  %vm414_vm8 = vcmp.gt.f32.partialorder %v350_v34, 0.0  ;;  %v478_v44 = vmul.f32 0.2, %v350_v34  ;;  %v285_v45 = vmul.f32 %v1003_v0, %v217_v35  ;;  %v229_v37 = vld [vmem:[%s1009_s20 + $0x1b8] sm:$0xff] }
  0x48   : > { %938 = vst [vmem:[%s1042_s26 + $0x90] sm:$0xff] %v854_v39   ;;  %v541_v47 = vsel %vm413_vm7, %v349_v32, %v477_v40  ;;  %vm415_vm9 = vcmp.gt.f32.partialorder %v351_v41, 0.0  ;;  %v479_v48 = vmul.f32 0.2, %v351_v41  ;;  %v352_v49 = vadd.f32 %v1014_v1, %v284_v38 }
  0x49   : > { %v859_v50 = vpack.c.bf16 %v541_v47, %v540_v43  ;;  %v542_v51 = vsel %vm414_vm8, %v350_v34, %v478_v44  ;;  %v353_v52 = vadd.f32 %v1014_v1, %v285_v45  ;;  %v286_v53 = vmul.f32 %v1003_v0, %v218_v42 }
  0x4a   : > { %v543_v56 = vsel %vm415_vm9, %v351_v41, %v479_v48  ;;  %vm416_vm10 = vcmp.gt.f32.partialorder %v352_v49, 0.0  ;;  %v480_v57 = vmul.f32 0.2, %v352_v49  ;;  %v287_v58 = vmul.f32 %v1003_v0, %v219_v46  ;;  %v230_v41 = vld [vmem:[%s1009_s20 + $0x1c0] sm:$0xff] }
  0x4b   : > { %939 = vst [vmem:[%s1042_s26 + $0x98] sm:$0xff] %v859_v50   ;;  %v864_v60 = vpack.c.bf16 %v543_v56, %v542_v51  ;;  %vm417_vm11 = vcmp.gt.f32.partialorder %v353_v52, 0.0  ;;  %v481_v61 = vmul.f32 0.2, %v353_v52  ;;  %v354_v62 = vadd.f32 %v1014_v1, %v286_v53  ;;  %v232_v53 = vld [vmem:[%s1009_s20 + $0x1d0] sm:$0xff] }
  0x4c   : > { %v544_v63 = vsel %vm416_vm10, %v352_v49, %v480_v57  ;;  %v355_v2 = vadd.f32 %v1014_v1, %v287_v58  ;;  %v288_v3 = vmul.f32 %v1003_v0, %v220_v54  ;;  %v289_v4 = vmul.f32 %v1003_v0, %v221_v55  ;;  %v231_v49 = vld [vmem:[%s1009_s20 + $0x1c8] sm:$0xff] }
  0x4d   : > { %940 = vst [vmem:[%s1042_s26 + $0xa0] sm:$0xff] %v864_v60   ;;  %v545_v6 = vsel %vm417_vm11, %v353_v52, %v481_v61  ;;  %vm418_vm12 = vcmp.gt.f32.partialorder %v354_v62, 0.0  ;;  %v482_v7 = vmul.f32 0.2, %v354_v62  ;;  %v290_v8 = vmul.f32 %v1003_v0, %v222_v59  ;;  %v233_v61 = vld [vmem:[%s1009_s20 + $0x1d8] sm:$0xff] }
  0x4e   : > { %v869_v10 = vpack.c.bf16 %v545_v6, %v544_v63  ;;  %vm419_vm13 = vcmp.gt.f32.partialorder %v355_v2, 0.0  ;;  %v483_v11 = vmul.f32 0.2, %v355_v2  ;;  %v356_v12 = vadd.f32 %v1014_v1, %v288_v3  ;;  %v234_v6 = vld [vmem:[%s1009_s20 + $0x1e0] sm:$0xff] }
  0x4f   : > { %v546_v13 = vsel %vm418_vm12, %v354_v62, %v482_v7  ;;  %v357_v14 = vadd.f32 %v1014_v1, %v289_v4  ;;  %v291_v15 = vmul.f32 %v1003_v0, %v223_v5  ;;  %v358_v16 = vadd.f32 %v1014_v1, %v290_v8 }
  0x50   : > { %941 = vst [vmem:[%s1042_s26 + $0xa8] sm:$0xff] %v869_v10   ;;  %v547_v18 = vsel %vm419_vm13, %v355_v2, %v483_v11  ;;  %vm420_vm14 = vcmp.gt.f32.partialorder %v356_v12, 0.0  ;;  %v484_v19 = vmul.f32 0.2, %v356_v12  ;;  %v292_v20 = vmul.f32 %v1003_v0, %v224_v9  ;;  %v235_v10 = vld [vmem:[%s1009_s20 + $0x1e8] sm:$0xff] }
  0x51   : > { %v874_v21 = vpack.c.bf16 %v547_v18, %v546_v13  ;;  %vm421_vm15 = vcmp.gt.f32.partialorder %v357_v14, 0.0  ;;  %v485_v22 = vmul.f32 0.2, %v357_v14  ;;  %v359_v23 = vadd.f32 %v1014_v1, %v291_v15  ;;  %v236_v18 = vld [vmem:[%s1009_s20 + $0x1f0] sm:$0xff] }
  0x52   : > { %v548_v25 = vsel %vm420_vm14, %v356_v12, %v484_v19  ;;  %vm422_vm0 = vcmp.gt.f32.partialorder %v358_v16, 0.0  ;;  %v486_v26 = vmul.f32 0.2, %v358_v16  ;;  %v293_v27 = vmul.f32 %v1003_v0, %v225_v17  ;;  %v237_v19 = vld [vmem:[%s1009_s20 + $0x1f8] sm:$0xff] }
  0x53   : > { %942 = vst [vmem:[%s1042_s26 + $0xb0] sm:$0xff] %v874_v21   ;;  %v549_v29 = vsel %vm421_vm15, %v357_v14, %v485_v22  ;;  %vm423_vm1 = vcmp.gt.f32.partialorder %v359_v23, 0.0  ;;  %v487_v30 = vmul.f32 0.2, %v359_v23  ;;  %v360_v31 = vadd.f32 %v1014_v1, %v292_v20 }
  0x54   : > { %v879_v32 = vpack.c.bf16 %v549_v29, %v548_v25  ;;  %v550_v33 = vsel %vm422_vm0, %v358_v16, %v486_v26  ;;  %v361_v34 = vadd.f32 %v1014_v1, %v293_v27  ;;  %v294_v35 = vmul.f32 %v1003_v0, %v226_v24 }
  0x55   : > { %v551_v38 = vsel %vm423_vm1, %v359_v23, %v487_v30  ;;  %vm424_vm2 = vcmp.gt.f32.partialorder %v360_v31, 0.0  ;;  %v488_v39 = vmul.f32 0.2, %v360_v31  ;;  %v295_v40 = vmul.f32 %v1003_v0, %v227_v28 }
  0x56   : > { %943 = vst [vmem:[%s1042_s26 + $0xb8] sm:$0xff] %v879_v32   ;;  %v884_v42 = vpack.c.bf16 %v551_v38, %v550_v33  ;;  %vm425_vm3 = vcmp.gt.f32.partialorder %v361_v34, 0.0  ;;  %v489_v43 = vmul.f32 0.2, %v361_v34  ;;  %v362_v44 = vadd.f32 %v1014_v1, %v294_v35 }
  0x57   : > { %v552_v45 = vsel %vm424_vm2, %v360_v31, %v488_v39  ;;  %v363_v46 = vadd.f32 %v1014_v1, %v295_v40  ;;  %v296_v47 = vmul.f32 %v1003_v0, %v228_v36  ;;  %v297_v48 = vmul.f32 %v1003_v0, %v229_v37 }
  0x58   : > { %944 = vst [vmem:[%s1042_s26 + $0xc0] sm:$0xff] %v884_v42   ;;  %v553_v50 = vsel %vm425_vm3, %v361_v34, %v489_v43  ;;  %vm426_vm4 = vcmp.gt.f32.partialorder %v362_v44, 0.0  ;;  %v490_v51 = vmul.f32 0.2, %v362_v44  ;;  %v298_v52 = vmul.f32 %v1003_v0, %v230_v41 }
  0x59   : > { %v889_v54 = vpack.c.bf16 %v553_v50, %v552_v45  ;;  %vm427_vm5 = vcmp.gt.f32.partialorder %v363_v46, 0.0  ;;  %v491_v55 = vmul.f32 0.2, %v363_v46  ;;  %v364_v56 = vadd.f32 %v1014_v1, %v296_v47 }
  0x5a   : > { %v554_v57 = vsel %vm426_vm4, %v362_v44, %v490_v51  ;;  %v365_v58 = vadd.f32 %v1014_v1, %v297_v48  ;;  %v299_v59 = vmul.f32 %v1003_v0, %v231_v49  ;;  %v366_v60 = vadd.f32 %v1014_v1, %v298_v52 }
  0x5b   : > { %945 = vst [vmem:[%s1042_s26 + $0xc8] sm:$0xff] %v889_v54   ;;  %v555_v62 = vsel %vm427_vm5, %v363_v46, %v491_v55  ;;  %vm428_vm6 = vcmp.gt.f32.partialorder %v364_v56, 0.0  ;;  %v492_v63 = vmul.f32 0.2, %v364_v56  ;;  %v300_v2 = vmul.f32 %v1003_v0, %v232_v53 }
  0x5c   : > { %v894_v3 = vpack.c.bf16 %v555_v62, %v554_v57  ;;  %vm429_vm7 = vcmp.gt.f32.partialorder %v365_v58, 0.0  ;;  %v493_v4 = vmul.f32 0.2, %v365_v58  ;;  %v367_v5 = vadd.f32 %v1014_v1, %v299_v59 }
  0x5d   : > { %v556_v7 = vsel %vm428_vm6, %v364_v56, %v492_v63  ;;  %vm430_vm8 = vcmp.gt.f32.partialorder %v366_v60, 0.0  ;;  %v494_v8 = vmul.f32 0.2, %v366_v60  ;;  %v301_v9 = vmul.f32 %v1003_v0, %v233_v61 }
  0x5e   : > { %946 = vst [vmem:[%s1042_s26 + $0xd0] sm:$0xff] %v894_v3   ;;  %v557_v11 = vsel %vm429_vm7, %v365_v58, %v493_v4  ;;  %vm431_vm9 = vcmp.gt.f32.partialorder %v367_v5, 0.0  ;;  %v495_v12 = vmul.f32 0.2, %v367_v5  ;;  %v368_v13 = vadd.f32 %v1014_v1, %v300_v2 }
  0x5f   : > { %v899_v14 = vpack.c.bf16 %v557_v11, %v556_v7  ;;  %v558_v15 = vsel %vm430_vm8, %v366_v60, %v494_v8  ;;  %v369_v16 = vadd.f32 %v1014_v1, %v301_v9  ;;  %v302_v17 = vmul.f32 %v1003_v0, %v234_v6 }
  0x60   : > { %v559_v20 = vsel %vm431_vm9, %v367_v5, %v495_v12  ;;  %vm432_vm10 = vcmp.gt.f32.partialorder %v368_v13, 0.0  ;;  %v496_v21 = vmul.f32 0.2, %v368_v13  ;;  %v303_v22 = vmul.f32 %v1003_v0, %v235_v10 }
  0x61   : > { %947 = vst [vmem:[%s1042_s26 + $0xd8] sm:$0xff] %v899_v14   ;;  %v904_v23 = vpack.c.bf16 %v559_v20, %v558_v15  ;;  %vm433_vm11 = vcmp.gt.f32.partialorder %v369_v16, 0.0  ;;  %v497_v24 = vmul.f32 0.2, %v369_v16  ;;  %v370_v25 = vadd.f32 %v1014_v1, %v302_v17 }
  0x62   : > { %v560_v26 = vsel %vm432_vm10, %v368_v13, %v496_v21  ;;  %v371_v27 = vadd.f32 %v1014_v1, %v303_v22  ;;  %v304_v28 = vmul.f32 %v1003_v0, %v236_v18  ;;  %v305_v29 = vmul.f32 %v1003_v0, %v237_v19 }
  0x63   : > { %948 = vst [vmem:[%s1042_s26 + $0xe0] sm:$0xff] %v904_v23   ;;  %v561_v30 = vsel %vm433_vm11, %v369_v16, %v497_v24  ;;  %vm434_vm12 = vcmp.gt.f32.partialorder %v370_v25, 0.0  ;;  %v498_v31 = vmul.f32 0.2, %v370_v25 }
  0x64   : > { %v909_v32 = vpack.c.bf16 %v561_v30, %v560_v26  ;;  %vm435_vm13 = vcmp.gt.f32.partialorder %v371_v27, 0.0  ;;  %v499_v33 = vmul.f32 0.2, %v371_v27  ;;  %v372_v34 = vadd.f32 %v1014_v1, %v304_v28 }
  0x65   : > { %v562_v35 = vsel %vm434_vm12, %v370_v25, %v498_v31  ;;  %v373_v36 = vadd.f32 %v1014_v1, %v305_v29 }
  0x66   : > { %949 = vst [vmem:[%s1042_s26 + $0xe8] sm:$0xff] %v909_v32   ;;  %v563_v37 = vsel %vm435_vm13, %v371_v27, %v499_v33  ;;  %vm436_vm14 = vcmp.gt.f32.partialorder %v372_v34, 0.0  ;;  %v500_v38 = vmul.f32 0.2, %v372_v34 }
  0x67   : > { %v914_v39 = vpack.c.bf16 %v563_v37, %v562_v35  ;;  %vm437_vm15 = vcmp.gt.f32.partialorder %v373_v36, 0.0  ;;  %v501_v0 = vmul.f32 0.2, %v373_v36 }
  0x68   : > { %v564_v40 = vsel %vm436_vm14, %v372_v34, %v500_v38 }
  0x69   : > { %950 = vst [vmem:[%s1042_s26 + $0xf0] sm:$0xff] %v914_v39   ;;  %v565_v41 = vsel %vm437_vm15, %v373_v36, %v501_v0 }
  0x6a   : > { %v919_v42 = vpack.c.bf16 %v565_v41, %v564_v40 }
  0x6c   : > { %951 = vst [vmem:[%s1042_s26 + $0xf8] sm:$0xff] %v919_v42  }
  0x6d PF: > { %s13_s12 = sadd.s32 1, %s968_s12  }
  0x6e   : > { %p10_p4 = scmp.ge.s32.totalorder %s13_s12, 6  }
  0x70   :  { %12 = sbr.rel (!%p10_p4) target bundleno = 1 (0x1), region = 62 }

// kernel: dc_discriminator_forward.12
= control target key start
LH: loop header
LB: loop body
LE: loop exit
PB: predicated region body
PF: predicated region fallthrough
CT: control target
= control target key end

     0   :  { %s2443_s1 = inlined_call_operand.vmem [shape: bf16[256,128], index: 1, kind: input, shape index: {}]   ;;  %s2444_s0 = inlined_call_operand.vmem [shape: bf16[512,256], index: 0, kind: input, shape index: {}]   ;;  %s2445_s2 = inlined_call_operand.vmem [shape: f32[512,128], index: 2, kind: output, shape index: {0}]   ;;  %s2446_s3 = inlined_call_operand.vmem [shape: f32[1,128], index: 3, kind: output, shape index: {1}]   ;;  %s2447_s4 = inlined_call_operand.vmem [shape: f32[1,128], index: 4, kind: output, shape index: {2}]  }
   0x1   :  { %v1545_v0 = vld [vmem:[%s2443_s1 + $0x38] sm:$0xff]  ;;  %v1544_v2 = vld [vmem:[%s2443_s1 + $0x30] sm:$0xff]  ;;  %v1543_v4 = vld [vmem:[%s2443_s1 + $0x28] sm:$0xff] }
   0x2   :  { %v1553_v1 = vld [vmem:[%s2443_s1 + $0x78] sm:$0xff]  ;;  %526 = vmatpush.bf16.msra.mxu0 %v1545_v0  ;;  %v1552_v3 = vld [vmem:[%s2443_s1 + $0x70] sm:$0xff]  ;;  %1554 = vmatpush.bf16.msra.mxu2 %v1545_v0  ;;  %v1551_v5 = vld [vmem:[%s2443_s1 + $0x68] sm:$0xff] }
   0x3   :  { %695 = vmatpush.bf16.msra.mxu1 %v1553_v1  ;;  %1562 = vmatpush.bf16.msra.mxu3 %v1553_v1  ;;  %v1542_v6 = vld [vmem:[%s2443_s1 + $0x20] sm:$0xff]  ;;  %v1541_v8 = vld [vmem:[%s2443_s1 + $0x18] sm:$0xff]  ;;  %v1540_v10 = vld [vmem:[%s2443_s1 + $0x10] sm:$0xff] }
   0x4   :  { %v1550_v7 = vld [vmem:[%s2443_s1 + $0x60] sm:$0xff]  ;;  %v1549_v9 = vld [vmem:[%s2443_s1 + $0x58] sm:$0xff]  ;;  %v1548_v11 = vld [vmem:[%s2443_s1 + $0x50] sm:$0xff] }
   0x5   :  { %v1539_v12 = vld [vmem:[%s2443_s1 + $0x8] sm:$0xff]  ;;  %v1538_v14 = vld [vmem:[%s2443_s1] sm:$0xff]  ;;  %v1164_v22 = vld [vmem:[%s2444_s0 + $0x10] sm:$0xf] }
   0x6   :  { %527 = vmatpush.bf16.msra.mxu0 %v1544_v2  ;;  %1555 = vmatpush.bf16.msra.mxu2 %v1544_v2  ;;  %v1547_v13 = vld [vmem:[%s2443_s1 + $0x48] sm:$0xff]  ;;  %v1546_v15 = vld [vmem:[%s2443_s1 + $0x40] sm:$0xff]  ;;  %v1477_v23 = vld [vmem:[%s2444_s0 + $0x14] sm:$0xf0] }
   0x7   :  { %696 = vmatpush.bf16.msra.mxu1 %v1552_v3  ;;  %1563 = vmatpush.bf16.msra.mxu3 %v1552_v3  ;;  %v1156_v16 = vld [vmem:[%s2444_s0] sm:$0xf]  ;;  %v1475_v17 = vld [vmem:[%s2444_s0 + $0x4] sm:$0xf0]  ;;  %v1474_v18 = vld [vmem:[%s2444_s0 + $0x4] sm:$0xf]  ;;  %v1165_v26 = vor.u32 %v1477_v23, %v1164_v22 }
   0x8   :  { %v1158_v19 = vld [vmem:[%s2444_s0 + $0x8] sm:$0xf0]  ;;  %v1157_v20 = vor.u32 %v1475_v17, %v1156_v16  ;;  %v1476_v24 = vld [vmem:[%s2444_s0 + $0x14] sm:$0xf]  ;;  %v1166_v25 = vld [vmem:[%s2444_s0 + $0x18] sm:$0xf0] }
   0x9   :  { %v1161_v21 = vor.u32 %v1474_v18, %v1158_v19  ;;  %v1169_v27 = vor.u32 %v1476_v24, %v1166_v25  ;;  %v1284_v28 = vld [vmem:[%s2444_s0 + $0x100] sm:$0xf]  ;;  %v1507_v29 = vld [vmem:[%s2444_s0 + $0x104] sm:$0xf0]  ;;  %v1506_v30 = vld [vmem:[%s2444_s0 + $0x104] sm:$0xf] }
   0xa   :  { %528 = vmatpush.bf16.msra.mxu0 %v1543_v4  ;;  %1556 = vmatpush.bf16.msra.mxu2 %v1543_v4  ;;  %v1285_v31 = vor.u32 %v1507_v29, %v1284_v28  ;;  %v1286_v32 = vld [vmem:[%s2444_s0 + $0x108] sm:$0xf0]  ;;  %v1172_v34 = vld [vmem:[%s2444_s0 + $0x20] sm:$0xf]  ;;  %v1479_v35 = vld [vmem:[%s2444_s0 + $0x24] sm:$0xf0] }
   0xb   :  { %697 = vmatpush.bf16.msra.mxu1 %v1551_v5  ;;  %1564 = vmatpush.bf16.msra.mxu3 %v1551_v5  ;;  %v1289_v33 = vor.u32 %v1506_v30, %v1286_v32  ;;  %v1478_v36 = vld [vmem:[%s2444_s0 + $0x24] sm:$0xf]  ;;  %v1174_v37 = vld [vmem:[%s2444_s0 + $0x28] sm:$0xf0]  ;;  %v1173_v38 = vor.u32 %v1479_v35, %v1172_v34  ;;  %v1292_v40 = vld [vmem:[%s2444_s0 + $0x110] sm:$0xf] }
   0xc   :  { %v1177_v39 = vor.u32 %v1478_v36, %v1174_v37  ;;  %v1509_v41 = vld [vmem:[%s2444_s0 + $0x114] sm:$0xf0]  ;;  %v1508_v42 = vld [vmem:[%s2444_s0 + $0x114] sm:$0xf]  ;;  %v1294_v44 = vld [vmem:[%s2444_s0 + $0x118] sm:$0xf0] }
   0xd   :  { %v1293_v43 = vor.u32 %v1509_v41, %v1292_v40  ;;  %v1297_v45 = vor.u32 %v1508_v42, %v1294_v44  ;;  %v1180_v46 = vld [vmem:[%s2444_s0 + $0x30] sm:$0xf]  ;;  %v1481_v47 = vld [vmem:[%s2444_s0 + $0x34] sm:$0xf0]  ;;  %v1480_v48 = vld [vmem:[%s2444_s0 + $0x34] sm:$0xf] }
   0xe   :  { %529 = vmatpush.bf16.msra.mxu0 %v1542_v6  ;;  %1557 = vmatpush.bf16.msra.mxu2 %v1542_v6  ;;  %v1182_v49 = vld [vmem:[%s2444_s0 + $0x38] sm:$0xf0]  ;;  %v1181_v50 = vor.u32 %v1481_v47, %v1180_v46  ;;  %v1300_v52 = vld [vmem:[%s2444_s0 + $0x120] sm:$0xf]  ;;  %v1511_v53 = vld [vmem:[%s2444_s0 + $0x124] sm:$0xf0] }
   0xf   :  { %698 = vmatpush.bf16.msra.mxu1 %v1550_v7  ;;  %1565 = vmatpush.bf16.msra.mxu3 %v1550_v7  ;;  %v1185_v51 = vor.u32 %v1480_v48, %v1182_v49  ;;  %v1510_v54 = vld [vmem:[%s2444_s0 + $0x124] sm:$0xf]  ;;  %v1301_v55 = vor.u32 %v1511_v53, %v1300_v52  ;;  %v1302_v56 = vld [vmem:[%s2444_s0 + $0x128] sm:$0xf0]  ;;  %v1188_v58 = vld [vmem:[%s2444_s0 + $0x40] sm:$0xf] }
  0x10   :  { %v1305_v57 = vor.u32 %v1510_v54, %v1302_v56  ;;  %v1483_v59 = vld [vmem:[%s2444_s0 + $0x44] sm:$0xf0]  ;;  %v1482_v60 = vld [vmem:[%s2444_s0 + $0x44] sm:$0xf]  ;;  %v1190_v61 = vld [vmem:[%s2444_s0 + $0x48] sm:$0xf0] }
  0x11   :  { %v1189_v62 = vor.u32 %v1483_v59, %v1188_v58  ;;  %v1193_v63 = vor.u32 %v1482_v60, %v1190_v61  ;;  %v1308_v0 = vld [vmem:[%s2444_s0 + $0x130] sm:$0xf]  ;;  %v1513_v1 = vld [vmem:[%s2444_s0 + $0x134] sm:$0xf0]  ;;  %v1512_v2 = vld [vmem:[%s2444_s0 + $0x134] sm:$0xf] }
  0x12   :  { %530 = vmatpush.bf16.msra.mxu0 %v1541_v8  ;;  %1558 = vmatpush.bf16.msra.mxu2 %v1541_v8  ;;  %v1309_v3 = vor.u32 %v1513_v1, %v1308_v0  ;;  %v1310_v4 = vld [vmem:[%s2444_s0 + $0x138] sm:$0xf0]  ;;  %v1196_v6 = vld [vmem:[%s2444_s0 + $0x50] sm:$0xf]  ;;  %v1485_v7 = vld [vmem:[%s2444_s0 + $0x54] sm:$0xf0] }
  0x13   :  { %699 = vmatpush.bf16.msra.mxu1 %v1549_v9  ;;  %1566 = vmatpush.bf16.msra.mxu3 %v1549_v9  ;;  %v1313_v5 = vor.u32 %v1512_v2, %v1310_v4  ;;  %v1484_v8 = vld [vmem:[%s2444_s0 + $0x54] sm:$0xf]  ;;  %v1198_v9 = vld [vmem:[%s2444_s0 + $0x58] sm:$0xf0]  ;;  %v1318_v16 = vld [vmem:[%s2444_s0 + $0x148] sm:$0xf0] }
  0x14   :  { %v1204_v18 = vld [vmem:[%s2444_s0 + $0x60] sm:$0xf]  ;;  %v1487_v19 = vld [vmem:[%s2444_s0 + $0x64] sm:$0xf0]  ;;  %v1324_v24 = vld [vmem:[%s2444_s0 + $0x150] sm:$0xf] }
  0x15   :  { %v1205_v22 = vor.u32 %v1487_v19, %v1204_v18  ;;  %v1517_v25 = vld [vmem:[%s2444_s0 + $0x154] sm:$0xf0]  ;;  %v1326_v28 = vld [vmem:[%s2444_s0 + $0x158] sm:$0xf0]  ;;  %v1212_v30 = vld [vmem:[%s2444_s0 + $0x70] sm:$0xf] }
  0x16   :  { %531 = vmatpush.bf16.msra.mxu0 %v1540_v10  ;;  %1559 = vmatpush.bf16.msra.mxu2 %v1540_v10  ;;  %v1197_v10 = vor.u32 %v1485_v7, %v1196_v6  ;;  %v1488_v32 = vld [vmem:[%s2444_s0 + $0x74] sm:$0xf]  ;;  %v1332_v36 = vld [vmem:[%s2444_s0 + $0x160] sm:$0xf]  ;;  %v1519_v37 = vld [vmem:[%s2444_s0 + $0x164] sm:$0xf0] }
  0x17   :  { %700 = vmatpush.bf16.msra.mxu1 %v1548_v11  ;;  %1567 = vmatpush.bf16.msra.mxu3 %v1548_v11  ;;  %v1201_v11 = vor.u32 %v1484_v8, %v1198_v9  ;;  %v1334_v40 = vld [vmem:[%s2444_s0 + $0x168] sm:$0xf0]  ;;  %v1220_v42 = vld [vmem:[%s2444_s0 + $0x80] sm:$0xf]  ;;  %v1490_v44 = vld [vmem:[%s2444_s0 + $0x84] sm:$0xf] }
  0x18   :  { %v1521_v52 = vld [vmem:[%s2444_s0 + $0x174] sm:$0xf0]  ;;  %v1520_v53 = vld [vmem:[%s2444_s0 + $0x174] sm:$0xf]  ;;  %v1230_v2 = vld [vmem:[%s2444_s0 + $0x98] sm:$0xf0] }
  0x19   :  { %v1493_v0 = vld [vmem:[%s2444_s0 + $0x94] sm:$0xf0]  ;;  %v1492_v1 = vld [vmem:[%s2444_s0 + $0x94] sm:$0xf]  ;;  %v1348_v9 = vld [vmem:[%s2444_s0 + $0x180] sm:$0xf] }
  0x1a   :  { %532 = vmatpush.bf16.msra.mxu0 %v1539_v12  ;;  %1560 = vmatpush.bf16.msra.mxu2 %v1539_v12  ;;  %v1316_v12 = vld [vmem:[%s2444_s0 + $0x140] sm:$0xf] }
  0x1b   :  { %701 = vmatpush.bf16.msra.mxu1 %v1547_v13  ;;  %1568 = vmatpush.bf16.msra.mxu3 %v1547_v13  ;;  %v1515_v13 = vld [vmem:[%s2444_s0 + $0x144] sm:$0xf0] }
  0x1e   :  { %533 = vmatpush.bf16.msra.mxu0 %v1538_v14  ;;  %1561 = vmatpush.bf16.msra.mxu2 %v1538_v14  ;;  %v1514_v14 = vld [vmem:[%s2444_s0 + $0x144] sm:$0xf] }
  0x1f   :  { %702 = vmatpush.bf16.msra.mxu1 %v1546_v15  ;;  %1569 = vmatpush.bf16.msra.mxu3 %v1546_v15  ;;  %v1317_v15 = vor.u32 %v1515_v13, %v1316_v12  ;;  %v1321_v17 = vor.u32 %v1514_v14, %v1318_v16 }
  0x21   :  { %534 = vmatmul.bf16.vlgmr.msra.gmra.mxu0 %v1157_v20  ;;  %614 = vmatmul.bf16.vlgmr.msra.gmra.mxu2 %v1285_v31  ;;  %v1486_v20 = vld [vmem:[%s2444_s0 + $0x64] sm:$0xf]  ;;  %v1489_v31 = vld [vmem:[%s2444_s0 + $0x74] sm:$0xf0] }
  0x22   :  { %703 = vmatmul.bf16.vlgmr.msra.gmra.mxu1 %v1161_v21  ;;  %783 = vmatmul.bf16.vlgmr.msra.gmra.mxu3 %v1289_v33  ;;  %v1206_v21 = vld [vmem:[%s2444_s0 + $0x68] sm:$0xf0]  ;;  %v1214_v33 = vld [vmem:[%s2444_s0 + $0x78] sm:$0xf0]  ;;  %v1213_v34 = vor.u32 %v1489_v31, %v1212_v30 }
  0x23   :  { %v1209_v23 = vor.u32 %v1486_v20, %v1206_v21  ;;  %v1217_v35 = vor.u32 %v1488_v32, %v1214_v33 }
  0x31   :  { %539 = vmatmul.bf16.gmra.mxu0 %v1165_v26  ;;  %619 = vmatmul.bf16.gmra.mxu2 %v1293_v43  ;;  %v1516_v26 = vld [vmem:[%s2444_s0 + $0x154] sm:$0xf]  ;;  %v1491_v43 = vld [vmem:[%s2444_s0 + $0x84] sm:$0xf0] }
  0x32   :  { %708 = vmatmul.bf16.gmra.mxu1 %v1169_v27  ;;  %788 = vmatmul.bf16.gmra.mxu3 %v1297_v45  ;;  %v1325_v27 = vor.u32 %v1517_v25, %v1324_v24  ;;  %v1329_v29 = vor.u32 %v1516_v26, %v1326_v28  ;;  %v1222_v45 = vld [vmem:[%s2444_s0 + $0x88] sm:$0xf0]  ;;  %v1221_v46 = vor.u32 %v1491_v43, %v1220_v42  ;;  %v1236_v25 = vld [vmem:[%s2444_s0 + $0xa0] sm:$0xf]  ;;  %v1495_v26 = vld [vmem:[%s2444_s0 + $0xa4] sm:$0xf0] }
  0x33   :  { %v1225_v47 = vor.u32 %v1490_v44, %v1222_v45  ;;  %v1238_v28 = vld [vmem:[%s2444_s0 + $0xa8] sm:$0xf0]  ;;  %v1237_v31 = vor.u32 %v1495_v26, %v1236_v25  ;;  %v1358_v45 = vld [vmem:[%s2444_s0 + $0x198] sm:$0xf0] }
  0x41   :  { %544 = vmatmul.bf16.gmra.mxu0 %v1173_v38  ;;  %624 = vmatmul.bf16.gmra.mxu2 %v1301_v55  ;;  %v1518_v38 = vld [vmem:[%s2444_s0 + $0x164] sm:$0xf]  ;;  %v1342_v55 = vld [vmem:[%s2444_s0 + $0x178] sm:$0xf0] }
  0x42   :  { %713 = vmatmul.bf16.gmra.mxu1 %v1177_v39  ;;  %793 = vmatmul.bf16.gmra.mxu3 %v1305_v57  ;;  %v1333_v39 = vor.u32 %v1519_v37, %v1332_v36  ;;  %v1337_v41 = vor.u32 %v1518_v38, %v1334_v40  ;;  %v1345_v56 = vor.u32 %v1520_v53, %v1342_v55  ;;  %v1525_v40 = vld [vmem:[%s2444_s0 + $0x194] sm:$0xf0]  ;;  %v1244_v55 = vld [vmem:[%s2444_s0 + $0xb0] sm:$0xf] }
  0x51   :  { %549 = vmatmul.bf16.gmra.mxu0 %v1181_v50  ;;  %629 = vmatmul.bf16.gmra.mxu2 %v1309_v3 }
  0x52   :  { %718 = vmatmul.bf16.gmra.mxu1 %v1185_v51  ;;  %798 = vmatmul.bf16.gmra.mxu3 %v1313_v5  ;;  %v1340_v51 = vld [vmem:[%s2444_s0 + $0x170] sm:$0xf]  ;;  %v1233_v5 = vor.u32 %v1492_v1, %v1230_v2 }
  0x53   :  { %v1341_v54 = vor.u32 %v1521_v52, %v1340_v51 }
  0x61   :  { %554 = vmatmul.bf16.gmra.mxu0 %v1189_v62  ;;  %634 = vmatmul.bf16.gmra.mxu2 %v1317_v15  ;;  %v1350_v15 = vld [vmem:[%s2444_s0 + $0x188] sm:$0xf0] }
  0x62   :  { %723 = vmatmul.bf16.gmra.mxu1 %v1193_v63  ;;  %803 = vmatmul.bf16.gmra.mxu3 %v1321_v17  ;;  %v1228_v63 = vld [vmem:[%s2444_s0 + $0x90] sm:$0xf] }
  0x63   :  { %v1229_v4 = vor.u32 %v1493_v0, %v1228_v63 }
  0x71   :  { %559 = vmatmul.bf16.gmra.mxu0 %v1197_v10  ;;  %639 = vmatmul.bf16.gmra.mxu2 %v1325_v27  ;;  %v1523_v10 = vld [vmem:[%s2444_s0 + $0x184] sm:$0xf0]  ;;  %v1494_v27 = vld [vmem:[%s2444_s0 + $0xa4] sm:$0xf] }
  0x72   :  { %728 = vmatmul.bf16.gmra.mxu1 %v1201_v11  ;;  %808 = vmatmul.bf16.gmra.mxu3 %v1329_v29  ;;  %v1522_v11 = vld [vmem:[%s2444_s0 + $0x184] sm:$0xf]  ;;  %v1349_v14 = vor.u32 %v1523_v10, %v1348_v9  ;;  %v1241_v32 = vor.u32 %v1494_v27, %v1238_v28 }
  0x73   :  { %v1353_v16 = vor.u32 %v1522_v11, %v1350_v15  ;;  %v1366_v11 = vld [vmem:[%s2444_s0 + $0x1a8] sm:$0xf0] }
  0x81   :  { %564 = vmatmul.bf16.gmra.mxu0 %v1205_v22  ;;  %644 = vmatmul.bf16.gmra.mxu2 %v1333_v39  ;;  %v1356_v39 = vld [vmem:[%s2444_s0 + $0x190] sm:$0xf] }
  0x82   :  { %733 = vmatmul.bf16.gmra.mxu1 %v1209_v23  ;;  %813 = vmatmul.bf16.gmra.mxu3 %v1337_v41  ;;  %v1524_v41 = vld [vmem:[%s2444_s0 + $0x194] sm:$0xf]  ;;  %v1357_v44 = vor.u32 %v1525_v40, %v1356_v39 }
  0x83   :  { %v1528_v39 = vld [vmem:[%s2444_s0 + $0x1b4] sm:$0xf] }
  0x91   :  { %569 = vmatmul.bf16.gmra.mxu0 %v1213_v34  ;;  %649 = vmatmul.bf16.gmra.mxu2 %v1341_v54 }
  0x92   :  { %738 = vmatmul.bf16.gmra.mxu1 %v1217_v35  ;;  %818 = vmatmul.bf16.gmra.mxu3 %v1345_v56  ;;  %v1497_v56 = vld [vmem:[%s2444_s0 + $0xb4] sm:$0xf0] }
  0x9e   :  { %v535_v48 = vpop.f32.mrf.mxu0 }
  0x9f   :  { %v704_v49 = vpop.f32.mrf.mxu1 }
  0xa0   :  { %v705_v50 = vadd.f32 %v704_v49, %v535_v48 }
  0xa1   :  { %574 = vmatmul.bf16.gmra.mxu0 %v1221_v46  ;;  %654 = vmatmul.bf16.gmra.mxu2 %v1349_v14  ;;  %v1361_v46 = vor.u32 %v1524_v41, %v1358_v45 }
  0xa2   :  { %864 = vst [vmem:[%s2445_s2] sm:$0xff] %v705_v50  ;;  %743 = vmatmul.bf16.gmra.mxu1 %v1225_v47  ;;  %v1007_v60 = vmul.f32 %v705_v50, %v705_v50  ;;  %823 = vmatmul.bf16.gmra.mxu3 %v1353_v16 }
  0xa4   :  { %v615_v21 = vpop.f32.mrf.mxu2 }
  0xa5   :  { %v784_v22 = vpop.f32.mrf.mxu3 }
  0xa6   :  { %v537_v57 = vpop.f32.mrf.mxu0  ;;  %v1897_v30 = vadd.f32 %v784_v22, %v615_v21  ;;  %v1252_v21 = vld [vmem:[%s2444_s0 + $0xc0] sm:$0xf]  ;;  %v1499_v22 = vld [vmem:[%s2444_s0 + $0xc4] sm:$0xf0] }
  0xa7   :  { %v706_v58 = vpop.f32.mrf.mxu1  ;;  %v1253_v27 = vor.u32 %v1499_v22, %v1252_v21  ;;  %v1268_v21 = vld [vmem:[%s2444_s0 + $0xe0] sm:$0xf]  ;;  %v1503_v22 = vld [vmem:[%s2444_s0 + $0xe4] sm:$0xf0] }
  0xa8   :  { %v707_v59 = vadd.f32 %v706_v58, %v537_v57  ;;  %896 = vst [vmem:[%s2445_s2 + $0x100] sm:$0xff] %v1897_v30  ;;  %v1496_v57 = vld [vmem:[%s2444_s0 + $0xb4] sm:$0xf]  ;;  %v1246_v58 = vld [vmem:[%s2444_s0 + $0xb8] sm:$0xf0] }
  0xaa   :  { %865 = vst [vmem:[%s2445_s2 + $0x8] sm:$0xff] %v707_v59  ;;  %v935_v61 = vadd.f32 %v707_v59, %v705_v50  ;;  %v1008_v62 = vmul.f32 %v707_v59, %v707_v59 }
  0xac   :  { %v1071_v3 = vadd.f32 %v1008_v62, %v1007_v60  ;;  %v617_v36 = vpop.f32.mrf.mxu2  ;;  %v1249_v62 = vor.u32 %v1496_v57, %v1246_v58 }
  0xad   :  { %v786_v37 = vpop.f32.mrf.mxu3 }
  0xae   :  { %v540_v6 = vpop.f32.mrf.mxu0  ;;  %v1903_v38 = vadd.f32 %v786_v37, %v617_v36  ;;  %v1372_v36 = vld [vmem:[%s2444_s0 + $0x1b0] sm:$0xf]  ;;  %v1529_v37 = vld [vmem:[%s2444_s0 + $0x1b4] sm:$0xf0] }
  0xaf   :  { %v709_v7 = vpop.f32.mrf.mxu1 }
  0xb0   :  { %v710_v8 = vadd.f32 %v709_v7, %v540_v6  ;;  %897 = vst [vmem:[%s2445_s2 + $0x108] sm:$0xff] %v1903_v38  ;;  %v1527_v6 = vld [vmem:[%s2444_s0 + $0x1a4] sm:$0xf0]  ;;  %v1526_v7 = vld [vmem:[%s2444_s0 + $0x1a4] sm:$0xf] }
  0xb1   :  { %579 = vmatmul.bf16.gmra.mxu0 %v1229_v4  ;;  %659 = vmatmul.bf16.gmra.mxu2 %v1357_v44 }
  0xb2   :  { %866 = vst [vmem:[%s2445_s2 + $0x10] sm:$0xff] %v710_v8  ;;  %v936_v12 = vadd.f32 %v935_v61, %v710_v8  ;;  %v1009_v13 = vmul.f32 %v710_v8, %v710_v8  ;;  %748 = vmatmul.bf16.gmra.mxu1 %v1233_v5  ;;  %828 = vmatmul.bf16.gmra.mxu3 %v1361_v46  ;;  %v1364_v5 = vld [vmem:[%s2444_s0 + $0x1a0] sm:$0xf] }
  0xb3   :  { %v1245_v61 = vor.u32 %v1497_v56, %v1244_v55  ;;  %v1365_v10 = vor.u32 %v1527_v6, %v1364_v5  ;;  %v1500_v55 = vld [vmem:[%s2444_s0 + $0xd4] sm:$0xf]  ;;  %v1262_v56 = vld [vmem:[%s2444_s0 + $0xd8] sm:$0xf0]  ;;  %v1380_v5 = vld [vmem:[%s2444_s0 + $0x1c0] sm:$0xf] }
  0xb4   :  { %v1072_v17 = vadd.f32 %v1071_v3, %v1009_v13  ;;  %v620_v51 = vpop.f32.mrf.mxu2  ;;  %v1531_v6 = vld [vmem:[%s2444_s0 + $0x1c4] sm:$0xf0] }
  0xb5   :  { %v789_v52 = vpop.f32.mrf.mxu3 }
  0xb6   :  { %v542_v18 = vpop.f32.mrf.mxu0  ;;  %v1939_v60 = vadd.f32 %v789_v52, %v620_v51 }
  0xb7   :  { %v711_v19 = vpop.f32.mrf.mxu1 }
  0xb8   :  { %v712_v20 = vadd.f32 %v711_v19, %v542_v18  ;;  %898 = vst [vmem:[%s2445_s2 + $0x110] sm:$0xff] %v1939_v60 }
  0xba   :  { %867 = vst [vmem:[%s2445_s2 + $0x18] sm:$0xff] %v712_v20  ;;  %v937_v23 = vadd.f32 %v936_v12, %v712_v20  ;;  %v1010_v24 = vmul.f32 %v712_v20, %v712_v20  ;;  %v1369_v12 = vor.u32 %v1526_v7, %v1366_v11  ;;  %v1530_v7 = vld [vmem:[%s2444_s0 + $0x1c4] sm:$0xf]  ;;  %v1382_v11 = vld [vmem:[%s2444_s0 + $0x1c8] sm:$0xf0] }
  0xbc   :  { %v1073_v29 = vadd.f32 %v1072_v17, %v1010_v24  ;;  %v622_v2 = vpop.f32.mrf.mxu2  ;;  %v1254_v24 = vld [vmem:[%s2444_s0 + $0xc8] sm:$0xf0] }
  0xbd   :  { %v791_v3 = vpop.f32.mrf.mxu3 }
  0xbe   :  { %v545_v33 = vpop.f32.mrf.mxu0  ;;  %v1945_v4 = vadd.f32 %v791_v3, %v622_v2 }
  0xbf   :  { %v714_v34 = vpop.f32.mrf.mxu1 }
  0xc0   :  { %v715_v35 = vadd.f32 %v714_v34, %v545_v33  ;;  %899 = vst [vmem:[%s2445_s2 + $0x118] sm:$0xff] %v1945_v4 }
  0xc1   :  { %584 = vmatmul.bf16.gmra.mxu0 %v1237_v31  ;;  %664 = vmatmul.bf16.gmra.mxu2 %v1365_v10  ;;  %v1381_v10 = vor.u32 %v1531_v6, %v1380_v5 }
  0xc2   :  { %868 = vst [vmem:[%s2445_s2 + $0x20] sm:$0xff] %v715_v35  ;;  %v938_v42 = vadd.f32 %v937_v23, %v715_v35  ;;  %v1011_v43 = vmul.f32 %v715_v35, %v715_v35  ;;  %753 = vmatmul.bf16.gmra.mxu1 %v1241_v32  ;;  %833 = vmatmul.bf16.gmra.mxu3 %v1369_v12  ;;  %v1498_v23 = vld [vmem:[%s2444_s0 + $0xc4] sm:$0xf] }
  0xc3   :  { %v1257_v28 = vor.u32 %v1498_v23, %v1254_v24  ;;  %v1385_v12 = vor.u32 %v1530_v7, %v1382_v11  ;;  %v1502_v23 = vld [vmem:[%s2444_s0 + $0xe4] sm:$0xf]  ;;  %v1270_v24 = vld [vmem:[%s2444_s0 + $0xe8] sm:$0xf0] }
  0xc4   :  { %v1074_v47 = vadd.f32 %v1073_v29, %v1011_v43  ;;  %v625_v17 = vpop.f32.mrf.mxu2  ;;  %v1374_v43 = vld [vmem:[%s2444_s0 + $0x1b8] sm:$0xf0]  ;;  %v1534_v11 = vld [vmem:[%s2444_s0 + $0x1e4] sm:$0xf] }
  0xc5   :  { %v794_v18 = vpop.f32.mrf.mxu3  ;;  %v1377_v44 = vor.u32 %v1528_v39, %v1374_v43  ;;  %v1388_v39 = vld [vmem:[%s2444_s0 + $0x1d0] sm:$0xf] }
  0xc6   :  { %v547_v48 = vpop.f32.mrf.mxu0  ;;  %v1981_v26 = vadd.f32 %v794_v18, %v625_v17 }
  0xc7   :  { %v716_v49 = vpop.f32.mrf.mxu1 }
  0xc8   :  { %v717_v50 = vadd.f32 %v716_v49, %v547_v48  ;;  %900 = vst [vmem:[%s2445_s2 + $0x120] sm:$0xff] %v1981_v26 }
  0xca   :  { %869 = vst [vmem:[%s2445_s2 + $0x28] sm:$0xff] %v717_v50  ;;  %v939_v53 = vadd.f32 %v938_v42, %v717_v50  ;;  %v1012_v54 = vmul.f32 %v717_v50, %v717_v50  ;;  %v1373_v42 = vor.u32 %v1529_v37, %v1372_v36 }
  0xcc   :  { %v1075_v59 = vadd.f32 %v1074_v47, %v1012_v54  ;;  %v627_v33 = vpop.f32.mrf.mxu2  ;;  %v1501_v54 = vld [vmem:[%s2444_s0 + $0xd4] sm:$0xf0] }
  0xcd   :  { %v796_v34 = vpop.f32.mrf.mxu3 }
  0xce   :  { %v550_v63 = vpop.f32.mrf.mxu0  ;;  %v1987_v35 = vadd.f32 %v796_v34, %v627_v33 }
  0xcf   :  { %v719_v0 = vpop.f32.mrf.mxu1 }
  0xd0   :  { %v720_v1 = vadd.f32 %v719_v0, %v550_v63  ;;  %901 = vst [vmem:[%s2445_s2 + $0x128] sm:$0xff] %v1987_v35 }
  0xd1   :  { %589 = vmatmul.bf16.gmra.mxu0 %v1245_v61  ;;  %669 = vmatmul.bf16.gmra.mxu2 %v1373_v42  ;;  %v1265_v61 = vor.u32 %v1500_v55, %v1262_v56  ;;  %v1276_v55 = vld [vmem:[%s2444_s0 + $0xf0] sm:$0xf]  ;;  %v1505_v56 = vld [vmem:[%s2444_s0 + $0xf4] sm:$0xf0] }
  0xd2   :  { %870 = vst [vmem:[%s2445_s2 + $0x30] sm:$0xff] %v720_v1  ;;  %v940_v8 = vadd.f32 %v939_v53, %v720_v1  ;;  %v1013_v9 = vmul.f32 %v720_v1, %v720_v1  ;;  %758 = vmatmul.bf16.gmra.mxu1 %v1249_v62  ;;  %838 = vmatmul.bf16.gmra.mxu3 %v1377_v44  ;;  %v1260_v53 = vld [vmem:[%s2444_s0 + $0xd0] sm:$0xf] }
  0xd4   :  { %v1076_v13 = vadd.f32 %v1075_v59, %v1013_v9  ;;  %v630_v49 = vpop.f32.mrf.mxu2  ;;  %v1261_v59 = vor.u32 %v1501_v54, %v1260_v53 }
  0xd5   :  { %v799_v50 = vpop.f32.mrf.mxu3 }
  0xd6   :  { %v552_v14 = vpop.f32.mrf.mxu0  ;;  %v2023_v58 = vadd.f32 %v799_v50, %v630_v49 }
  0xd7   :  { %v721_v15 = vpop.f32.mrf.mxu1 }
  0xd8   :  { %v722_v16 = vadd.f32 %v721_v15, %v552_v14  ;;  %902 = vst [vmem:[%s2445_s2 + $0x130] sm:$0xff] %v2023_v58 }
  0xda   :  { %871 = vst [vmem:[%s2445_s2 + $0x38] sm:$0xff] %v722_v16  ;;  %v941_v19 = vadd.f32 %v940_v8, %v722_v16  ;;  %v1014_v20 = vmul.f32 %v722_v16, %v722_v16 }
  0xdc   :  { %v1077_v25 = vadd.f32 %v1076_v13, %v1014_v20  ;;  %v632_v1 = vpop.f32.mrf.mxu2 }
  0xdd   :  { %v801_v2 = vpop.f32.mrf.mxu3 }
  0xde   :  { %v555_v29 = vpop.f32.mrf.mxu0  ;;  %v2029_v3 = vadd.f32 %v801_v2, %v632_v1 }
  0xdf   :  { %v724_v31 = vpop.f32.mrf.mxu1 }
  0xe0   :  { %v725_v32 = vadd.f32 %v724_v31, %v555_v29  ;;  %903 = vst [vmem:[%s2445_s2 + $0x138] sm:$0xff] %v2029_v3  ;;  %v1273_v29 = vor.u32 %v1502_v23, %v1270_v24 }
  0xe1   :  { %594 = vmatmul.bf16.gmra.mxu0 %v1253_v27  ;;  %674 = vmatmul.bf16.gmra.mxu2 %v1381_v10  ;;  %v1535_v10 = vld [vmem:[%s2444_s0 + $0x1e4] sm:$0xf0] }
  0xe2   :  { %872 = vst [vmem:[%s2445_s2 + $0x40] sm:$0xff] %v725_v32  ;;  %v942_v40 = vadd.f32 %v941_v19, %v725_v32  ;;  %v1015_v41 = vmul.f32 %v725_v32, %v725_v32  ;;  %763 = vmatmul.bf16.gmra.mxu1 %v1257_v28  ;;  %843 = vmatmul.bf16.gmra.mxu3 %v1385_v12 }
  0xe3   :  { %v1269_v28 = vor.u32 %v1503_v22, %v1268_v21 }
  0xe4   :  { %v1078_v45 = vadd.f32 %v1077_v25, %v1015_v41  ;;  %v635_v17 = vpop.f32.mrf.mxu2  ;;  %v1532_v41 = vld [vmem:[%s2444_s0 + $0x1d4] sm:$0xf] }
  0xe5   :  { %v804_v18 = vpop.f32.mrf.mxu3 }
  0xe6   :  { %v557_v46 = vpop.f32.mrf.mxu0  ;;  %v2065_v27 = vadd.f32 %v804_v18, %v635_v17 }
  0xe7   :  { %v726_v47 = vpop.f32.mrf.mxu1 }
  0xe8   :  { %v727_v48 = vadd.f32 %v726_v47, %v557_v46  ;;  %904 = vst [vmem:[%s2445_s2 + $0x140] sm:$0xff] %v2065_v27 }
  0xea   :  { %873 = vst [vmem:[%s2445_s2 + $0x48] sm:$0xff] %v727_v48  ;;  %v943_v51 = vadd.f32 %v942_v40, %v727_v48  ;;  %v1016_v52 = vmul.f32 %v727_v48, %v727_v48  ;;  %v1533_v40 = vld [vmem:[%s2444_s0 + $0x1d4] sm:$0xf0] }
  0xeb   :  { %v1389_v44 = vor.u32 %v1533_v40, %v1388_v39  ;;  %v1404_v39 = vld [vmem:[%s2444_s0 + $0x1f0] sm:$0xf]  ;;  %v1537_v40 = vld [vmem:[%s2444_s0 + $0x1f4] sm:$0xf0] }
  0xec   :  { %v1079_v57 = vadd.f32 %v1078_v45, %v1016_v52  ;;  %v637_v34 = vpop.f32.mrf.mxu2  ;;  %v1390_v45 = vld [vmem:[%s2444_s0 + $0x1d8] sm:$0xf0] }
  0xed   :  { %v806_v36 = vpop.f32.mrf.mxu3  ;;  %v1393_v46 = vor.u32 %v1532_v41, %v1390_v45  ;;  %v1536_v41 = vld [vmem:[%s2444_s0 + $0x1f4] sm:$0xf]  ;;  %v1406_v45 = vld [vmem:[%s2444_s0 + $0x1f8] sm:$0xf0] }
  0xee   :  { %v560_v62 = vpop.f32.mrf.mxu0  ;;  %v2071_v37 = vadd.f32 %v806_v36, %v637_v34 }
  0xef   :  { %v729_v63 = vpop.f32.mrf.mxu1 }
  0xf0   :  { %v730_v0 = vadd.f32 %v729_v63, %v560_v62  ;;  %905 = vst [vmem:[%s2445_s2 + $0x148] sm:$0xff] %v2071_v37  ;;  %v1277_v63 = vor.u32 %v1505_v56, %v1276_v55 }
  0xf1   :  { %599 = vmatmul.bf16.gmra.mxu0 %v1261_v59  ;;  %679 = vmatmul.bf16.gmra.mxu2 %v1389_v44  ;;  %v1278_v59 = vld [vmem:[%s2444_s0 + $0xf8] sm:$0xf0]  ;;  %v1405_v44 = vor.u32 %v1537_v40, %v1404_v39 }
  0xf2   :  { %874 = vst [vmem:[%s2445_s2 + $0x50] sm:$0xff] %v730_v0  ;;  %v944_v8 = vadd.f32 %v943_v51, %v730_v0  ;;  %v1017_v9 = vmul.f32 %v730_v0, %v730_v0  ;;  %768 = vmatmul.bf16.gmra.mxu1 %v1265_v61  ;;  %848 = vmatmul.bf16.gmra.mxu3 %v1393_v46 }
  0xf3   :  { %v1409_v46 = vor.u32 %v1536_v41, %v1406_v45 }
  0xf4   :  { %v1080_v13 = vadd.f32 %v1079_v57, %v1017_v9  ;;  %v640_v51 = vpop.f32.mrf.mxu2  ;;  %v1504_v57 = vld [vmem:[%s2444_s0 + $0xf4] sm:$0xf]  ;;  %v1396_v9 = vld [vmem:[%s2444_s0 + $0x1e0] sm:$0xf] }
  0xf5   :  { %v809_v52 = vpop.f32.mrf.mxu3  ;;  %v1281_v0 = vor.u32 %v1504_v57, %v1278_v59 }
  0xf6   :  { %v562_v14 = vpop.f32.mrf.mxu0  ;;  %v2107_v62 = vadd.f32 %v809_v52, %v640_v51 }
  0xf7   :  { %v731_v15 = vpop.f32.mrf.mxu1 }
  0xf8   :  { %v732_v16 = vadd.f32 %v731_v15, %v562_v14  ;;  %906 = vst [vmem:[%s2445_s2 + $0x150] sm:$0xff] %v2107_v62  ;;  %v1397_v14 = vor.u32 %v1535_v10, %v1396_v9  ;;  %v1398_v15 = vld [vmem:[%s2444_s0 + $0x1e8] sm:$0xf0] }
  0xfa   :  { %875 = vst [vmem:[%s2445_s2 + $0x58] sm:$0xff] %v732_v16  ;;  %v945_v19 = vadd.f32 %v944_v8, %v732_v16  ;;  %v1018_v20 = vmul.f32 %v732_v16, %v732_v16  ;;  %v1401_v16 = vor.u32 %v1534_v11, %v1398_v15 }
  0xfc   :  { %v1081_v25 = vadd.f32 %v1080_v13, %v1018_v20  ;;  %v642_v6 = vpop.f32.mrf.mxu2 }
  0xfd   :  { %v811_v7 = vpop.f32.mrf.mxu3 }
  0xfe   :  { %v565_v31 = vpop.f32.mrf.mxu0  ;;  %v2113_v8 = vadd.f32 %v811_v7, %v642_v6 }
  0xff   :  { %v734_v32 = vpop.f32.mrf.mxu1 }
 0x100   :  { %v735_v33 = vadd.f32 %v734_v32, %v565_v31  ;;  %907 = vst [vmem:[%s2445_s2 + $0x158] sm:$0xff] %v2113_v8 }
 0x101   :  { %604 = vmatmul.bf16.gmra.mxu0 %v1269_v28  ;;  %684 = vmatmul.bf16.gmra.mxu2 %v1397_v14 }
 0x102   :  { %876 = vst [vmem:[%s2445_s2 + $0x60] sm:$0xff] %v735_v33  ;;  %v946_v42 = vadd.f32 %v945_v19, %v735_v33  ;;  %v1019_v43 = vmul.f32 %v735_v33, %v735_v33  ;;  %773 = vmatmul.bf16.gmra.mxu1 %v1273_v29  ;;  %853 = vmatmul.bf16.gmra.mxu3 %v1401_v16 }
 0x104   :  { %v1082_v47 = vadd.f32 %v1081_v25, %v1019_v43  ;;  %v645_v21 = vpop.f32.mrf.mxu2 }
 0x105   :  { %v814_v22 = vpop.f32.mrf.mxu3 }
 0x106   :  { %v567_v48 = vpop.f32.mrf.mxu0  ;;  %v2137_v28 = vadd.f32 %v814_v22, %v645_v21 }
 0x107   :  { %v736_v49 = vpop.f32.mrf.mxu1 }
 0x108   :  { %v737_v50 = vadd.f32 %v736_v49, %v567_v48  ;;  %908 = vst [vmem:[%s2445_s2 + $0x160] sm:$0xff] %v2137_v28 }
 0x10a   :  { %877 = vst [vmem:[%s2445_s2 + $0x68] sm:$0xff] %v737_v50  ;;  %v947_v53 = vadd.f32 %v946_v42, %v737_v50  ;;  %v1020_v54 = vmul.f32 %v737_v50, %v737_v50 }
 0x10c   :  { %v1083_v61 = vadd.f32 %v1082_v47, %v1020_v54  ;;  %v647_v33 = vpop.f32.mrf.mxu2 }
 0x10d   :  { %v816_v34 = vpop.f32.mrf.mxu3 }
 0x10e   :  { %v570_v1 = vpop.f32.mrf.mxu0  ;;  %v2143_v36 = vadd.f32 %v816_v34, %v647_v33 }
 0x10f   :  { %v739_v2 = vpop.f32.mrf.mxu1 }
 0x110   :  { %v740_v5 = vadd.f32 %v739_v2, %v570_v1  ;;  %909 = vst [vmem:[%s2445_s2 + $0x168] sm:$0xff] %v2143_v36 }
 0x111   :  { %609 = vmatmul.bf16.gmra.mxu0 %v1277_v63  ;;  %689 = vmatmul.bf16.gmra.mxu2 %v1405_v44 }
 0x112   :  { %878 = vst [vmem:[%s2445_s2 + $0x70] sm:$0xff] %v740_v5  ;;  %v948_v12 = vadd.f32 %v947_v53, %v740_v5  ;;  %v1021_v13 = vmul.f32 %v740_v5, %v740_v5  ;;  %778 = vmatmul.bf16.gmra.mxu1 %v1281_v0  ;;  %858 = vmatmul.bf16.gmra.mxu3 %v1409_v46 }
 0x114   :  { %v1084_v17 = vadd.f32 %v1083_v61, %v1021_v13  ;;  %v650_v51 = vpop.f32.mrf.mxu2 }
 0x115   :  { %v819_v52 = vpop.f32.mrf.mxu3 }
 0x116   :  { %v572_v18 = vpop.f32.mrf.mxu0  ;;  %v2167_v56 = vadd.f32 %v819_v52, %v650_v51 }
 0x117   :  { %v741_v19 = vpop.f32.mrf.mxu1 }
 0x118   :  { %v742_v20 = vadd.f32 %v741_v19, %v572_v18  ;;  %910 = vst [vmem:[%s2445_s2 + $0x170] sm:$0xff] %v2167_v56 }
 0x11a   :  { %879 = vst [vmem:[%s2445_s2 + $0x78] sm:$0xff] %v742_v20  ;;  %v949_v23 = vadd.f32 %v948_v12, %v742_v20  ;;  %v1022_v24 = vmul.f32 %v742_v20, %v742_v20 }
 0x11c   :  { %v1085_v25 = vadd.f32 %v1084_v17, %v1022_v24  ;;  %v652_v63 = vpop.f32.mrf.mxu2 }
 0x11d   :  { %v821_v0 = vpop.f32.mrf.mxu3 }
 0x11e   :  { %v575_v29 = vpop.f32.mrf.mxu0  ;;  %v2173_v1 = vadd.f32 %v821_v0, %v652_v63 }
 0x11f   :  { %v744_v31 = vpop.f32.mrf.mxu1 }
 0x120   :  { %v745_v32 = vadd.f32 %v744_v31, %v575_v29  ;;  %911 = vst [vmem:[%s2445_s2 + $0x178] sm:$0xff] %v2173_v1 }
 0x122   :  { %880 = vst [vmem:[%s2445_s2 + $0x80] sm:$0xff] %v745_v32  ;;  %v950_v42 = vadd.f32 %v949_v23, %v745_v32  ;;  %v1023_v43 = vmul.f32 %v745_v32, %v745_v32 }
 0x124   :  { %v1086_v47 = vadd.f32 %v1085_v25, %v1023_v43  ;;  %v655_v11 = vpop.f32.mrf.mxu2 }
 0x125   :  { %v824_v12 = vpop.f32.mrf.mxu3 }
 0x126   :  { %v577_v48 = vpop.f32.mrf.mxu0  ;;  %v2185_v16 = vadd.f32 %v824_v12, %v655_v11 }
 0x127   :  { %v746_v49 = vpop.f32.mrf.mxu1 }
 0x128   :  { %v747_v50 = vadd.f32 %v746_v49, %v577_v48  ;;  %912 = vst [vmem:[%s2445_s2 + $0x180] sm:$0xff] %v2185_v16 }
 0x12a   :  { %881 = vst [vmem:[%s2445_s2 + $0x88] sm:$0xff] %v747_v50  ;;  %v951_v53 = vadd.f32 %v950_v42, %v747_v50  ;;  %v1024_v54 = vmul.f32 %v747_v50, %v747_v50 }
 0x12c   :  { %v1087_v55 = vadd.f32 %v1086_v47, %v1024_v54  ;;  %v657_v20 = vpop.f32.mrf.mxu2 }
 0x12d   :  { %v826_v21 = vpop.f32.mrf.mxu3 }
 0x12e   :  { %v580_v57 = vpop.f32.mrf.mxu0  ;;  %v2191_v22 = vadd.f32 %v826_v21, %v657_v20 }
 0x12f   :  { %v749_v59 = vpop.f32.mrf.mxu1 }
 0x130   :  { %v750_v61 = vadd.f32 %v749_v59, %v580_v57  ;;  %913 = vst [vmem:[%s2445_s2 + $0x188] sm:$0xff] %v2191_v22 }
 0x132   :  { %882 = vst [vmem:[%s2445_s2 + $0x90] sm:$0xff] %v750_v61  ;;  %v952_v2 = vadd.f32 %v951_v53, %v750_v61  ;;  %v1025_v5 = vmul.f32 %v750_v61, %v750_v61 }
 0x134   :  { %v1088_v6 = vadd.f32 %v1087_v55, %v1025_v5  ;;  %v660_v33 = vpop.f32.mrf.mxu2 }
 0x135   :  { %v829_v34 = vpop.f32.mrf.mxu3 }
 0x136   :  { %v582_v7 = vpop.f32.mrf.mxu0  ;;  %v2210_v39 = vadd.f32 %v829_v34, %v660_v33 }
 0x137   :  { %v751_v9 = vpop.f32.mrf.mxu1 }
 0x138   :  { %v752_v10 = vadd.f32 %v751_v9, %v582_v7  ;;  %914 = vst [vmem:[%s2445_s2 + $0x190] sm:$0xff] %v2210_v39 }
 0x13a   :  { %883 = vst [vmem:[%s2445_s2 + $0x98] sm:$0xff] %v752_v10  ;;  %v953_v13 = vadd.f32 %v952_v2, %v752_v10  ;;  %v1026_v14 = vmul.f32 %v752_v10, %v752_v10 }
 0x13c   :  { %v1089_v15 = vadd.f32 %v1088_v6, %v1026_v14  ;;  %v662_v43 = vpop.f32.mrf.mxu2 }
 0x13d   :  { %v831_v44 = vpop.f32.mrf.mxu3 }
 0x13e   :  { %v585_v17 = vpop.f32.mrf.mxu0  ;;  %v2216_v45 = vadd.f32 %v831_v44, %v662_v43 }
 0x13f   :  { %v754_v18 = vpop.f32.mrf.mxu1 }
 0x140   :  { %v755_v19 = vadd.f32 %v754_v18, %v585_v17  ;;  %915 = vst [vmem:[%s2445_s2 + $0x198] sm:$0xff] %v2216_v45 }
 0x142   :  { %884 = vst [vmem:[%s2445_s2 + $0xa0] sm:$0xff] %v755_v19  ;;  %v2196_v23 = vadd.f32 %v953_v13, %v755_v19  ;;  %v1027_v24 = vmul.f32 %v755_v19, %v755_v19 }
 0x144   :  { %v2202_v25 = vadd.f32 %v1089_v15, %v1027_v24  ;;  %v665_v49 = vpop.f32.mrf.mxu2 }
 0x145   :  { %v834_v50 = vpop.f32.mrf.mxu3 }
 0x146   :  { %v587_v29 = vpop.f32.mrf.mxu0  ;;  %v2228_v51 = vadd.f32 %v834_v50, %v665_v49 }
 0x147   :  { %v756_v31 = vpop.f32.mrf.mxu1 }
 0x148   :  { %v2204_v32 = vadd.f32 %v756_v31, %v587_v29  ;;  %916 = vst [vmem:[%s2445_s2 + $0x1a0] sm:$0xff] %v2228_v51 }
 0x14a   :  { %885 = vst [vmem:[%s2445_s2 + $0xa8] sm:$0xff] %v2204_v32  ;;  %v955_v43 = vadd.f32 %v2196_v23, %v2204_v32 }
 0x14c   :  { %v667_v55 = vpop.f32.mrf.mxu2 }
 0x14d   :  { %v836_v57 = vpop.f32.mrf.mxu3 }
 0x14e   :  { %v590_v40 = vpop.f32.mrf.mxu0  ;;  %v2234_v59 = vadd.f32 %v836_v57, %v667_v55 }
 0x14f   :  { %v759_v41 = vpop.f32.mrf.mxu1 }
 0x150   :  { %v760_v42 = vadd.f32 %v759_v41, %v590_v40  ;;  %917 = vst [vmem:[%s2445_s2 + $0x1a8] sm:$0xff] %v2234_v59  ;;  %v1028_v40 = vmul.f32 %v2204_v32, %v2204_v32 }
 0x152   :  { %886 = vst [vmem:[%s2445_s2 + $0xb0] sm:$0xff] %v760_v42  ;;  %v1029_v41 = vmul.f32 %v760_v42, %v760_v42  ;;  %v1091_v44 = vadd.f32 %v2202_v25, %v1028_v40  ;;  %v956_v50 = vadd.f32 %v955_v43, %v760_v42 }
 0x154   :  { %v670_v2 = vpop.f32.mrf.mxu2  ;;  %v1092_v57 = vadd.f32 %v1091_v44, %v1029_v41 }
 0x155   :  { %v839_v5 = vpop.f32.mrf.mxu3 }
 0x156   :  { %v592_v46 = vpop.f32.mrf.mxu0  ;;  %v2246_v6 = vadd.f32 %v839_v5, %v670_v2 }
 0x157   :  { %v761_v47 = vpop.f32.mrf.mxu1 }
 0x158   :  { %v762_v48 = vadd.f32 %v761_v47, %v592_v46  ;;  %918 = vst [vmem:[%s2445_s2 + $0x1b0] sm:$0xff] %v2246_v6 }
 0x15a   :  { %887 = vst [vmem:[%s2445_s2 + $0xb8] sm:$0xff] %v762_v48  ;;  %v1030_v46 = vmul.f32 %v762_v48, %v762_v48 }
 0x15c   :  { %v672_v11 = vpop.f32.mrf.mxu2  ;;  %v1093_v2 = vadd.f32 %v1092_v57, %v1030_v46 }
 0x15d   :  { %v841_v12 = vpop.f32.mrf.mxu3 }
 0x15e   :  { %v595_v52 = vpop.f32.mrf.mxu0  ;;  %v2252_v13 = vadd.f32 %v841_v12, %v672_v11 }
 0x15f   :  { %v764_v53 = vpop.f32.mrf.mxu1 }
 0x160   :  { %v765_v54 = vadd.f32 %v764_v53, %v595_v52  ;;  %919 = vst [vmem:[%s2445_s2 + $0x1b8] sm:$0xff] %v2252_v13 }
 0x162   :  { %888 = vst [vmem:[%s2445_s2 + $0xc0] sm:$0xff] %v765_v54 }
 0x164   :  { %v675_v18 = vpop.f32.mrf.mxu2 }
 0x165   :  { %v844_v19 = vpop.f32.mrf.mxu3 }
 0x166   :  { %v597_v61 = vpop.f32.mrf.mxu0  ;;  %v2264_v29 = vadd.f32 %v844_v19, %v675_v18 }
 0x167   :  { %v766_v63 = vpop.f32.mrf.mxu1 }
 0x168   :  { %v767_v0 = vadd.f32 %v766_v63, %v597_v61  ;;  %920 = vst [vmem:[%s2445_s2 + $0x1c0] sm:$0xff] %v2264_v29  ;;  %v1031_v61 = vmul.f32 %v765_v54, %v765_v54  ;;  %v957_v63 = vadd.f32 %v956_v50, %v762_v48 }
 0x16a   :  { %889 = vst [vmem:[%s2445_s2 + $0xc8] sm:$0xff] %v767_v0  ;;  %v1032_v5 = vmul.f32 %v767_v0, %v767_v0  ;;  %v1094_v23 = vadd.f32 %v1093_v2, %v1031_v61  ;;  %v1039_v61 = vmul.f32 %v1897_v30, %v1897_v30  ;;  %v1040_v2 = vmul.f32 %v1903_v38, %v1903_v38 }
 0x16c   :  { %v677_v31 = vpop.f32.mrf.mxu2 }
 0x16d   :  { %v846_v33 = vpop.f32.mrf.mxu3 }
 0x16e   :  { %v600_v7 = vpop.f32.mrf.mxu0  ;;  %v2266_v34 = vadd.f32 %v846_v33, %v677_v31 }
 0x16f   :  { %v769_v9 = vpop.f32.mrf.mxu1 }
 0x170   :  { %v770_v10 = vadd.f32 %v769_v9, %v600_v7  ;;  %921 = vst [vmem:[%s2445_s2 + $0x1c8] sm:$0xff] %v2266_v34  ;;  %v958_v7 = vadd.f32 %v957_v63, %v765_v54  ;;  %v1095_v9 = vadd.f32 %v1094_v23, %v1032_v5  ;;  %v1041_v23 = vmul.f32 %v1939_v60, %v1939_v60 }
 0x172   :  { %890 = vst [vmem:[%s2445_s2 + $0xd0] sm:$0xff] %v770_v10  ;;  %v959_v32 = vadd.f32 %v958_v7, %v767_v0  ;;  %v1033_v25 = vmul.f32 %v770_v10, %v770_v10 }
 0x174   :  { %v680_v53 = vpop.f32.mrf.mxu2  ;;  %v960_v42 = vadd.f32 %v959_v32, %v770_v10 }
 0x175   :  { %v849_v55 = vpop.f32.mrf.mxu3 }
 0x176   :  { %v602_v14 = vpop.f32.mrf.mxu0  ;;  %v2287_v18 = vadd.f32 %v849_v55, %v680_v53 }
 0x177   :  { %v771_v15 = vpop.f32.mrf.mxu1 }
 0x178   :  { %v772_v17 = vadd.f32 %v771_v15, %v602_v14  ;;  %922 = vst [vmem:[%s2445_s2 + $0x1d0] sm:$0xff] %v2287_v18 }
 0x17a   :  { %891 = vst [vmem:[%s2445_s2 + $0xd8] sm:$0xff] %v772_v17  ;;  %v1034_v14 = vmul.f32 %v772_v17, %v772_v17  ;;  %v961_v31 = vadd.f32 %v960_v42, %v772_v17 }
 0x17c   :  { %v682_v19 = vpop.f32.mrf.mxu2 }
 0x17d   :  { %v851_v48 = vpop.f32.mrf.mxu3 }
 0x17e   :  { %v605_v20 = vpop.f32.mrf.mxu0 }
 0x17f   :  { %v774_v21 = vpop.f32.mrf.mxu1 }
 0x180   :  { %v775_v24 = vadd.f32 %v774_v21, %v605_v20  ;;  %v2289_v20 = vadd.f32 %v851_v48, %v682_v19  ;;  %v1096_v21 = vadd.f32 %v1095_v9, %v1033_v25 }
 0x182   :  { %892 = vst [vmem:[%s2445_s2 + $0xe0] sm:$0xff] %v775_v24  ;;  %v1035_v33 = vmul.f32 %v775_v24, %v775_v24  ;;  %v1097_v54 = vadd.f32 %v1096_v21, %v1034_v14  ;;  %v962_v0 = vadd.f32 %v961_v31, %v775_v24  ;;  %v1045_v31 = vmul.f32 %v2023_v58, %v2023_v58 }
 0x183   :  { %923 = vst [vmem:[%s2445_s2 + $0x1d8] sm:$0xff] %v2289_v20 }
 0x184   :  { %v1098_v40 = vadd.f32 %v1097_v54, %v1035_v33  ;;  %v685_v50 = vpop.f32.mrf.mxu2 }
 0x185   :  { %v854_v53 = vpop.f32.mrf.mxu3 }
 0x186   :  { %v607_v47 = vpop.f32.mrf.mxu0  ;;  %v2314_v9 = vadd.f32 %v854_v53, %v685_v50 }
 0x187   :  { %v776_v49 = vpop.f32.mrf.mxu1 }
 0x188   :  { %v777_v52 = vadd.f32 %v776_v49, %v607_v47  ;;  %924 = vst [vmem:[%s2445_s2 + $0x1e0] sm:$0xff] %v2314_v9 }
 0x18a   :  { %893 = vst [vmem:[%s2445_s2 + $0xe8] sm:$0xff] %v777_v52  ;;  %v1036_v10 = vmul.f32 %v777_v52, %v777_v52  ;;  %v963_v17 = vadd.f32 %v962_v0, %v777_v52 }
 0x18c   :  { %v1099_v46 = vadd.f32 %v1098_v40, %v1036_v10  ;;  %v1046_v40 = vmul.f32 %v2029_v3, %v2029_v3 }
 0x18e   :  { %v610_v11 = vpop.f32.mrf.mxu0 }
 0x18f   :  { %v779_v12 = vpop.f32.mrf.mxu1 }
 0x190   :  { %v780_v15 = vadd.f32 %v779_v12, %v610_v11  ;;  %v687_v11 = vpop.f32.mrf.mxu2  ;;  %v856_v12 = vpop.f32.mrf.mxu3 }
 0x191   :  { %v2316_v42 = vadd.f32 %v856_v12, %v687_v11  ;;  %v1571_v12 = vmov 0.0  }
 0x192   :  { %894 = vst [vmem:[%s2445_s2 + $0xf0] sm:$0xff] %v780_v15  ;;  %v1037_v41 = vmul.f32 %v780_v15, %v780_v15  ;;  %v964_v47 = vadd.f32 %v963_v17, %v780_v15 }
 0x193   :  { %925 = vst [vmem:[%s2445_s2 + $0x1e8] sm:$0xff] %v2316_v42 }
 0x194   :  { %v1100_v55 = vadd.f32 %v1099_v46, %v1037_v41  ;;  %v1047_v41 = vmul.f32 %v2065_v27, %v2065_v27  ;;  %932 = vst [vmem:[%s2446_s3] sm:$0x1] %v1571_v12 }
 0x195   :  { %933 = vst [vmem:[%s2447_s4] sm:$0x1] %v1571_v12 }
 0x196   :  { %v612_v43 = vpop.f32.mrf.mxu0 }
 0x197   :  { %v781_v44 = vpop.f32.mrf.mxu1 }
 0x198   :  { %v782_v49 = vadd.f32 %v781_v44, %v612_v43  ;;  %v690_v0 = vpop.f32.mrf.mxu2  ;;  %v859_v10 = vpop.f32.mrf.mxu3  ;;  %v1048_v44 = vmul.f32 %v2071_v37, %v2071_v37 }
 0x19a   :  { %895 = vst [vmem:[%s2445_s2 + $0xf8] sm:$0xff] %v782_v49  ;;  %v965_v24 = vadd.f32 %v964_v47, %v782_v49  ;;  %v1038_v57 = vmul.f32 %v782_v49, %v782_v49  ;;  %v1049_v47 = vmul.f32 %v2107_v62, %v2107_v62 }
 0x19c   :  { %v966_v52 = vadd.f32 %v965_v24, %v1897_v30  ;;  %v1101_v63 = vadd.f32 %v1100_v55, %v1038_v57  ;;  %v1042_v30 = vmul.f32 %v1945_v4, %v1945_v4 }
 0x19e   :  { %v967_v5 = vadd.f32 %v966_v52, %v1903_v38  ;;  %v1102_v7 = vadd.f32 %v1101_v63, %v1039_v61  ;;  %v1043_v38 = vmul.f32 %v1981_v26, %v1981_v26 }
 0x1a0   :  { %v968_v32 = vadd.f32 %v967_v5, %v1939_v60  ;;  %v1103_v25 = vadd.f32 %v1102_v7, %v1040_v2  ;;  %v692_v53 = vpop.f32.mrf.mxu2  ;;  %v861_v55 = vpop.f32.mrf.mxu3  ;;  %v1053_v5 = vmul.f32 %v2167_v56, %v2167_v56 }
 0x1a1   :  { %v2352_v24 = vadd.f32 %v861_v55, %v692_v53  ;;  %v1068_v55 = vmul.f32 %v2316_v42, %v2316_v42 }
 0x1a2   :  { %v969_v14 = vadd.f32 %v968_v32, %v1945_v4  ;;  %v1104_v15 = vadd.f32 %v1103_v25, %v1041_v23  ;;  %v1044_v4 = vmul.f32 %v1987_v35, %v1987_v35  ;;  %v1054_v32 = vmul.f32 %v2173_v1, %v2173_v1 }
 0x1a3   :  { %927 = vst [vmem:[%s2445_s2 + $0x1f8] sm:$0xff] %v2352_v24 }
 0x1a4   :  { %v970_v60 = vadd.f32 %v969_v14, %v1981_v26  ;;  %v1105_v19 = vadd.f32 %v1104_v15, %v1042_v30  ;;  %v1057_v15 = vmul.f32 %v2210_v39, %v2210_v39 }
 0x1a6   :  { %v971_v48 = vadd.f32 %v970_v60, %v1987_v35  ;;  %v1106_v21 = vadd.f32 %v1105_v19, %v1043_v38 }
 0x1a8   :  { %v972_v33 = vadd.f32 %v971_v48, %v2023_v58  ;;  %v1107_v54 = vadd.f32 %v1106_v21, %v1044_v4  ;;  %v1059_v48 = vmul.f32 %v2228_v51, %v2228_v51 }
 0x1aa   :  { %v973_v26 = vadd.f32 %v972_v33, %v2029_v3  ;;  %v1108_v17 = vadd.f32 %v1107_v54, %v1045_v31  ;;  %v2350_v3 = vadd.f32 %v859_v10, %v690_v0 }
 0x1ac   :  { %v974_v35 = vadd.f32 %v973_v26, %v2065_v27  ;;  %v1109_v43 = vadd.f32 %v1108_v17, %v1046_v40  ;;  %v1050_v27 = vmul.f32 %v2113_v8, %v2113_v8  ;;  %926 = vst [vmem:[%s2445_s2 + $0x1f0] sm:$0xff] %v2350_v3  ;;  %v1063_v17 = vmul.f32 %v2264_v29, %v2264_v29 }
 0x1ae   :  { %v975_v58 = vadd.f32 %v974_v35, %v2071_v37  ;;  %v1110_v46 = vadd.f32 %v1109_v43, %v1047_v41  ;;  %v1051_v37 = vmul.f32 %v2137_v28, %v2137_v28  ;;  %v1064_v43 = vmul.f32 %v2266_v34, %v2266_v34 }
 0x1b0   :  { %v976_v49 = vadd.f32 %v975_v58, %v2107_v62  ;;  %v1111_v50 = vadd.f32 %v1110_v46, %v1048_v44  ;;  %v1065_v58 = vmul.f32 %v2287_v18, %v2287_v18 }
 0x1b2   :  { %v977_v57 = vadd.f32 %v976_v49, %v2113_v8  ;;  %v1112_v61 = vadd.f32 %v1111_v50, %v1049_v47  ;;  %v1052_v8 = vmul.f32 %v2143_v36, %v2143_v36  ;;  %v1066_v47 = vmul.f32 %v2289_v20, %v2289_v20 }
 0x1b3   :  { %v1067_v50 = vmul.f32 %v2314_v9, %v2314_v9 }
 0x1b4   :  { %v1113_v62 = vadd.f32 %v1112_v61, %v1050_v27  ;;  %v978_v52 = vadd.f32 %v977_v57, %v2137_v28  ;;  %v1055_v28 = vmul.f32 %v2185_v16, %v2185_v16  ;;  %v1069_v57 = vmul.f32 %v2350_v3, %v2350_v3 }
 0x1b6   :  { %v979_v63 = vadd.f32 %v978_v52, %v2143_v36  ;;  %v1114_v2 = vadd.f32 %v1113_v62, %v1051_v37  ;;  %v1070_v37 = vmul.f32 %v2352_v24, %v2352_v24 }
 0x1b8   :  { %v980_v7 = vadd.f32 %v979_v63, %v2167_v56  ;;  %v1115_v23 = vadd.f32 %v1114_v2, %v1052_v8  ;;  %v1056_v56 = vmul.f32 %v2191_v22, %v2191_v22 }
 0x1ba   :  { %v981_v25 = vadd.f32 %v980_v7, %v2173_v1  ;;  %v1116_v11 = vadd.f32 %v1115_v23, %v1053_v5 }
 0x1bc   :  { %v982_v36 = vadd.f32 %v981_v25, %v2185_v16  ;;  %v1117_v30 = vadd.f32 %v1116_v11, %v1054_v32  ;;  %v1058_v16 = vmul.f32 %v2216_v45, %v2216_v45 }
 0x1be   :  { %v983_v1 = vadd.f32 %v982_v36, %v2191_v22  ;;  %v1118_v14 = vadd.f32 %v1117_v30, %v1055_v28  ;;  %v1060_v22 = vmul.f32 %v2234_v59, %v2234_v59 }
 0x1c0   :  { %v984_v38 = vadd.f32 %v983_v1, %v2210_v39  ;;  %v1119_v60 = vadd.f32 %v1118_v14, %v1056_v56  ;;  %v1061_v39 = vmul.f32 %v2246_v6, %v2246_v6 }
 0x1c2   :  { %v985_v19 = vadd.f32 %v984_v38, %v2216_v45  ;;  %v1120_v4 = vadd.f32 %v1119_v60, %v1057_v15  ;;  %v1062_v45 = vmul.f32 %v2252_v13, %v2252_v13 }
 0x1c4   :  { %v986_v21 = vadd.f32 %v985_v19, %v2228_v51  ;;  %v1121_v31 = vadd.f32 %v1120_v4, %v1058_v16 }
 0x1c6   :  { %v987_v33 = vadd.f32 %v986_v21, %v2234_v59  ;;  %v1122_v54 = vadd.f32 %v1121_v31, %v1059_v48 }
 0x1c8   :  { %v988_v0 = vadd.f32 %v987_v33, %v2246_v6  ;;  %v1123_v10 = vadd.f32 %v1122_v54, %v1060_v22 }
 0x1ca   :  { %v989_v40 = vadd.f32 %v988_v0, %v2252_v13  ;;  %v1124_v26 = vadd.f32 %v1123_v10, %v1061_v39 }
 0x1cc   :  { %v990_v51 = vadd.f32 %v989_v40, %v2264_v29  ;;  %v1125_v41 = vadd.f32 %v1124_v26, %v1062_v45 }
 0x1ce   :  { %v1126_v59 = vadd.f32 %v1125_v41, %v1063_v17  ;;  %v991_v35 = vadd.f32 %v990_v51, %v2266_v34 }
 0x1d0   :  { %v1127_v6 = vadd.f32 %v1126_v59, %v1064_v43  ;;  %v992_v44 = vadd.f32 %v991_v35, %v2287_v18 }
 0x1d2   :  { %v1128_v13 = vadd.f32 %v1127_v6, %v1065_v58  ;;  %v993_v46 = vadd.f32 %v992_v44, %v2289_v20 }
 0x1d4   :  { %v1129_v29 = vadd.f32 %v1128_v13, %v1066_v47  ;;  %v994_v49 = vadd.f32 %v993_v46, %v2314_v9 }
 0x1d6   :  { %v1130_v53 = vadd.f32 %v1129_v29, %v1067_v50  ;;  %v995_v34 = vadd.f32 %v994_v49, %v2316_v42 }
 0x1d8   :  { %v1131_v27 = vadd.f32 %v1130_v53, %v1068_v55  ;;  %v996_v18 = vadd.f32 %v995_v34, %v2350_v3  ;;  %v934_v3 = vld [vmem:[%s2446_s3] sm:$0x1] }
 0x1da   :  { %v1132_v61 = vadd.f32 %v1131_v27, %v1069_v57  ;;  %v997_v20 = vadd.f32 %v996_v18, %v2352_v24  ;;  %v1006_v24 = vld [vmem:[%s2447_s4] sm:$0x1] }
 0x1dc   :  { %v998_v62 = vrot.slane %v997_v20, 4  ;;  %v1133_v9 = vadd.f32 %v1132_v61, %v1070_v37 }
 0x1de   :  { %v999_v52 = vadd.f32 %v998_v62, %v997_v20  ;;  %v1134_v8 = vrot.slane %v1133_v9, 4 }
 0x1e0   :  { %v1000_v63 = vrot.slane %v999_v52, 2  ;;  %v1135_v2 = vadd.f32 %v1134_v8, %v1133_v9 }
 0x1e2   :  { %v1001_v5 = vadd.f32 %v1000_v63, %v999_v52  ;;  %v1136_v42 = vrot.slane %v1135_v2, 2 }
 0x1e4   :  { %v1002_v7 = vrot.slane %v1001_v5, 1  ;;  %v1137_v23 = vadd.f32 %v1136_v42, %v1135_v2 }
 0x1e6   :  { %v1003_v32 = vadd.f32 %v1002_v7, %v1001_v5  ;;  %v1138_v25 = vrot.slane %v1137_v23, 1 }
 0x1e8   :  { %v1004_v11 = vadd.f32 %v1003_v32, %v934_v3  ;;  %v1139_v12 = vadd.f32 %v1138_v25, %v1137_v23 }
 0x1ea   :  { %1005 = vst [vmem:[%s2446_s3] sm:$0x1] %v1004_v11  ;;  %v1140_v28 = vadd.f32 %v1139_v12, %v1006_v24 }
 0x1ec   :  { %1141 = vst [vmem:[%s2447_s4] sm:$0x1] %v1140_v28 }

// kernel: dc_discriminator_forward.13
= control target key start
LH: loop header
LB: loop body
LE: loop exit
PB: predicated region body
PF: predicated region fallthrough
CT: control target
= control target key end

     0   :  { %s1178_s0 = inlined_call_operand.vmem [shape: f32[512,128], index: 0, kind: input, shape index: {}]   ;;  %s1179_s1 = inlined_call_operand.vmem [shape: f32[1,128], index: 1, kind: input, shape index: {}]   ;;  %s1180_s2 = inlined_call_operand.vmem [shape: f32[1,128], index: 2, kind: input, shape index: {}]   ;;  %s1181_s3 = inlined_call_operand.vmem [shape: bf16[512,128], index: 3, kind: output, shape index: {}]  }
   0x1   :  { %v14_v0 = vld [vmem:[%s1178_s0] sm:$0xff]  ;;  %v15_v1 = vld [vmem:[%s1178_s0 + $0x8] sm:$0xff]  ;;  %v16_v4 = vld [vmem:[%s1178_s0 + $0x10] sm:$0xff] }
   0x2   :  { %v760_v2 = vld [vmem:[%s1179_s1] ss:$0 sm:$0xff]  ;;  %v17_v5 = vld [vmem:[%s1178_s0 + $0x18] sm:$0xff]  ;;  %v19_v11 = vld [vmem:[%s1178_s0 + $0x28] sm:$0xff] }
   0x3   :  { %v765_v3 = vld [vmem:[%s1180_s2] ss:$0 sm:$0xff]  ;;  %v82_v7 = vmul.f32 %v760_v2, %v14_v0  ;;  %v83_v8 = vmul.f32 %v760_v2, %v15_v1  ;;  %v84_v9 = vmul.f32 %v760_v2, %v16_v4  ;;  %v85_v10 = vmul.f32 %v760_v2, %v17_v5  ;;  %v20_v12 = vld [vmem:[%s1178_s0 + $0x30] sm:$0xff]  ;;  %v21_v13 = vld [vmem:[%s1178_s0 + $0x38] sm:$0xff] }
   0x4   :  { %v18_v6 = vld [vmem:[%s1178_s0 + $0x20] sm:$0xff]  ;;  %v87_v15 = vmul.f32 %v760_v2, %v19_v11  ;;  %v88_v16 = vmul.f32 %v760_v2, %v20_v12  ;;  %v89_v17 = vmul.f32 %v760_v2, %v21_v13  ;;  %v23_v37 = vld [vmem:[%s1178_s0 + $0x48] sm:$0xff]  ;;  %v24_v38 = vld [vmem:[%s1178_s0 + $0x50] sm:$0xff] }
   0x5   :  { %v86_v14 = vmul.f32 %v760_v2, %v18_v6  ;;  %v150_v18 = vadd.f32 %v765_v3, %v82_v7  ;;  %v151_v19 = vadd.f32 %v765_v3, %v83_v8  ;;  %v152_v20 = vadd.f32 %v765_v3, %v84_v9  ;;  %v22_v32 = vld [vmem:[%s1178_s0 + $0x40] sm:$0xff]  ;;  %v25_v39 = vld [vmem:[%s1178_s0 + $0x58] sm:$0xff]  ;;  %v27_v51 = vld [vmem:[%s1178_s0 + $0x68] sm:$0xff] }
   0x6   :  { %v153_v21 = vadd.f32 %v765_v3, %v85_v10  ;;  %v155_v23 = vadd.f32 %v765_v3, %v87_v15  ;;  %v156_v24 = vadd.f32 %v765_v3, %v88_v16  ;;  %v157_v25 = vadd.f32 %v765_v3, %v89_v17  ;;  %v26_v50 = vld [vmem:[%s1178_s0 + $0x60] sm:$0xff]  ;;  %v28_v63 = vld [vmem:[%s1178_s0 + $0x70] sm:$0xff]  ;;  %v29_v0 = vld [vmem:[%s1178_s0 + $0x78] sm:$0xff] }
   0x7   :  { %v154_v22 = vadd.f32 %v765_v3, %v86_v14  ;;  %vm214_vm0 = vcmp.gt.f32.partialorder %v150_v18, 0.0  ;;  %vm215_vm1 = vcmp.gt.f32.partialorder %v151_v19, 0.0  ;;  %v278_v26 = vmul.f32 0.2, %v150_v18  ;;  %v30_v12 = vld [vmem:[%s1178_s0 + $0x80] sm:$0xff]  ;;  %v31_v13 = vld [vmem:[%s1178_s0 + $0x88] sm:$0xff] }
   0x8   :  { %v279_v27 = vmul.f32 0.2, %v151_v19  ;;  %vm216_vm2 = vcmp.gt.f32.partialorder %v152_v20, 0.0  ;;  %vm217_vm3 = vcmp.gt.f32.partialorder %v153_v21, 0.0  ;;  %v280_v28 = vmul.f32 0.2, %v152_v20 }
   0x9   :  { %v281_v29 = vmul.f32 0.2, %v153_v21  ;;  %v342_v30 = vsel %vm214_vm0, %v150_v18, %v278_v26  ;;  %vm218_vm4 = vcmp.gt.f32.partialorder %v154_v22, 0.0  ;;  %vm219_vm5 = vcmp.gt.f32.partialorder %v155_v23, 0.0  ;;  %v32_v17 = vld [vmem:[%s1178_s0 + $0x90] sm:$0xff]  ;;  %v33_v18 = vld [vmem:[%s1178_s0 + $0x98] sm:$0xff] }
   0xa   :  { %v343_v31 = vsel %vm215_vm1, %v151_v19, %v279_v27  ;;  %v344_v34 = vsel %vm216_vm2, %v152_v20, %v280_v28  ;;  %v282_v36 = vmul.f32 0.2, %v154_v22  ;;  %v283_v41 = vmul.f32 0.2, %v155_v23 }
   0xb   :  { %v541_v33 = vpack.c.bf16 %v343_v31, %v342_v30  ;;  %v345_v35 = vsel %vm217_vm3, %v153_v21, %v281_v29  ;;  %vm220_vm6 = vcmp.gt.f32.partialorder %v156_v24, 0.0  ;;  %vm221_vm7 = vcmp.gt.f32.partialorder %v157_v25, 0.0  ;;  %v34_v30 = vld [vmem:[%s1178_s0 + $0xa0] sm:$0xff]  ;;  %v35_v31 = vld [vmem:[%s1178_s0 + $0xa8] sm:$0xff] }
   0xc   :  { %v546_v40 = vpack.c.bf16 %v345_v35, %v344_v34  ;;  %v346_v42 = vsel %vm218_vm4, %v154_v22, %v282_v36  ;;  %v284_v43 = vmul.f32 0.2, %v156_v24  ;;  %v285_v44 = vmul.f32 0.2, %v157_v25 }
   0xd   :  { %542 = vst [vmem:[%s1181_s3] sm:$0xff] %v541_v33   ;;  %v90_v45 = vmul.f32 %v760_v2, %v22_v32  ;;  %v347_v46 = vsel %vm219_vm5, %v155_v23, %v283_v41  ;;  %v91_v47 = vmul.f32 %v760_v2, %v23_v37  ;;  %v92_v48 = vmul.f32 %v760_v2, %v24_v38 }
   0xe   :  { %698 = vst [vmem:[%s1181_s3 + $0x8] sm:$0xff] %v546_v40   ;;  %v93_v49 = vmul.f32 %v760_v2, %v25_v39  ;;  %v551_v52 = vpack.c.bf16 %v347_v46, %v346_v42  ;;  %v348_v53 = vsel %vm220_vm6, %v156_v24, %v284_v43  ;;  %v349_v54 = vsel %vm221_vm7, %v157_v25, %v285_v44  ;;  %v36_v44 = vld [vmem:[%s1178_s0 + $0xb0] sm:$0xff] }
   0xf   :  { %v158_v55 = vadd.f32 %v765_v3, %v90_v45  ;;  %v556_v56 = vpack.c.bf16 %v349_v54, %v348_v53  ;;  %v159_v57 = vadd.f32 %v765_v3, %v91_v47  ;;  %v160_v58 = vadd.f32 %v765_v3, %v92_v48  ;;  %v37_v45 = vld [vmem:[%s1178_s0 + $0xb8] sm:$0xff] }
  0x10   :  { %v161_v59 = vadd.f32 %v765_v3, %v93_v49  ;;  %699 = vst [vmem:[%s1181_s3 + $0x10] sm:$0xff] %v551_v52   ;;  %v94_v61 = vmul.f32 %v760_v2, %v26_v50  ;;  %v95_v62 = vmul.f32 %v760_v2, %v27_v51  ;;  %v96_v10 = vmul.f32 %v760_v2, %v28_v63 }
  0x11   :  { %vm222_vm8 = vcmp.gt.f32.partialorder %v158_v55, 0.0  ;;  %v286_v60 = vmul.f32 0.2, %v158_v55  ;;  %700 = vst [vmem:[%s1181_s3 + $0x18] sm:$0xff] %v556_v56   ;;  %vm223_vm9 = vcmp.gt.f32.partialorder %v159_v57, 0.0  ;;  %vm224_vm10 = vcmp.gt.f32.partialorder %v160_v58, 0.0 }
  0x12   :  { %v287_v1 = vmul.f32 0.2, %v159_v57  ;;  %vm225_vm11 = vcmp.gt.f32.partialorder %v161_v59, 0.0  ;;  %v288_v5 = vmul.f32 0.2, %v160_v58  ;;  %v162_v7 = vadd.f32 %v765_v3, %v94_v61  ;;  %v38_v56 = vld [vmem:[%s1178_s0 + $0xc0] sm:$0xff] }
  0x13   :  { %v350_v4 = vsel %vm222_vm8, %v158_v55, %v286_v60  ;;  %v289_v6 = vmul.f32 0.2, %v161_v59  ;;  %v163_v9 = vadd.f32 %v765_v3, %v95_v62  ;;  %v97_v11 = vmul.f32 %v760_v2, %v29_v0  ;;  %v40_v61 = vld [vmem:[%s1178_s0 + $0xd0] sm:$0xff]  ;;  %v41_v62 = vld [vmem:[%s1178_s0 + $0xd8] sm:$0xff] }
  0x14   :  { %v351_v8 = vsel %vm223_vm9, %v159_v57, %v287_v1  ;;  %v352_v15 = vsel %vm224_vm10, %v160_v58, %v288_v5  ;;  %vm226_vm12 = vcmp.gt.f32.partialorder %v162_v7, 0.0  ;;  %v290_v20 = vmul.f32 0.2, %v162_v7  ;;  %v39_v57 = vld [vmem:[%s1178_s0 + $0xc8] sm:$0xff] }
  0x15   :  { %v561_v14 = vpack.c.bf16 %v351_v8, %v350_v4  ;;  %v353_v16 = vsel %vm225_vm11, %v161_v59, %v289_v6  ;;  %vm227_vm13 = vcmp.gt.f32.partialorder %v163_v9, 0.0  ;;  %v291_v21 = vmul.f32 0.2, %v163_v9 }
  0x16   :  { %v566_v19 = vpack.c.bf16 %v353_v16, %v352_v15  ;;  %v164_v22 = vadd.f32 %v765_v3, %v96_v10  ;;  %v165_v23 = vadd.f32 %v765_v3, %v97_v11  ;;  %v98_v24 = vmul.f32 %v760_v2, %v30_v12  ;;  %v42_v12 = vld [vmem:[%s1178_s0 + $0xe0] sm:$0xff] }
  0x17   :  { %701 = vst [vmem:[%s1181_s3 + $0x20] sm:$0xff] %v561_v14   ;;  %v99_v25 = vmul.f32 %v760_v2, %v31_v13  ;;  %v354_v26 = vsel %vm226_vm12, %v162_v7, %v290_v20  ;;  %v355_v27 = vsel %vm227_vm13, %v163_v9, %v291_v21  ;;  %v100_v28 = vmul.f32 %v760_v2, %v32_v17  ;;  %v43_v13 = vld [vmem:[%s1178_s0 + $0xe8] sm:$0xff] }
  0x18   :  { %702 = vst [vmem:[%s1181_s3 + $0x28] sm:$0xff] %v566_v19   ;;  %v101_v29 = vmul.f32 %v760_v2, %v33_v18  ;;  %v571_v32 = vpack.c.bf16 %v355_v27, %v354_v26  ;;  %vm228_vm14 = vcmp.gt.f32.partialorder %v164_v22, 0.0  ;;  %vm229_vm15 = vcmp.gt.f32.partialorder %v165_v23, 0.0  ;;  %v44_v26 = vld [vmem:[%s1178_s0 + $0xf0] sm:$0xff]  ;;  %v45_v27 = vld [vmem:[%s1178_s0 + $0xf8] sm:$0xff] }
  0x19   :  { %v292_v33 = vmul.f32 0.2, %v164_v22  ;;  %v293_v34 = vmul.f32 0.2, %v165_v23  ;;  %v166_v35 = vadd.f32 %v765_v3, %v98_v24  ;;  %v167_v36 = vadd.f32 %v765_v3, %v99_v25 }
  0x1a   :  { %v168_v37 = vadd.f32 %v765_v3, %v100_v28  ;;  %703 = vst [vmem:[%s1181_s3 + $0x30] sm:$0xff] %v571_v32   ;;  %v169_v39 = vadd.f32 %v765_v3, %v101_v29  ;;  %v102_v40 = vmul.f32 %v760_v2, %v34_v30  ;;  %v103_v41 = vmul.f32 %v760_v2, %v35_v31 }
  0x1b   :  { %v356_v38 = vsel %vm228_vm14, %v164_v22, %v292_v33  ;;  %v357_v42 = vsel %vm229_vm15, %v165_v23, %v293_v34  ;;  %vm230_vm0 = vcmp.gt.f32.partialorder %v166_v35, 0.0  ;;  %vm231_vm1 = vcmp.gt.f32.partialorder %v167_v36, 0.0 }
  0x1c   :  { %v294_v43 = vmul.f32 0.2, %v166_v35  ;;  %v576_v46 = vpack.c.bf16 %v357_v42, %v356_v38  ;;  %v295_v47 = vmul.f32 0.2, %v167_v36  ;;  %vm232_vm2 = vcmp.gt.f32.partialorder %v168_v37, 0.0  ;;  %v46_v38 = vld [vmem:[%s1178_s0 + $0x100] sm:$0xff] }
  0x1d   :  { %vm233_vm3 = vcmp.gt.f32.partialorder %v169_v39, 0.0  ;;  %v296_v49 = vmul.f32 0.2, %v168_v37  ;;  %v297_v50 = vmul.f32 0.2, %v169_v39  ;;  %v170_v51 = vadd.f32 %v765_v3, %v102_v40 }
  0x1e   :  { %v358_v48 = vsel %vm230_vm0, %v166_v35, %v294_v43  ;;  %704 = vst [vmem:[%s1181_s3 + $0x38] sm:$0xff] %v576_v46   ;;  %v359_v52 = vsel %vm231_vm1, %v167_v36, %v295_v47  ;;  %v171_v53 = vadd.f32 %v765_v3, %v103_v41  ;;  %v104_v54 = vmul.f32 %v760_v2, %v36_v44  ;;  %v48_v43 = vld [vmem:[%s1178_s0 + $0x110] sm:$0xff]  ;;  %v49_v44 = vld [vmem:[%s1178_s0 + $0x118] sm:$0xff] }
  0x1f   :  { %v105_v55 = vmul.f32 %v760_v2, %v37_v45  ;;  %v581_v58 = vpack.c.bf16 %v359_v52, %v358_v48  ;;  %v360_v59 = vsel %vm232_vm2, %v168_v37, %v296_v49  ;;  %v361_v60 = vsel %vm233_vm3, %v169_v39, %v297_v50  ;;  %v47_v39 = vld [vmem:[%s1178_s0 + $0x108] sm:$0xff] }
  0x20   :  { %vm234_vm4 = vcmp.gt.f32.partialorder %v170_v51, 0.0  ;;  %v586_v63 = vpack.c.bf16 %v361_v60, %v360_v59  ;;  %vm235_vm5 = vcmp.gt.f32.partialorder %v171_v53, 0.0  ;;  %v298_v0 = vmul.f32 0.2, %v170_v51 }
  0x21   :  { %v299_v1 = vmul.f32 0.2, %v171_v53  ;;  %705 = vst [vmem:[%s1181_s3 + $0x40] sm:$0xff] %v581_v58   ;;  %v172_v4 = vadd.f32 %v765_v3, %v104_v54  ;;  %v173_v5 = vadd.f32 %v765_v3, %v105_v55  ;;  %v106_v6 = vmul.f32 %v760_v2, %v38_v56  ;;  %v50_v56 = vld [vmem:[%s1178_s0 + $0x120] sm:$0xff] }
  0x22   :  { %v107_v7 = vmul.f32 %v760_v2, %v39_v57  ;;  %706 = vst [vmem:[%s1181_s3 + $0x48] sm:$0xff] %v586_v63   ;;  %v362_v8 = vsel %vm234_vm4, %v170_v51, %v298_v0  ;;  %v108_v10 = vmul.f32 %v760_v2, %v40_v61  ;;  %v109_v11 = vmul.f32 %v760_v2, %v41_v62  ;;  %v51_v57 = vld [vmem:[%s1178_s0 + $0x128] sm:$0xff] }
  0x23   :  { %v363_v9 = vsel %vm235_vm5, %v171_v53, %v299_v1  ;;  %vm236_vm6 = vcmp.gt.f32.partialorder %v172_v4, 0.0  ;;  %vm237_vm7 = vcmp.gt.f32.partialorder %v173_v5, 0.0  ;;  %v300_v15 = vmul.f32 0.2, %v172_v4 }
  0x24   :  { %v591_v14 = vpack.c.bf16 %v363_v9, %v362_v8  ;;  %v301_v16 = vmul.f32 0.2, %v173_v5  ;;  %v174_v17 = vadd.f32 %v765_v3, %v106_v6  ;;  %v175_v18 = vadd.f32 %v765_v3, %v107_v7  ;;  %v52_v8 = vld [vmem:[%s1178_s0 + $0x130] sm:$0xff]  ;;  %v53_v9 = vld [vmem:[%s1178_s0 + $0x138] sm:$0xff] }
  0x25   :  { %v176_v19 = vadd.f32 %v765_v3, %v108_v10  ;;  %v364_v20 = vsel %vm236_vm6, %v172_v4, %v300_v15  ;;  %v177_v21 = vadd.f32 %v765_v3, %v109_v11  ;;  %v110_v22 = vmul.f32 %v760_v2, %v42_v12 }
  0x26   :  { %707 = vst [vmem:[%s1181_s3 + $0x50] sm:$0xff] %v591_v14   ;;  %v111_v23 = vmul.f32 %v760_v2, %v43_v13  ;;  %v365_v24 = vsel %vm237_vm7, %v173_v5, %v301_v16  ;;  %vm238_vm8 = vcmp.gt.f32.partialorder %v174_v17, 0.0  ;;  %vm239_vm9 = vcmp.gt.f32.partialorder %v175_v18, 0.0 }
  0x27   :  { %v302_v25 = vmul.f32 0.2, %v174_v17  ;;  %v596_v28 = vpack.c.bf16 %v365_v24, %v364_v20  ;;  %v303_v29 = vmul.f32 0.2, %v175_v18  ;;  %vm240_vm10 = vcmp.gt.f32.partialorder %v176_v19, 0.0  ;;  %v54_v20 = vld [vmem:[%s1178_s0 + $0x140] sm:$0xff] }
  0x28   :  { %vm241_vm11 = vcmp.gt.f32.partialorder %v177_v21, 0.0  ;;  %v304_v31 = vmul.f32 0.2, %v176_v19  ;;  %v305_v32 = vmul.f32 0.2, %v177_v21  ;;  %v178_v33 = vadd.f32 %v765_v3, %v110_v22 }
  0x29   :  { %v366_v30 = vsel %vm238_vm8, %v174_v17, %v302_v25  ;;  %708 = vst [vmem:[%s1181_s3 + $0x58] sm:$0xff] %v596_v28   ;;  %v367_v34 = vsel %vm239_vm9, %v175_v18, %v303_v29  ;;  %v179_v35 = vadd.f32 %v765_v3, %v111_v23  ;;  %v112_v36 = vmul.f32 %v760_v2, %v44_v26  ;;  %v56_v25 = vld [vmem:[%s1178_s0 + $0x150] sm:$0xff]  ;;  %v57_v26 = vld [vmem:[%s1178_s0 + $0x158] sm:$0xff] }
  0x2a   :  { %v113_v37 = vmul.f32 %v760_v2, %v45_v27  ;;  %v601_v40 = vpack.c.bf16 %v367_v34, %v366_v30  ;;  %v368_v41 = vsel %vm240_vm10, %v176_v19, %v304_v31  ;;  %v369_v42 = vsel %vm241_vm11, %v177_v21, %v305_v32  ;;  %v55_v21 = vld [vmem:[%s1178_s0 + $0x148] sm:$0xff] }
  0x2b   :  { %vm242_vm12 = vcmp.gt.f32.partialorder %v178_v33, 0.0  ;;  %v606_v45 = vpack.c.bf16 %v369_v42, %v368_v41  ;;  %vm243_vm13 = vcmp.gt.f32.partialorder %v179_v35, 0.0  ;;  %v306_v46 = vmul.f32 0.2, %v178_v33 }
  0x2c   :  { %v307_v47 = vmul.f32 0.2, %v179_v35  ;;  %709 = vst [vmem:[%s1181_s3 + $0x60] sm:$0xff] %v601_v40   ;;  %v180_v48 = vadd.f32 %v765_v3, %v112_v36  ;;  %v181_v49 = vadd.f32 %v765_v3, %v113_v37  ;;  %v114_v50 = vmul.f32 %v760_v2, %v46_v38  ;;  %v58_v38 = vld [vmem:[%s1178_s0 + $0x160] sm:$0xff] }
  0x2d   :  { %v115_v51 = vmul.f32 %v760_v2, %v47_v39  ;;  %710 = vst [vmem:[%s1181_s3 + $0x68] sm:$0xff] %v606_v45   ;;  %v370_v52 = vsel %vm242_vm12, %v178_v33, %v306_v46  ;;  %v116_v54 = vmul.f32 %v760_v2, %v48_v43  ;;  %v117_v55 = vmul.f32 %v760_v2, %v49_v44  ;;  %v59_v39 = vld [vmem:[%s1178_s0 + $0x168] sm:$0xff] }
  0x2e   :  { %v371_v53 = vsel %vm243_vm13, %v179_v35, %v307_v47  ;;  %vm244_vm14 = vcmp.gt.f32.partialorder %v180_v48, 0.0  ;;  %vm245_vm15 = vcmp.gt.f32.partialorder %v181_v49, 0.0  ;;  %v308_v59 = vmul.f32 0.2, %v180_v48 }
  0x2f   :  { %v611_v58 = vpack.c.bf16 %v371_v53, %v370_v52  ;;  %v309_v60 = vmul.f32 0.2, %v181_v49  ;;  %v182_v61 = vadd.f32 %v765_v3, %v114_v50  ;;  %v183_v62 = vadd.f32 %v765_v3, %v115_v51  ;;  %v60_v52 = vld [vmem:[%s1178_s0 + $0x170] sm:$0xff]  ;;  %v61_v53 = vld [vmem:[%s1178_s0 + $0x178] sm:$0xff] }
  0x30   :  { %v184_v63 = vadd.f32 %v765_v3, %v116_v54  ;;  %v372_v0 = vsel %vm244_vm14, %v180_v48, %v308_v59  ;;  %v185_v1 = vadd.f32 %v765_v3, %v117_v55  ;;  %v118_v4 = vmul.f32 %v760_v2, %v50_v56 }
  0x31   :  { %711 = vst [vmem:[%s1181_s3 + $0x70] sm:$0xff] %v611_v58   ;;  %v119_v5 = vmul.f32 %v760_v2, %v51_v57  ;;  %v373_v6 = vsel %vm245_vm15, %v181_v49, %v309_v60  ;;  %vm246_vm0 = vcmp.gt.f32.partialorder %v182_v61, 0.0  ;;  %vm247_vm1 = vcmp.gt.f32.partialorder %v183_v62, 0.0 }
  0x32   :  { %v310_v7 = vmul.f32 0.2, %v182_v61  ;;  %v616_v10 = vpack.c.bf16 %v373_v6, %v372_v0  ;;  %v311_v11 = vmul.f32 0.2, %v183_v62  ;;  %vm248_vm2 = vcmp.gt.f32.partialorder %v184_v63, 0.0  ;;  %v62_v0 = vld [vmem:[%s1178_s0 + $0x180] sm:$0xff] }
  0x33   :  { %vm249_vm3 = vcmp.gt.f32.partialorder %v185_v1, 0.0  ;;  %v312_v13 = vmul.f32 0.2, %v184_v63  ;;  %v313_v14 = vmul.f32 0.2, %v185_v1  ;;  %v186_v15 = vadd.f32 %v765_v3, %v118_v4 }
  0x34   :  { %v374_v12 = vsel %vm246_vm0, %v182_v61, %v310_v7  ;;  %712 = vst [vmem:[%s1181_s3 + $0x78] sm:$0xff] %v616_v10   ;;  %v375_v16 = vsel %vm247_vm1, %v183_v62, %v311_v11  ;;  %v187_v17 = vadd.f32 %v765_v3, %v119_v5  ;;  %v120_v18 = vmul.f32 %v760_v2, %v52_v8  ;;  %v64_v7 = vld [vmem:[%s1178_s0 + $0x190] sm:$0xff]  ;;  %v65_v8 = vld [vmem:[%s1178_s0 + $0x198] sm:$0xff] }
  0x35   :  { %v121_v19 = vmul.f32 %v760_v2, %v53_v9  ;;  %v621_v22 = vpack.c.bf16 %v375_v16, %v374_v12  ;;  %v376_v23 = vsel %vm248_vm2, %v184_v63, %v312_v13  ;;  %v377_v24 = vsel %vm249_vm3, %v185_v1, %v313_v14  ;;  %v63_v1 = vld [vmem:[%s1178_s0 + $0x188] sm:$0xff] }
  0x36   :  { %vm250_vm4 = vcmp.gt.f32.partialorder %v186_v15, 0.0  ;;  %v626_v27 = vpack.c.bf16 %v377_v24, %v376_v23  ;;  %vm251_vm5 = vcmp.gt.f32.partialorder %v187_v17, 0.0  ;;  %v314_v28 = vmul.f32 0.2, %v186_v15 }
  0x37   :  { %v315_v29 = vmul.f32 0.2, %v187_v17  ;;  %713 = vst [vmem:[%s1181_s3 + $0x80] sm:$0xff] %v621_v22   ;;  %v188_v30 = vadd.f32 %v765_v3, %v120_v18  ;;  %v189_v31 = vadd.f32 %v765_v3, %v121_v19  ;;  %v122_v32 = vmul.f32 %v760_v2, %v54_v20  ;;  %v66_v20 = vld [vmem:[%s1178_s0 + $0x1a0] sm:$0xff] }
  0x38   :  { %v123_v33 = vmul.f32 %v760_v2, %v55_v21  ;;  %714 = vst [vmem:[%s1181_s3 + $0x88] sm:$0xff] %v626_v27   ;;  %v378_v34 = vsel %vm250_vm4, %v186_v15, %v314_v28  ;;  %v124_v36 = vmul.f32 %v760_v2, %v56_v25  ;;  %v125_v37 = vmul.f32 %v760_v2, %v57_v26  ;;  %v67_v21 = vld [vmem:[%s1178_s0 + $0x1a8] sm:$0xff] }
  0x39   :  { %v379_v35 = vsel %vm251_vm5, %v187_v17, %v315_v29  ;;  %vm252_vm6 = vcmp.gt.f32.partialorder %v188_v30, 0.0  ;;  %vm253_vm7 = vcmp.gt.f32.partialorder %v189_v31, 0.0  ;;  %v316_v41 = vmul.f32 0.2, %v188_v30 }
  0x3a   :  { %v631_v40 = vpack.c.bf16 %v379_v35, %v378_v34  ;;  %v317_v42 = vmul.f32 0.2, %v189_v31  ;;  %v190_v43 = vadd.f32 %v765_v3, %v122_v32  ;;  %v191_v44 = vadd.f32 %v765_v3, %v123_v33  ;;  %v68_v34 = vld [vmem:[%s1178_s0 + $0x1b0] sm:$0xff]  ;;  %v69_v35 = vld [vmem:[%s1178_s0 + $0x1b8] sm:$0xff] }
  0x3b   :  { %v192_v45 = vadd.f32 %v765_v3, %v124_v36  ;;  %v380_v46 = vsel %vm252_vm6, %v188_v30, %v316_v41  ;;  %v193_v47 = vadd.f32 %v765_v3, %v125_v37  ;;  %v126_v48 = vmul.f32 %v760_v2, %v58_v38 }
  0x3c   :  { %715 = vst [vmem:[%s1181_s3 + $0x90] sm:$0xff] %v631_v40   ;;  %v127_v49 = vmul.f32 %v760_v2, %v59_v39  ;;  %v381_v50 = vsel %vm253_vm7, %v189_v31, %v317_v42  ;;  %vm254_vm8 = vcmp.gt.f32.partialorder %v190_v43, 0.0  ;;  %vm255_vm9 = vcmp.gt.f32.partialorder %v191_v44, 0.0 }
  0x3d   :  { %v318_v51 = vmul.f32 0.2, %v190_v43  ;;  %v636_v54 = vpack.c.bf16 %v381_v50, %v380_v46  ;;  %v319_v55 = vmul.f32 0.2, %v191_v44  ;;  %vm256_vm10 = vcmp.gt.f32.partialorder %v192_v45, 0.0  ;;  %v70_v46 = vld [vmem:[%s1178_s0 + $0x1c0] sm:$0xff] }
  0x3e   :  { %vm257_vm11 = vcmp.gt.f32.partialorder %v193_v47, 0.0  ;;  %v320_v57 = vmul.f32 0.2, %v192_v45  ;;  %v321_v58 = vmul.f32 0.2, %v193_v47  ;;  %v194_v59 = vadd.f32 %v765_v3, %v126_v48 }
  0x3f   :  { %v382_v56 = vsel %vm254_vm8, %v190_v43, %v318_v51  ;;  %716 = vst [vmem:[%s1181_s3 + $0x98] sm:$0xff] %v636_v54   ;;  %v383_v60 = vsel %vm255_vm9, %v191_v44, %v319_v55  ;;  %v195_v61 = vadd.f32 %v765_v3, %v127_v49  ;;  %v128_v62 = vmul.f32 %v760_v2, %v60_v52  ;;  %v72_v51 = vld [vmem:[%s1178_s0 + $0x1d0] sm:$0xff]  ;;  %v73_v52 = vld [vmem:[%s1178_s0 + $0x1d8] sm:$0xff] }
  0x40   :  { %v129_v63 = vmul.f32 %v760_v2, %v61_v53  ;;  %v641_v4 = vpack.c.bf16 %v383_v60, %v382_v56  ;;  %v384_v5 = vsel %vm256_vm10, %v192_v45, %v320_v57  ;;  %v385_v6 = vsel %vm257_vm11, %v193_v47, %v321_v58  ;;  %v71_v47 = vld [vmem:[%s1178_s0 + $0x1c8] sm:$0xff] }
  0x41   :  { %vm258_vm12 = vcmp.gt.f32.partialorder %v194_v59, 0.0  ;;  %v646_v9 = vpack.c.bf16 %v385_v6, %v384_v5  ;;  %vm259_vm13 = vcmp.gt.f32.partialorder %v195_v61, 0.0  ;;  %v322_v10 = vmul.f32 0.2, %v194_v59 }
  0x42   :  { %v323_v11 = vmul.f32 0.2, %v195_v61  ;;  %717 = vst [vmem:[%s1181_s3 + $0xa0] sm:$0xff] %v641_v4   ;;  %v196_v12 = vadd.f32 %v765_v3, %v128_v62  ;;  %v197_v13 = vadd.f32 %v765_v3, %v129_v63  ;;  %v130_v14 = vmul.f32 %v760_v2, %v62_v0  ;;  %v74_v0 = vld [vmem:[%s1178_s0 + $0x1e0] sm:$0xff] }
  0x43   :  { %v131_v15 = vmul.f32 %v760_v2, %v63_v1  ;;  %718 = vst [vmem:[%s1181_s3 + $0xa8] sm:$0xff] %v646_v9   ;;  %v386_v16 = vsel %vm258_vm12, %v194_v59, %v322_v10  ;;  %v132_v18 = vmul.f32 %v760_v2, %v64_v7  ;;  %v133_v19 = vmul.f32 %v760_v2, %v65_v8  ;;  %v75_v1 = vld [vmem:[%s1178_s0 + $0x1e8] sm:$0xff] }
  0x44   :  { %v387_v17 = vsel %vm259_vm13, %v195_v61, %v323_v11  ;;  %vm260_vm14 = vcmp.gt.f32.partialorder %v196_v12, 0.0  ;;  %vm261_vm15 = vcmp.gt.f32.partialorder %v197_v13, 0.0  ;;  %v324_v23 = vmul.f32 0.2, %v196_v12 }
  0x45   :  { %v651_v22 = vpack.c.bf16 %v387_v17, %v386_v16  ;;  %v325_v24 = vmul.f32 0.2, %v197_v13  ;;  %v198_v25 = vadd.f32 %v765_v3, %v130_v14  ;;  %v199_v26 = vadd.f32 %v765_v3, %v131_v15  ;;  %v76_v16 = vld [vmem:[%s1178_s0 + $0x1f0] sm:$0xff]  ;;  %v77_v17 = vld [vmem:[%s1178_s0 + $0x1f8] sm:$0xff] }
  0x46   :  { %v200_v27 = vadd.f32 %v765_v3, %v132_v18  ;;  %v388_v28 = vsel %vm260_vm14, %v196_v12, %v324_v23  ;;  %v201_v29 = vadd.f32 %v765_v3, %v133_v19  ;;  %v134_v30 = vmul.f32 %v760_v2, %v66_v20 }
  0x47   :  { %719 = vst [vmem:[%s1181_s3 + $0xb0] sm:$0xff] %v651_v22   ;;  %v135_v31 = vmul.f32 %v760_v2, %v67_v21  ;;  %v389_v32 = vsel %vm261_vm15, %v197_v13, %v325_v24  ;;  %vm262_vm0 = vcmp.gt.f32.partialorder %v198_v25, 0.0  ;;  %vm263_vm1 = vcmp.gt.f32.partialorder %v199_v26, 0.0 }
  0x48   :  { %v326_v33 = vmul.f32 0.2, %v198_v25  ;;  %v656_v36 = vpack.c.bf16 %v389_v32, %v388_v28  ;;  %v327_v37 = vmul.f32 0.2, %v199_v26  ;;  %vm264_vm2 = vcmp.gt.f32.partialorder %v200_v27, 0.0 }
  0x49   :  { %vm265_vm3 = vcmp.gt.f32.partialorder %v201_v29, 0.0  ;;  %v328_v39 = vmul.f32 0.2, %v200_v27  ;;  %v329_v40 = vmul.f32 0.2, %v201_v29  ;;  %v202_v41 = vadd.f32 %v765_v3, %v134_v30 }
  0x4a   :  { %v390_v38 = vsel %vm262_vm0, %v198_v25, %v326_v33  ;;  %720 = vst [vmem:[%s1181_s3 + $0xb8] sm:$0xff] %v656_v36   ;;  %v391_v42 = vsel %vm263_vm1, %v199_v26, %v327_v37  ;;  %v203_v43 = vadd.f32 %v765_v3, %v135_v31  ;;  %v136_v44 = vmul.f32 %v760_v2, %v68_v34 }
  0x4b   :  { %v137_v45 = vmul.f32 %v760_v2, %v69_v35  ;;  %v661_v48 = vpack.c.bf16 %v391_v42, %v390_v38  ;;  %v392_v49 = vsel %vm264_vm2, %v200_v27, %v328_v39  ;;  %v393_v50 = vsel %vm265_vm3, %v201_v29, %v329_v40 }
  0x4c   :  { %vm266_vm4 = vcmp.gt.f32.partialorder %v202_v41, 0.0  ;;  %v666_v53 = vpack.c.bf16 %v393_v50, %v392_v49  ;;  %vm267_vm5 = vcmp.gt.f32.partialorder %v203_v43, 0.0  ;;  %v330_v54 = vmul.f32 0.2, %v202_v41 }
  0x4d   :  { %v331_v55 = vmul.f32 0.2, %v203_v43  ;;  %721 = vst [vmem:[%s1181_s3 + $0xc0] sm:$0xff] %v661_v48   ;;  %v204_v56 = vadd.f32 %v765_v3, %v136_v44  ;;  %v205_v57 = vadd.f32 %v765_v3, %v137_v45  ;;  %v138_v58 = vmul.f32 %v760_v2, %v70_v46 }
  0x4e   :  { %v139_v59 = vmul.f32 %v760_v2, %v71_v47  ;;  %722 = vst [vmem:[%s1181_s3 + $0xc8] sm:$0xff] %v666_v53   ;;  %v394_v60 = vsel %vm266_vm4, %v202_v41, %v330_v54  ;;  %v140_v62 = vmul.f32 %v760_v2, %v72_v51  ;;  %v141_v63 = vmul.f32 %v760_v2, %v73_v52 }
  0x4f   :  { %v395_v61 = vsel %vm267_vm5, %v203_v43, %v331_v55  ;;  %vm268_vm6 = vcmp.gt.f32.partialorder %v204_v56, 0.0  ;;  %vm269_vm7 = vcmp.gt.f32.partialorder %v205_v57, 0.0  ;;  %v332_v5 = vmul.f32 0.2, %v204_v56 }
  0x50   :  { %v671_v4 = vpack.c.bf16 %v395_v61, %v394_v60  ;;  %v333_v6 = vmul.f32 0.2, %v205_v57  ;;  %v206_v7 = vadd.f32 %v765_v3, %v138_v58  ;;  %v207_v8 = vadd.f32 %v765_v3, %v139_v59 }
  0x51   :  { %v208_v9 = vadd.f32 %v765_v3, %v140_v62  ;;  %v396_v10 = vsel %vm268_vm6, %v204_v56, %v332_v5  ;;  %v209_v11 = vadd.f32 %v765_v3, %v141_v63  ;;  %v142_v12 = vmul.f32 %v760_v2, %v74_v0 }
  0x52   :  { %723 = vst [vmem:[%s1181_s3 + $0xd0] sm:$0xff] %v671_v4   ;;  %v143_v13 = vmul.f32 %v760_v2, %v75_v1  ;;  %v397_v14 = vsel %vm269_vm7, %v205_v57, %v333_v6  ;;  %vm270_vm8 = vcmp.gt.f32.partialorder %v206_v7, 0.0  ;;  %vm271_vm9 = vcmp.gt.f32.partialorder %v207_v8, 0.0 }
  0x53   :  { %v334_v15 = vmul.f32 0.2, %v206_v7  ;;  %v676_v18 = vpack.c.bf16 %v397_v14, %v396_v10  ;;  %v335_v19 = vmul.f32 0.2, %v207_v8  ;;  %vm272_vm10 = vcmp.gt.f32.partialorder %v208_v9, 0.0 }
  0x54   :  { %vm273_vm11 = vcmp.gt.f32.partialorder %v209_v11, 0.0  ;;  %v336_v21 = vmul.f32 0.2, %v208_v9  ;;  %v337_v22 = vmul.f32 0.2, %v209_v11  ;;  %v210_v23 = vadd.f32 %v765_v3, %v142_v12 }
  0x55   :  { %v398_v20 = vsel %vm270_vm8, %v206_v7, %v334_v15  ;;  %724 = vst [vmem:[%s1181_s3 + $0xd8] sm:$0xff] %v676_v18   ;;  %v399_v24 = vsel %vm271_vm9, %v207_v8, %v335_v19  ;;  %v211_v25 = vadd.f32 %v765_v3, %v143_v13  ;;  %v144_v26 = vmul.f32 %v760_v2, %v76_v16 }
  0x56   :  { %v145_v27 = vmul.f32 %v760_v2, %v77_v17  ;;  %v681_v28 = vpack.c.bf16 %v399_v24, %v398_v20  ;;  %v400_v29 = vsel %vm272_vm10, %v208_v9, %v336_v21  ;;  %v401_v30 = vsel %vm273_vm11, %v209_v11, %v337_v22 }
  0x57   :  { %vm274_vm12 = vcmp.gt.f32.partialorder %v210_v23, 0.0  ;;  %v686_v31 = vpack.c.bf16 %v401_v30, %v400_v29  ;;  %vm275_vm13 = vcmp.gt.f32.partialorder %v211_v25, 0.0  ;;  %v338_v32 = vmul.f32 0.2, %v210_v23 }
  0x58   :  { %v339_v33 = vmul.f32 0.2, %v211_v25  ;;  %725 = vst [vmem:[%s1181_s3 + $0xe0] sm:$0xff] %v681_v28   ;;  %v212_v34 = vadd.f32 %v765_v3, %v144_v26  ;;  %v213_v35 = vadd.f32 %v765_v3, %v145_v27 }
  0x59   :  { %726 = vst [vmem:[%s1181_s3 + $0xe8] sm:$0xff] %v686_v31   ;;  %v402_v2 = vsel %vm274_vm12, %v210_v23, %v338_v32 }
  0x5a   :  { %v403_v36 = vsel %vm275_vm13, %v211_v25, %v339_v33  ;;  %vm276_vm14 = vcmp.gt.f32.partialorder %v212_v34, 0.0  ;;  %vm277_vm15 = vcmp.gt.f32.partialorder %v213_v35, 0.0  ;;  %v340_v38 = vmul.f32 0.2, %v212_v34 }
  0x5b   :  { %v691_v37 = vpack.c.bf16 %v403_v36, %v402_v2  ;;  %v341_v39 = vmul.f32 0.2, %v213_v35 }
  0x5c   :  { %v404_v40 = vsel %vm276_vm14, %v212_v34, %v340_v38 }
  0x5d   :  { %727 = vst [vmem:[%s1181_s3 + $0xf0] sm:$0xff] %v691_v37   ;;  %v405_v41 = vsel %vm277_vm15, %v213_v35, %v341_v39 }
  0x5e   :  { %v696_v42 = vpack.c.bf16 %v405_v41, %v404_v40 }
  0x60   :  { %728 = vst [vmem:[%s1181_s3 + $0xf8] sm:$0xff] %v696_v42  }

// kernel: dc_discriminator_forward.15
= control target key start
LH: loop header
LB: loop body
LE: loop exit
PB: predicated region body
PF: predicated region fallthrough
CT: control target
= control target key end

     0   :  { %s338_s0 = inlined_call_operand.vmem [shape: f32[128,128], index: 0, kind: input, shape index: {}]   ;;  %s339_s1 = inlined_call_operand.vmem [shape: f32[1,128], index: 1, kind: input, shape index: {}]   ;;  %s340_s2 = inlined_call_operand.vmem [shape: f32[1,128], index: 2, kind: input, shape index: {}]   ;;  %s341_s3 = inlined_call_operand.vmem [shape: bf16[128,128], index: 3, kind: output, shape index: {}]  }
   0x1   :  { %v14_v0 = vld [vmem:[%s338_s0] sm:$0xff]  ;;  %v15_v1 = vld [vmem:[%s338_s0 + $0x8] sm:$0xff]  ;;  %v16_v4 = vld [vmem:[%s338_s0 + $0x10] sm:$0xff] }
   0x2   :  { %v232_v2 = vld [vmem:[%s339_s1] ss:$0 sm:$0xff]  ;;  %v17_v5 = vld [vmem:[%s338_s0 + $0x18] sm:$0xff]  ;;  %v19_v11 = vld [vmem:[%s338_s0 + $0x28] sm:$0xff] }
   0x3   :  { %v237_v3 = vld [vmem:[%s340_s2] ss:$0 sm:$0xff]  ;;  %v34_v7 = vmul.f32 %v232_v2, %v14_v0  ;;  %v35_v8 = vmul.f32 %v232_v2, %v15_v1  ;;  %v36_v9 = vmul.f32 %v232_v2, %v16_v4  ;;  %v37_v10 = vmul.f32 %v232_v2, %v17_v5  ;;  %v20_v12 = vld [vmem:[%s338_s0 + $0x30] sm:$0xff]  ;;  %v21_v13 = vld [vmem:[%s338_s0 + $0x38] sm:$0xff] }
   0x4   :  { %v18_v6 = vld [vmem:[%s338_s0 + $0x20] sm:$0xff]  ;;  %v39_v15 = vmul.f32 %v232_v2, %v19_v11  ;;  %v40_v16 = vmul.f32 %v232_v2, %v20_v12  ;;  %v41_v17 = vmul.f32 %v232_v2, %v21_v13  ;;  %v23_v37 = vld [vmem:[%s338_s0 + $0x48] sm:$0xff]  ;;  %v24_v38 = vld [vmem:[%s338_s0 + $0x50] sm:$0xff] }
   0x5   :  { %v38_v14 = vmul.f32 %v232_v2, %v18_v6  ;;  %v54_v18 = vadd.f32 %v237_v3, %v34_v7  ;;  %v55_v19 = vadd.f32 %v237_v3, %v35_v8  ;;  %v56_v20 = vadd.f32 %v237_v3, %v36_v9  ;;  %v22_v32 = vld [vmem:[%s338_s0 + $0x40] sm:$0xff]  ;;  %v25_v39 = vld [vmem:[%s338_s0 + $0x58] sm:$0xff]  ;;  %v27_v51 = vld [vmem:[%s338_s0 + $0x68] sm:$0xff] }
   0x6   :  { %v57_v21 = vadd.f32 %v237_v3, %v37_v10  ;;  %v59_v23 = vadd.f32 %v237_v3, %v39_v15  ;;  %v60_v24 = vadd.f32 %v237_v3, %v40_v16  ;;  %v61_v25 = vadd.f32 %v237_v3, %v41_v17  ;;  %v26_v50 = vld [vmem:[%s338_s0 + $0x60] sm:$0xff]  ;;  %v28_v63 = vld [vmem:[%s338_s0 + $0x70] sm:$0xff]  ;;  %v29_v0 = vld [vmem:[%s338_s0 + $0x78] sm:$0xff] }
   0x7   :  { %v58_v22 = vadd.f32 %v237_v3, %v38_v14  ;;  %vm70_vm0 = vcmp.gt.f32.partialorder %v54_v18, 0.0  ;;  %vm71_vm1 = vcmp.gt.f32.partialorder %v55_v19, 0.0  ;;  %v86_v26 = vmul.f32 0.2, %v54_v18 }
   0x8   :  { %v87_v27 = vmul.f32 0.2, %v55_v19  ;;  %vm72_vm2 = vcmp.gt.f32.partialorder %v56_v20, 0.0  ;;  %vm73_vm3 = vcmp.gt.f32.partialorder %v57_v21, 0.0  ;;  %v88_v28 = vmul.f32 0.2, %v56_v20 }
   0x9   :  { %v89_v29 = vmul.f32 0.2, %v57_v21  ;;  %v102_v30 = vsel %vm70_vm0, %v54_v18, %v86_v26  ;;  %vm74_vm4 = vcmp.gt.f32.partialorder %v58_v22, 0.0  ;;  %vm75_vm5 = vcmp.gt.f32.partialorder %v59_v23, 0.0 }
   0xa   :  { %v103_v31 = vsel %vm71_vm1, %v55_v19, %v87_v27  ;;  %v104_v34 = vsel %vm72_vm2, %v56_v20, %v88_v28  ;;  %v90_v36 = vmul.f32 0.2, %v58_v22  ;;  %v91_v41 = vmul.f32 0.2, %v59_v23 }
   0xb   :  { %v157_v33 = vpack.c.bf16 %v103_v31, %v102_v30  ;;  %v105_v35 = vsel %vm73_vm3, %v57_v21, %v89_v29  ;;  %vm76_vm6 = vcmp.gt.f32.partialorder %v60_v24, 0.0  ;;  %vm77_vm7 = vcmp.gt.f32.partialorder %v61_v25, 0.0 }
   0xc   :  { %v162_v40 = vpack.c.bf16 %v105_v35, %v104_v34  ;;  %v106_v42 = vsel %vm74_vm4, %v58_v22, %v90_v36  ;;  %v92_v43 = vmul.f32 0.2, %v60_v24  ;;  %v93_v44 = vmul.f32 0.2, %v61_v25 }
   0xd   :  { %158 = vst [vmem:[%s341_s3] sm:$0xff] %v157_v33   ;;  %v42_v45 = vmul.f32 %v232_v2, %v22_v32  ;;  %v107_v46 = vsel %vm75_vm5, %v59_v23, %v91_v41  ;;  %v43_v47 = vmul.f32 %v232_v2, %v23_v37  ;;  %v44_v48 = vmul.f32 %v232_v2, %v24_v38 }
   0xe   :  { %194 = vst [vmem:[%s341_s3 + $0x8] sm:$0xff] %v162_v40   ;;  %v45_v49 = vmul.f32 %v232_v2, %v25_v39  ;;  %v167_v52 = vpack.c.bf16 %v107_v46, %v106_v42  ;;  %v108_v53 = vsel %vm76_vm6, %v60_v24, %v92_v43  ;;  %v109_v54 = vsel %vm77_vm7, %v61_v25, %v93_v44 }
   0xf   :  { %v62_v55 = vadd.f32 %v237_v3, %v42_v45  ;;  %v172_v56 = vpack.c.bf16 %v109_v54, %v108_v53  ;;  %v63_v57 = vadd.f32 %v237_v3, %v43_v47  ;;  %v64_v58 = vadd.f32 %v237_v3, %v44_v48 }
  0x10   :  { %v65_v59 = vadd.f32 %v237_v3, %v45_v49  ;;  %195 = vst [vmem:[%s341_s3 + $0x10] sm:$0xff] %v167_v52   ;;  %v46_v61 = vmul.f32 %v232_v2, %v26_v50  ;;  %v47_v62 = vmul.f32 %v232_v2, %v27_v51  ;;  %v48_v10 = vmul.f32 %v232_v2, %v28_v63 }
  0x11   :  { %vm78_vm8 = vcmp.gt.f32.partialorder %v62_v55, 0.0  ;;  %v94_v60 = vmul.f32 0.2, %v62_v55  ;;  %196 = vst [vmem:[%s341_s3 + $0x18] sm:$0xff] %v172_v56   ;;  %vm79_vm9 = vcmp.gt.f32.partialorder %v63_v57, 0.0  ;;  %vm80_vm10 = vcmp.gt.f32.partialorder %v64_v58, 0.0 }
  0x12   :  { %v95_v1 = vmul.f32 0.2, %v63_v57  ;;  %vm81_vm11 = vcmp.gt.f32.partialorder %v65_v59, 0.0  ;;  %v96_v5 = vmul.f32 0.2, %v64_v58  ;;  %v66_v7 = vadd.f32 %v237_v3, %v46_v61 }
  0x13   :  { %v110_v4 = vsel %vm78_vm8, %v62_v55, %v94_v60  ;;  %v97_v6 = vmul.f32 0.2, %v65_v59  ;;  %v67_v9 = vadd.f32 %v237_v3, %v47_v62  ;;  %v49_v11 = vmul.f32 %v232_v2, %v29_v0 }
  0x14   :  { %v111_v8 = vsel %vm79_vm9, %v63_v57, %v95_v1  ;;  %v112_v13 = vsel %vm80_vm10, %v64_v58, %v96_v5  ;;  %vm82_vm12 = vcmp.gt.f32.partialorder %v66_v7, 0.0  ;;  %v98_v16 = vmul.f32 0.2, %v66_v7 }
  0x15   :  { %v177_v12 = vpack.c.bf16 %v111_v8, %v110_v4  ;;  %v113_v14 = vsel %vm81_vm11, %v65_v59, %v97_v6  ;;  %vm83_vm13 = vcmp.gt.f32.partialorder %v67_v9, 0.0  ;;  %v99_v17 = vmul.f32 0.2, %v67_v9 }
  0x16   :  { %v182_v15 = vpack.c.bf16 %v113_v14, %v112_v13  ;;  %v68_v18 = vadd.f32 %v237_v3, %v48_v10  ;;  %v69_v19 = vadd.f32 %v237_v3, %v49_v11  ;;  %v114_v2 = vsel %vm82_vm12, %v66_v7, %v98_v16 }
  0x17   :  { %197 = vst [vmem:[%s341_s3 + $0x20] sm:$0xff] %v177_v12   ;;  %v115_v20 = vsel %vm83_vm13, %v67_v9, %v99_v17 }
  0x18   :  { %198 = vst [vmem:[%s341_s3 + $0x28] sm:$0xff] %v182_v15   ;;  %v187_v21 = vpack.c.bf16 %v115_v20, %v114_v2  ;;  %vm84_vm14 = vcmp.gt.f32.partialorder %v68_v18, 0.0  ;;  %vm85_vm15 = vcmp.gt.f32.partialorder %v69_v19, 0.0  ;;  %v100_v22 = vmul.f32 0.2, %v68_v18 }
  0x19   :  { %v101_v23 = vmul.f32 0.2, %v69_v19 }
  0x1a   :  { %199 = vst [vmem:[%s341_s3 + $0x30] sm:$0xff] %v187_v21   ;;  %v116_v24 = vsel %vm84_vm14, %v68_v18, %v100_v22 }
  0x1b   :  { %v117_v25 = vsel %vm85_vm15, %v69_v19, %v101_v23 }
  0x1c   :  { %v192_v26 = vpack.c.bf16 %v117_v25, %v116_v24 }
  0x1e   :  { %200 = vst [vmem:[%s341_s3 + $0x38] sm:$0xff] %v192_v26  }

// kernel: dc_discriminator_forward.14
= control target key start
LH: loop header
LB: loop body
LE: loop exit
PB: predicated region body
PF: predicated region fallthrough
CT: control target
= control target key end

     0   :  { %s1475_s1 = inlined_call_operand.vmem [shape: bf16[512,128], index: 1, kind: input, shape index: {}]   ;;  %s1476_s0 = inlined_call_operand.vmem [shape: bf16[128,512], index: 0, kind: input, shape index: {}]   ;;  %s1477_s2 = inlined_call_operand.vmem [shape: f32[128,128], index: 2, kind: output, shape index: {0}]   ;;  %s1478_s3 = inlined_call_operand.vmem [shape: f32[1,128], index: 3, kind: output, shape index: {1}]   ;;  %s1479_s4 = inlined_call_operand.vmem [shape: f32[1,128], index: 4, kind: output, shape index: {2}]  }
   0x1   :  { %v1051_v0 = vld [vmem:[%s1475_s1 + $0x38] sm:$0xff]  ;;  %v1050_v4 = vld [vmem:[%s1475_s1 + $0x30] sm:$0xff]  ;;  %v1049_v8 = vld [vmem:[%s1475_s1 + $0x28] sm:$0xff] }
   0x2   :  { %v1059_v1 = vld [vmem:[%s1475_s1 + $0x78] sm:$0xff]  ;;  %462 = vmatpush.bf16.msra.mxu0 %v1051_v0  ;;  %v1058_v5 = vld [vmem:[%s1475_s1 + $0x70] sm:$0xff]  ;;  %v1057_v9 = vld [vmem:[%s1475_s1 + $0x68] sm:$0xff] }
   0x3   :  { %v1067_v2 = vld [vmem:[%s1475_s1 + $0xb8] sm:$0xff]  ;;  %511 = vmatpush.bf16.msra.mxu1 %v1059_v1  ;;  %v1066_v6 = vld [vmem:[%s1475_s1 + $0xb0] sm:$0xff]  ;;  %v1065_v10 = vld [vmem:[%s1475_s1 + $0xa8] sm:$0xff] }
   0x4   :  { %v1075_v3 = vld [vmem:[%s1475_s1 + $0xf8] sm:$0xff]  ;;  %560 = vmatpush.bf16.msra.mxu2 %v1067_v2  ;;  %v1074_v7 = vld [vmem:[%s1475_s1 + $0xf0] sm:$0xff]  ;;  %v1073_v11 = vld [vmem:[%s1475_s1 + $0xe8] sm:$0xff] }
   0x5   :  { %609 = vmatpush.bf16.msra.mxu3 %v1075_v3  ;;  %v1048_v12 = vld [vmem:[%s1475_s1 + $0x20] sm:$0xff]  ;;  %v1047_v16 = vld [vmem:[%s1475_s1 + $0x18] sm:$0xff]  ;;  %v1046_v20 = vld [vmem:[%s1475_s1 + $0x10] sm:$0xff] }
   0x6   :  { %463 = vmatpush.bf16.msra.mxu0 %v1050_v4  ;;  %v1056_v13 = vld [vmem:[%s1475_s1 + $0x60] sm:$0xff]  ;;  %v1055_v17 = vld [vmem:[%s1475_s1 + $0x58] sm:$0xff]  ;;  %v1054_v21 = vld [vmem:[%s1475_s1 + $0x50] sm:$0xff] }
   0x7   :  { %512 = vmatpush.bf16.msra.mxu1 %v1058_v5  ;;  %v1064_v14 = vld [vmem:[%s1475_s1 + $0xa0] sm:$0xff]  ;;  %v1063_v18 = vld [vmem:[%s1475_s1 + $0x98] sm:$0xff]  ;;  %v1062_v22 = vld [vmem:[%s1475_s1 + $0x90] sm:$0xff] }
   0x8   :  { %561 = vmatpush.bf16.msra.mxu2 %v1066_v6  ;;  %v1072_v15 = vld [vmem:[%s1475_s1 + $0xe0] sm:$0xff]  ;;  %v1071_v19 = vld [vmem:[%s1475_s1 + $0xd8] sm:$0xff]  ;;  %v1070_v23 = vld [vmem:[%s1475_s1 + $0xd0] sm:$0xff] }
   0x9   :  { %610 = vmatpush.bf16.msra.mxu3 %v1074_v7  ;;  %v1045_v24 = vld [vmem:[%s1475_s1 + $0x8] sm:$0xff]  ;;  %v1044_v28 = vld [vmem:[%s1475_s1] sm:$0xff]  ;;  %v1014_v33 = vld [vmem:[%s1476_s0 + $0xc] sm:$0xf0] }
   0xa   :  { %464 = vmatpush.bf16.msra.mxu0 %v1049_v8  ;;  %v1053_v25 = vld [vmem:[%s1475_s1 + $0x48] sm:$0xff]  ;;  %v1052_v29 = vld [vmem:[%s1475_s1 + $0x40] sm:$0xff]  ;;  %v760_v35 = vld [vmem:[%s1476_s0 + $0x10] sm:$0xf0] }
   0xb   :  { %513 = vmatpush.bf16.msra.mxu1 %v1057_v9  ;;  %v1061_v26 = vld [vmem:[%s1475_s1 + $0x88] sm:$0xff]  ;;  %v1060_v30 = vld [vmem:[%s1475_s1 + $0x80] sm:$0xff]  ;;  %v1015_v37 = vld [vmem:[%s1476_s0 + $0x14] sm:$0xf0] }
   0xc   :  { %562 = vmatpush.bf16.msra.mxu2 %v1065_v10  ;;  %v1069_v27 = vld [vmem:[%s1475_s1 + $0xc8] sm:$0xff]  ;;  %v1068_v31 = vld [vmem:[%s1475_s1 + $0xc0] sm:$0xff]  ;;  %v768_v39 = vld [vmem:[%s1476_s0 + $0x18] sm:$0xf0] }
   0xd   :  { %611 = vmatpush.bf16.msra.mxu3 %v1073_v11  ;;  %v758_v32 = vld [vmem:[%s1476_s0] sm:$0xf]  ;;  %v1012_v34 = vld [vmem:[%s1476_s0 + $0x4] sm:$0xf]  ;;  %v766_v36 = vld [vmem:[%s1476_s0 + $0x8] sm:$0xf] }
   0xe   :  { %465 = vmatpush.bf16.msra.mxu0 %v1048_v12  ;;  %v1013_v38 = vld [vmem:[%s1476_s0 + $0xc] sm:$0xf]  ;;  %v759_v40 = vor.u32 %v1014_v33, %v758_v32  ;;  %v763_v41 = vor.u32 %v1012_v34, %v760_v35  ;;  %v767_v42 = vor.u32 %v1015_v37, %v766_v36  ;;  %v774_v44 = vld [vmem:[%s1476_s0 + $0x20] sm:$0xf]  ;;  %v1018_v45 = vld [vmem:[%s1476_s0 + $0x2c] sm:$0xf0] }
   0xf   :  { %514 = vmatpush.bf16.msra.mxu1 %v1056_v13  ;;  %v771_v43 = vor.u32 %v1013_v38, %v768_v39  ;;  %v1016_v46 = vld [vmem:[%s1476_s0 + $0x24] sm:$0xf]  ;;  %v776_v47 = vld [vmem:[%s1476_s0 + $0x30] sm:$0xf0]  ;;  %v782_v48 = vld [vmem:[%s1476_s0 + $0x28] sm:$0xf]  ;;  %v775_v52 = vor.u32 %v1018_v45, %v774_v44 }
  0x10   :  { %563 = vmatpush.bf16.msra.mxu2 %v1064_v14  ;;  %v1019_v49 = vld [vmem:[%s1476_s0 + $0x34] sm:$0xf0]  ;;  %v1017_v50 = vld [vmem:[%s1476_s0 + $0x2c] sm:$0xf]  ;;  %v784_v51 = vld [vmem:[%s1476_s0 + $0x38] sm:$0xf0]  ;;  %v779_v53 = vor.u32 %v1016_v46, %v776_v47 }
  0x11   :  { %612 = vmatpush.bf16.msra.mxu3 %v1072_v15  ;;  %v783_v54 = vor.u32 %v1019_v49, %v782_v48  ;;  %v787_v55 = vor.u32 %v1017_v50, %v784_v51  ;;  %v790_v56 = vld [vmem:[%s1476_s0 + $0x40] sm:$0xf]  ;;  %v1022_v57 = vld [vmem:[%s1476_s0 + $0x4c] sm:$0xf0]  ;;  %v1020_v58 = vld [vmem:[%s1476_s0 + $0x44] sm:$0xf] }
  0x12   :  { %466 = vmatpush.bf16.msra.mxu0 %v1047_v16  ;;  %v792_v59 = vld [vmem:[%s1476_s0 + $0x50] sm:$0xf0]  ;;  %v798_v60 = vld [vmem:[%s1476_s0 + $0x48] sm:$0xf]  ;;  %v1023_v61 = vld [vmem:[%s1476_s0 + $0x54] sm:$0xf0]  ;;  %v791_v0 = vor.u32 %v1022_v57, %v790_v56 }
  0x13   :  { %515 = vmatpush.bf16.msra.mxu1 %v1055_v17  ;;  %v1021_v62 = vld [vmem:[%s1476_s0 + $0x4c] sm:$0xf]  ;;  %v800_v63 = vld [vmem:[%s1476_s0 + $0x58] sm:$0xf0]  ;;  %v795_v1 = vor.u32 %v1020_v58, %v792_v59  ;;  %v799_v2 = vor.u32 %v1023_v61, %v798_v60  ;;  %v806_v4 = vld [vmem:[%s1476_s0 + $0x60] sm:$0xf] }
  0x14   :  { %564 = vmatpush.bf16.msra.mxu2 %v1063_v18  ;;  %v803_v3 = vor.u32 %v1021_v62, %v800_v63  ;;  %v1026_v5 = vld [vmem:[%s1476_s0 + $0x6c] sm:$0xf0]  ;;  %v1024_v6 = vld [vmem:[%s1476_s0 + $0x64] sm:$0xf]  ;;  %v808_v7 = vld [vmem:[%s1476_s0 + $0x70] sm:$0xf0] }
  0x15   :  { %613 = vmatpush.bf16.msra.mxu3 %v1071_v19  ;;  %v814_v8 = vld [vmem:[%s1476_s0 + $0x68] sm:$0xf]  ;;  %v1027_v9 = vld [vmem:[%s1476_s0 + $0x74] sm:$0xf0]  ;;  %v1025_v10 = vld [vmem:[%s1476_s0 + $0x6c] sm:$0xf]  ;;  %v807_v12 = vor.u32 %v1026_v5, %v806_v4  ;;  %v811_v13 = vor.u32 %v1024_v6, %v808_v7 }
  0x16   :  { %467 = vmatpush.bf16.msra.mxu0 %v1046_v20  ;;  %v816_v11 = vld [vmem:[%s1476_s0 + $0x78] sm:$0xf0]  ;;  %v815_v14 = vor.u32 %v1027_v9, %v814_v8  ;;  %v822_v16 = vld [vmem:[%s1476_s0 + $0x80] sm:$0xf]  ;;  %v1030_v17 = vld [vmem:[%s1476_s0 + $0x8c] sm:$0xf0] }
  0x17   :  { %516 = vmatpush.bf16.msra.mxu1 %v1054_v21  ;;  %v819_v15 = vor.u32 %v1025_v10, %v816_v11  ;;  %v1028_v18 = vld [vmem:[%s1476_s0 + $0x84] sm:$0xf]  ;;  %v824_v19 = vld [vmem:[%s1476_s0 + $0x90] sm:$0xf0]  ;;  %v830_v20 = vld [vmem:[%s1476_s0 + $0x88] sm:$0xf] }
  0x18   :  { %565 = vmatpush.bf16.msra.mxu2 %v1062_v22  ;;  %v1031_v21 = vld [vmem:[%s1476_s0 + $0x94] sm:$0xf0]  ;;  %v1029_v22 = vld [vmem:[%s1476_s0 + $0x8c] sm:$0xf]  ;;  %v846_v32 = vld [vmem:[%s1476_s0 + $0xa8] sm:$0xf] }
  0x19   :  { %614 = vmatpush.bf16.msra.mxu3 %v1070_v23  ;;  %v832_v23 = vld [vmem:[%s1476_s0 + $0x98] sm:$0xf0]  ;;  %v1035_v33 = vld [vmem:[%s1476_s0 + $0xb4] sm:$0xf0]  ;;  %v1033_v34 = vld [vmem:[%s1476_s0 + $0xac] sm:$0xf] }
  0x1a   :  { %468 = vmatpush.bf16.msra.mxu0 %v1045_v24  ;;  %v823_v24 = vor.u32 %v1030_v17, %v822_v16  ;;  %v848_v35 = vld [vmem:[%s1476_s0 + $0xb8] sm:$0xf0]  ;;  %v847_v38 = vor.u32 %v1035_v33, %v846_v32  ;;  %v862_v44 = vld [vmem:[%s1476_s0 + $0xc8] sm:$0xf]  ;;  %v1039_v45 = vld [vmem:[%s1476_s0 + $0xd4] sm:$0xf0] }
  0x1b   :  { %517 = vmatpush.bf16.msra.mxu1 %v1053_v25  ;;  %v827_v25 = vor.u32 %v1028_v18, %v824_v19  ;;  %v851_v39 = vor.u32 %v1033_v34, %v848_v35  ;;  %v1037_v46 = vld [vmem:[%s1476_s0 + $0xcc] sm:$0xf]  ;;  %v864_v47 = vld [vmem:[%s1476_s0 + $0xd8] sm:$0xf0]  ;;  %v863_v50 = vor.u32 %v1039_v45, %v862_v44  ;;  %v878_v56 = vld [vmem:[%s1476_s0 + $0xe8] sm:$0xf] }
  0x1c   :  { %566 = vmatpush.bf16.msra.mxu2 %v1061_v26  ;;  %v831_v26 = vor.u32 %v1031_v21, %v830_v20  ;;  %v867_v51 = vor.u32 %v1037_v46, %v864_v47  ;;  %v1043_v57 = vld [vmem:[%s1476_s0 + $0xf4] sm:$0xf0]  ;;  %v1041_v58 = vld [vmem:[%s1476_s0 + $0xec] sm:$0xf]  ;;  %v880_v59 = vld [vmem:[%s1476_s0 + $0xf8] sm:$0xf0] }
  0x1d   :  { %615 = vmatpush.bf16.msra.mxu3 %v1069_v27  ;;  %v835_v27 = vor.u32 %v1029_v22, %v832_v23  ;;  %v879_v62 = vor.u32 %v1043_v57, %v878_v56  ;;  %v883_v63 = vor.u32 %v1041_v58, %v880_v59 }
  0x1e   :  { %469 = vmatpush.bf16.msra.mxu0 %v1044_v28  ;;  %v838_v28 = vld [vmem:[%s1476_s0 + $0xa0] sm:$0xf] }
  0x1f   :  { %518 = vmatpush.bf16.msra.mxu1 %v1052_v29  ;;  %v1034_v29 = vld [vmem:[%s1476_s0 + $0xac] sm:$0xf0] }
  0x20   :  { %567 = vmatpush.bf16.msra.mxu2 %v1060_v30  ;;  %v1032_v30 = vld [vmem:[%s1476_s0 + $0xa4] sm:$0xf]  ;;  %v839_v36 = vor.u32 %v1034_v29, %v838_v28 }
  0x21   :  { %616 = vmatpush.bf16.msra.mxu3 %v1068_v31  ;;  %470 = vmatmul.bf16.vlgmr.msra.gmra.mxu0 %v759_v40  ;;  %v840_v31 = vld [vmem:[%s1476_s0 + $0xb0] sm:$0xf0]  ;;  %v854_v40 = vld [vmem:[%s1476_s0 + $0xc0] sm:$0xf] }
  0x22   :  { %519 = vmatmul.bf16.vlgmr.msra.gmra.mxu1 %v763_v41  ;;  %v843_v37 = vor.u32 %v1032_v30, %v840_v31  ;;  %v1038_v41 = vld [vmem:[%s1476_s0 + $0xcc] sm:$0xf0] }
  0x23   :  { %568 = vmatmul.bf16.vlgmr.msra.gmra.mxu2 %v767_v42  ;;  %v1036_v42 = vld [vmem:[%s1476_s0 + $0xc4] sm:$0xf]  ;;  %v855_v48 = vor.u32 %v1038_v41, %v854_v40 }
  0x24   :  { %617 = vmatmul.bf16.vlgmr.msra.gmra.mxu3 %v771_v43  ;;  %v856_v43 = vld [vmem:[%s1476_s0 + $0xd0] sm:$0xf0] }
  0x25   :  { %v859_v49 = vor.u32 %v1036_v42, %v856_v43 }
  0x31   :  { %475 = vmatmul.bf16.gmra.mxu0 %v775_v52  ;;  %v870_v52 = vld [vmem:[%s1476_s0 + $0xe0] sm:$0xf] }
  0x32   :  { %524 = vmatmul.bf16.gmra.mxu1 %v779_v53  ;;  %v1042_v53 = vld [vmem:[%s1476_s0 + $0xec] sm:$0xf0] }
  0x33   :  { %573 = vmatmul.bf16.gmra.mxu2 %v783_v54  ;;  %v1040_v54 = vld [vmem:[%s1476_s0 + $0xe4] sm:$0xf]  ;;  %v871_v60 = vor.u32 %v1042_v53, %v870_v52 }
  0x34   :  { %622 = vmatmul.bf16.gmra.mxu3 %v787_v55  ;;  %v872_v55 = vld [vmem:[%s1476_s0 + $0xf0] sm:$0xf0] }
  0x35   :  { %v875_v61 = vor.u32 %v1040_v54, %v872_v55 }
  0x41   :  { %480 = vmatmul.bf16.gmra.mxu0 %v791_v0 }
  0x42   :  { %529 = vmatmul.bf16.gmra.mxu1 %v795_v1 }
  0x43   :  { %578 = vmatmul.bf16.gmra.mxu2 %v799_v2 }
  0x44   :  { %627 = vmatmul.bf16.gmra.mxu3 %v803_v3 }
  0x51   :  { %485 = vmatmul.bf16.gmra.mxu0 %v807_v12 }
  0x52   :  { %534 = vmatmul.bf16.gmra.mxu1 %v811_v13 }
  0x53   :  { %583 = vmatmul.bf16.gmra.mxu2 %v815_v14 }
  0x54   :  { %632 = vmatmul.bf16.gmra.mxu3 %v819_v15 }
  0x61   :  { %490 = vmatmul.bf16.gmra.mxu0 %v823_v24 }
  0x62   :  { %539 = vmatmul.bf16.gmra.mxu1 %v827_v25 }
  0x63   :  { %588 = vmatmul.bf16.gmra.mxu2 %v831_v26 }
  0x64   :  { %637 = vmatmul.bf16.gmra.mxu3 %v835_v27 }
  0x71   :  { %495 = vmatmul.bf16.gmra.mxu0 %v839_v36 }
  0x72   :  { %544 = vmatmul.bf16.gmra.mxu1 %v843_v37 }
  0x73   :  { %593 = vmatmul.bf16.gmra.mxu2 %v847_v38 }
  0x74   :  { %642 = vmatmul.bf16.gmra.mxu3 %v851_v39 }
  0x81   :  { %500 = vmatmul.bf16.gmra.mxu0 %v855_v48 }
  0x82   :  { %549 = vmatmul.bf16.gmra.mxu1 %v859_v49 }
  0x83   :  { %598 = vmatmul.bf16.gmra.mxu2 %v863_v50 }
  0x84   :  { %647 = vmatmul.bf16.gmra.mxu3 %v867_v51 }
  0x91   :  { %505 = vmatmul.bf16.gmra.mxu0 %v871_v60 }
  0x92   :  { %554 = vmatmul.bf16.gmra.mxu1 %v875_v61 }
  0x93   :  { %603 = vmatmul.bf16.gmra.mxu2 %v879_v62 }
  0x94   :  { %652 = vmatmul.bf16.gmra.mxu3 %v883_v63 }
  0x9e   :  { %v471_v0 = vpop.f32.mrf.mxu0 }
  0x9f   :  { %v520_v1 = vpop.f32.mrf.mxu1 }
  0xa0   :  { %v521_v2 = vadd.f32 %v520_v1, %v471_v0 }
  0xa6   :  { %v569_v3 = vpop.f32.mrf.mxu2  ;;  %v473_v6 = vpop.f32.mrf.mxu0 }
  0xa7   :  { %v618_v4 = vpop.f32.mrf.mxu3  ;;  %v570_v5 = vadd.f32 %v569_v3, %v521_v2  ;;  %v522_v7 = vpop.f32.mrf.mxu1 }
  0xa8   :  { %v523_v9 = vadd.f32 %v522_v7, %v473_v6 }
  0xa9   :  { %v619_v8 = vadd.f32 %v618_v4, %v570_v5 }
  0xab   :  { %658 = vst [vmem:[%s1477_s2] sm:$0xff] %v619_v8  ;;  %v705_v16 = vmul.f32 %v619_v8, %v619_v8 }
  0xae   :  { %v571_v10 = vpop.f32.mrf.mxu2  ;;  %v476_v13 = vpop.f32.mrf.mxu0 }
  0xaf   :  { %v620_v11 = vpop.f32.mrf.mxu3  ;;  %v572_v12 = vadd.f32 %v571_v10, %v523_v9  ;;  %v525_v14 = vpop.f32.mrf.mxu1 }
  0xb0   :  { %v526_v19 = vadd.f32 %v525_v14, %v476_v13 }
  0xb1   :  { %v621_v15 = vadd.f32 %v620_v11, %v572_v12 }
  0xb3   :  { %659 = vst [vmem:[%s1477_s2 + $0x8] sm:$0xff] %v621_v15  ;;  %v681_v17 = vadd.f32 %v621_v15, %v619_v8  ;;  %v706_v18 = vmul.f32 %v621_v15, %v621_v15 }
  0xb5   :  { %v721_v20 = vadd.f32 %v706_v18, %v705_v16 }
  0xb6   :  { %v574_v21 = vpop.f32.mrf.mxu2  ;;  %v478_v24 = vpop.f32.mrf.mxu0 }
  0xb7   :  { %v623_v22 = vpop.f32.mrf.mxu3  ;;  %v575_v23 = vadd.f32 %v574_v21, %v526_v19  ;;  %v527_v25 = vpop.f32.mrf.mxu1 }
  0xb8   :  { %v528_v30 = vadd.f32 %v527_v25, %v478_v24 }
  0xb9   :  { %v624_v26 = vadd.f32 %v623_v22, %v575_v23 }
  0xbb   :  { %660 = vst [vmem:[%s1477_s2 + $0x10] sm:$0xff] %v624_v26  ;;  %v682_v27 = vadd.f32 %v681_v17, %v624_v26  ;;  %v707_v28 = vmul.f32 %v624_v26, %v624_v26 }
  0xbd   :  { %v722_v29 = vadd.f32 %v721_v20, %v707_v28 }
  0xbe   :  { %v576_v31 = vpop.f32.mrf.mxu2  ;;  %v481_v34 = vpop.f32.mrf.mxu0 }
  0xbf   :  { %v625_v32 = vpop.f32.mrf.mxu3  ;;  %v577_v33 = vadd.f32 %v576_v31, %v528_v30  ;;  %v530_v35 = vpop.f32.mrf.mxu1 }
  0xc0   :  { %v531_v39 = vadd.f32 %v530_v35, %v481_v34 }
  0xc1   :  { %v626_v36 = vadd.f32 %v625_v32, %v577_v33 }
  0xc3   :  { %661 = vst [vmem:[%s1477_s2 + $0x18] sm:$0xff] %v626_v36  ;;  %v683_v37 = vadd.f32 %v682_v27, %v626_v36  ;;  %v708_v38 = vmul.f32 %v626_v36, %v626_v36  ;;  %v1077_v36 = vmov 0.0  }
  0xc4   :  { %678 = vst [vmem:[%s1478_s3] sm:$0x1] %v1077_v36 }
  0xc5   :  { %v723_v40 = vadd.f32 %v722_v29, %v708_v38  ;;  %679 = vst [vmem:[%s1479_s4] sm:$0x1] %v1077_v36 }
  0xc6   :  { %v579_v41 = vpop.f32.mrf.mxu2  ;;  %v483_v44 = vpop.f32.mrf.mxu0 }
  0xc7   :  { %v628_v42 = vpop.f32.mrf.mxu3  ;;  %v580_v43 = vadd.f32 %v579_v41, %v531_v39  ;;  %v532_v45 = vpop.f32.mrf.mxu1 }
  0xc8   :  { %v533_v50 = vadd.f32 %v532_v45, %v483_v44 }
  0xc9   :  { %v629_v46 = vadd.f32 %v628_v42, %v580_v43 }
  0xcb   :  { %662 = vst [vmem:[%s1477_s2 + $0x20] sm:$0xff] %v629_v46  ;;  %v1406_v47 = vadd.f32 %v683_v37, %v629_v46  ;;  %v709_v48 = vmul.f32 %v629_v46, %v629_v46 }
  0xcd   :  { %v1408_v49 = vadd.f32 %v723_v40, %v709_v48 }
  0xce   :  { %v581_v51 = vpop.f32.mrf.mxu2  ;;  %v486_v54 = vpop.f32.mrf.mxu0 }
  0xcf   :  { %v630_v52 = vpop.f32.mrf.mxu3  ;;  %v582_v53 = vadd.f32 %v581_v51, %v533_v50  ;;  %v535_v55 = vpop.f32.mrf.mxu1 }
  0xd0   :  { %v536_v57 = vadd.f32 %v535_v55, %v486_v54 }
  0xd1   :  { %v1410_v56 = vadd.f32 %v630_v52, %v582_v53 }
  0xd3   :  { %663 = vst [vmem:[%s1477_s2 + $0x28] sm:$0xff] %v1410_v56  ;;  %v710_v43 = vmul.f32 %v1410_v56, %v1410_v56  ;;  %v685_v48 = vadd.f32 %v1406_v47, %v1410_v56 }
  0xd5   :  { %v725_v54 = vadd.f32 %v1408_v49, %v710_v43  ;;  %v704_v43 = vld [vmem:[%s1479_s4] sm:$0x1] }
  0xd6   :  { %v584_v58 = vpop.f32.mrf.mxu2  ;;  %v488_v61 = vpop.f32.mrf.mxu0 }
  0xd7   :  { %v633_v59 = vpop.f32.mrf.mxu3  ;;  %v585_v60 = vadd.f32 %v584_v58, %v536_v57  ;;  %v537_v62 = vpop.f32.mrf.mxu1 }
  0xd8   :  { %v538_v0 = vadd.f32 %v537_v62, %v488_v61 }
  0xd9   :  { %v1416_v63 = vadd.f32 %v633_v59, %v585_v60 }
  0xdb   :  { %664 = vst [vmem:[%s1477_s2 + $0x30] sm:$0xff] %v1416_v63  ;;  %v711_v50 = vmul.f32 %v1416_v63, %v1416_v63  ;;  %v686_v55 = vadd.f32 %v685_v48, %v1416_v63 }
  0xdd   :  { %v726_v59 = vadd.f32 %v725_v54, %v711_v50 }
  0xde   :  { %v586_v1 = vpop.f32.mrf.mxu2  ;;  %v491_v4 = vpop.f32.mrf.mxu0 }
  0xdf   :  { %v635_v2 = vpop.f32.mrf.mxu3  ;;  %v587_v3 = vadd.f32 %v586_v1, %v538_v0  ;;  %v540_v5 = vpop.f32.mrf.mxu1 }
  0xe0   :  { %v541_v7 = vadd.f32 %v540_v5, %v491_v4 }
  0xe1   :  { %v636_v6 = vadd.f32 %v635_v2, %v587_v3 }
  0xe3   :  { %665 = vst [vmem:[%s1477_s2 + $0x38] sm:$0xff] %v636_v6  ;;  %v712_v57 = vmul.f32 %v636_v6, %v636_v6  ;;  %v687_v60 = vadd.f32 %v686_v55, %v636_v6 }
  0xe5   :  { %v727_v56 = vadd.f32 %v726_v59, %v712_v57 }
  0xe6   :  { %v589_v8 = vpop.f32.mrf.mxu2  ;;  %v493_v11 = vpop.f32.mrf.mxu0 }
  0xe7   :  { %v638_v9 = vpop.f32.mrf.mxu3  ;;  %v590_v10 = vadd.f32 %v589_v8, %v541_v7  ;;  %v542_v12 = vpop.f32.mrf.mxu1 }
  0xe8   :  { %v543_v14 = vadd.f32 %v542_v12, %v493_v11 }
  0xe9   :  { %v639_v13 = vadd.f32 %v638_v9, %v590_v10 }
  0xeb   :  { %666 = vst [vmem:[%s1477_s2 + $0x40] sm:$0xff] %v639_v13  ;;  %v713_v61 = vmul.f32 %v639_v13, %v639_v13  ;;  %v688_v62 = vadd.f32 %v687_v60, %v639_v13 }
  0xed   :  { %v728_v3 = vadd.f32 %v727_v56, %v713_v61 }
  0xee   :  { %v591_v15 = vpop.f32.mrf.mxu2  ;;  %v496_v18 = vpop.f32.mrf.mxu0 }
  0xef   :  { %v640_v16 = vpop.f32.mrf.mxu3  ;;  %v592_v17 = vadd.f32 %v591_v15, %v543_v14  ;;  %v545_v19 = vpop.f32.mrf.mxu1 }
  0xf0   :  { %v546_v21 = vadd.f32 %v545_v19, %v496_v18 }
  0xf1   :  { %v641_v20 = vadd.f32 %v640_v16, %v592_v17 }
  0xf3   :  { %667 = vst [vmem:[%s1477_s2 + $0x48] sm:$0xff] %v641_v20  ;;  %v714_v0 = vmul.f32 %v641_v20, %v641_v20  ;;  %v689_v4 = vadd.f32 %v688_v62, %v641_v20 }
  0xf5   :  { %v729_v63 = vadd.f32 %v728_v3, %v714_v0 }
  0xf6   :  { %v594_v22 = vpop.f32.mrf.mxu2  ;;  %v498_v25 = vpop.f32.mrf.mxu0 }
  0xf7   :  { %v643_v23 = vpop.f32.mrf.mxu3  ;;  %v595_v24 = vadd.f32 %v594_v22, %v546_v21  ;;  %v547_v26 = vpop.f32.mrf.mxu1 }
  0xf8   :  { %v548_v28 = vadd.f32 %v547_v26, %v498_v25 }
  0xf9   :  { %v644_v27 = vadd.f32 %v643_v23, %v595_v24 }
  0xfb   :  { %668 = vst [vmem:[%s1477_s2 + $0x50] sm:$0xff] %v644_v27  ;;  %v715_v49 = vmul.f32 %v644_v27, %v644_v27  ;;  %v690_v7 = vadd.f32 %v689_v4, %v644_v27 }
  0xfd   :  { %v730_v11 = vadd.f32 %v729_v63, %v715_v49 }
  0xfe   :  { %v596_v29 = vpop.f32.mrf.mxu2  ;;  %v501_v32 = vpop.f32.mrf.mxu0 }
  0xff   :  { %v645_v30 = vpop.f32.mrf.mxu3  ;;  %v597_v31 = vadd.f32 %v596_v29, %v548_v28  ;;  %v550_v33 = vpop.f32.mrf.mxu1 }
 0x100   :  { %v551_v35 = vadd.f32 %v550_v33, %v501_v32 }
 0x101   :  { %v646_v34 = vadd.f32 %v645_v30, %v597_v31 }
 0x103   :  { %669 = vst [vmem:[%s1477_s2 + $0x58] sm:$0xff] %v646_v34  ;;  %v716_v8 = vmul.f32 %v646_v34, %v646_v34  ;;  %v691_v12 = vadd.f32 %v690_v7, %v646_v34 }
 0x105   :  { %v731_v13 = vadd.f32 %v730_v11, %v716_v8 }
 0x106   :  { %v599_v37 = vpop.f32.mrf.mxu2  ;;  %v503_v40 = vpop.f32.mrf.mxu0 }
 0x107   :  { %v648_v38 = vpop.f32.mrf.mxu3  ;;  %v600_v39 = vadd.f32 %v599_v37, %v551_v35  ;;  %v552_v41 = vpop.f32.mrf.mxu1 }
 0x108   :  { %v553_v44 = vadd.f32 %v552_v41, %v503_v40  ;;  %v680_v40 = vld [vmem:[%s1478_s3] sm:$0x1] }
 0x109   :  { %v649_v42 = vadd.f32 %v648_v38, %v600_v39 }
 0x10b   :  { %670 = vst [vmem:[%s1477_s2 + $0x60] sm:$0xff] %v649_v42  ;;  %v717_v14 = vmul.f32 %v649_v42, %v649_v42  ;;  %v692_v15 = vadd.f32 %v691_v12, %v649_v42 }
 0x10d   :  { %v732_v19 = vadd.f32 %v731_v13, %v717_v14 }
 0x10e   :  { %v601_v45 = vpop.f32.mrf.mxu2  ;;  %v506_v52 = vpop.f32.mrf.mxu0 }
 0x10f   :  { %v650_v46 = vpop.f32.mrf.mxu3  ;;  %v602_v51 = vadd.f32 %v601_v45, %v553_v44  ;;  %v555_v53 = vpop.f32.mrf.mxu1 }
 0x110   :  { %v556_v47 = vadd.f32 %v555_v53, %v506_v52 }
 0x111   :  { %v651_v58 = vadd.f32 %v650_v46, %v602_v51 }
 0x113   :  { %671 = vst [vmem:[%s1477_s2 + $0x68] sm:$0xff] %v651_v58  ;;  %v718_v16 = vmul.f32 %v651_v58, %v651_v58  ;;  %v693_v20 = vadd.f32 %v692_v15, %v651_v58 }
 0x115   :  { %v733_v24 = vadd.f32 %v732_v19, %v718_v16 }
 0x116   :  { %v604_v1 = vpop.f32.mrf.mxu2  ;;  %v508_v6 = vpop.f32.mrf.mxu0 }
 0x117   :  { %v653_v2 = vpop.f32.mrf.mxu3  ;;  %v605_v5 = vadd.f32 %v604_v1, %v556_v47  ;;  %v557_v10 = vpop.f32.mrf.mxu1 }
 0x118   :  { %v558_v17 = vadd.f32 %v557_v10, %v508_v6 }
 0x119   :  { %v654_v9 = vadd.f32 %v653_v2, %v605_v5 }
 0x11b   :  { %672 = vst [vmem:[%s1477_s2 + $0x70] sm:$0xff] %v654_v9  ;;  %v719_v21 = vmul.f32 %v654_v9, %v654_v9  ;;  %v694_v25 = vadd.f32 %v693_v20, %v654_v9 }
 0x11d   :  { %v734_v27 = vadd.f32 %v733_v24, %v719_v21 }
 0x11e   :  { %v606_v18 = vpop.f32.mrf.mxu2 }
 0x11f   :  { %v607_v22 = vadd.f32 %v606_v18, %v558_v17  ;;  %v655_v23 = vpop.f32.mrf.mxu3 }
 0x121   :  { %v656_v26 = vadd.f32 %v655_v23, %v607_v22 }
 0x123   :  { %673 = vst [vmem:[%s1477_s2 + $0x78] sm:$0xff] %v656_v26  ;;  %v695_v28 = vadd.f32 %v694_v25, %v656_v26  ;;  %v720_v29 = vmul.f32 %v656_v26, %v656_v26 }
 0x125   :  { %v696_v30 = vrot.slane %v695_v28, 4  ;;  %v735_v31 = vadd.f32 %v734_v27, %v720_v29 }
 0x127   :  { %v697_v32 = vadd.f32 %v696_v30, %v695_v28  ;;  %v736_v33 = vrot.slane %v735_v31, 4 }
 0x129   :  { %v698_v34 = vrot.slane %v697_v32, 2  ;;  %v737_v35 = vadd.f32 %v736_v33, %v735_v31 }
 0x12b   :  { %v699_v36 = vadd.f32 %v698_v34, %v697_v32  ;;  %v738_v37 = vrot.slane %v737_v35, 2 }
 0x12d   :  { %v700_v38 = vrot.slane %v699_v36, 1  ;;  %v739_v39 = vadd.f32 %v738_v37, %v737_v35 }
 0x12f   :  { %v701_v41 = vadd.f32 %v700_v38, %v699_v36  ;;  %v740_v42 = vrot.slane %v739_v39, 1 }
 0x131   :  { %v702_v44 = vadd.f32 %v701_v41, %v680_v40  ;;  %v741_v45 = vadd.f32 %v740_v42, %v739_v39 }
 0x133   :  { %703 = vst [vmem:[%s1478_s3] sm:$0x1] %v702_v44  ;;  %v742_v46 = vadd.f32 %v741_v45, %v704_v43 }
 0x135   :  { %743 = vst [vmem:[%s1479_s4] sm:$0x1] %v742_v46 }

// kernel: dc_discriminator_forward.17
= control target key start
LH: loop header
LB: loop body
LE: loop exit
PB: predicated region body
PF: predicated region fallthrough
CT: control target
= control target key end

     0   :  { %s115_s0 = inlined_call_operand.vmem [shape: f32[32,128], index: 0, kind: input, shape index: {}]   ;;  %s116_s1 = inlined_call_operand.vmem [shape: f32[1,128], index: 1, kind: input, shape index: {}]   ;;  %s117_s2 = inlined_call_operand.vmem [shape: f32[1,128], index: 2, kind: input, shape index: {}]   ;;  %s118_s3 = inlined_call_operand.vmem [shape: bf16[32,128], index: 3, kind: output, shape index: {}]  }
   0x1   :  { %v14_v0 = vld [vmem:[%s115_s0] sm:$0xff]  ;;  %v15_v1 = vld [vmem:[%s115_s0 + $0x8] sm:$0xff]  ;;  %v16_v4 = vld [vmem:[%s115_s0 + $0x10] sm:$0xff] }
   0x2   :  { %v69_v2 = vld [vmem:[%s116_s1] ss:$0 sm:$0xff]  ;;  %v17_v5 = vld [vmem:[%s115_s0 + $0x18] sm:$0xff] }
   0x3   :  { %v70_v3 = vld [vmem:[%s117_s2] ss:$0 sm:$0xff]  ;;  %v22_v6 = vmul.f32 %v69_v2, %v14_v0  ;;  %v23_v7 = vmul.f32 %v69_v2, %v15_v1  ;;  %v24_v8 = vmul.f32 %v69_v2, %v16_v4  ;;  %v25_v9 = vmul.f32 %v69_v2, %v17_v5 }
   0x5   :  { %v30_v10 = vadd.f32 %v70_v3, %v22_v6  ;;  %v31_v11 = vadd.f32 %v70_v3, %v23_v7  ;;  %v32_v12 = vadd.f32 %v70_v3, %v24_v8  ;;  %v33_v13 = vadd.f32 %v70_v3, %v25_v9 }
   0x7   :  { %vm34_vm0 = vcmp.gt.f32.partialorder %v30_v10, 0.0  ;;  %vm35_vm1 = vcmp.gt.f32.partialorder %v31_v11, 0.0  ;;  %v38_v14 = vmul.f32 0.2, %v30_v10  ;;  %v39_v15 = vmul.f32 0.2, %v31_v11 }
   0x8   :  { %vm36_vm2 = vcmp.gt.f32.partialorder %v32_v12, 0.0  ;;  %vm37_vm3 = vcmp.gt.f32.partialorder %v33_v13, 0.0  ;;  %v40_v16 = vmul.f32 0.2, %v32_v12  ;;  %v41_v17 = vmul.f32 0.2, %v33_v13 }
   0x9   :  { %v42_v18 = vsel %vm34_vm0, %v30_v10, %v38_v14  ;;  %v43_v19 = vsel %vm35_vm1, %v31_v11, %v39_v15 }
   0xa   :  { %v61_v20 = vpack.c.bf16 %v43_v19, %v42_v18  ;;  %v44_v21 = vsel %vm36_vm2, %v32_v12, %v40_v16  ;;  %v45_v22 = vsel %vm37_vm3, %v33_v13, %v41_v17 }
   0xb   :  { %v66_v23 = vpack.c.bf16 %v45_v22, %v44_v21 }
   0xc   :  { %62 = vst [vmem:[%s118_s3] sm:$0xff] %v61_v20  }
   0xd   :  { %68 = vst [vmem:[%s118_s3 + $0x8] sm:$0xff] %v66_v23  }

// kernel: dc_discriminator_forward.16
= control target key start
LH: loop header
LB: loop body
LE: loop exit
PB: predicated region body
PF: predicated region fallthrough
CT: control target
= control target key end

     0   :  { %s1569_s1 = inlined_call_operand.vmem [shape: bf16[1024,128], index: 1, kind: input, shape index: {}]   ;;  %s1570_s0 = inlined_call_operand.vmem [shape: bf16[32,1024], index: 0, kind: input, shape index: {}]   ;;  %s1571_s3 = inlined_call_operand.vmem [shape: f32[1,128], index: 3, kind: output, shape index: {1}]   ;;  %s1572_s4 = inlined_call_operand.vmem [shape: f32[1,128], index: 4, kind: output, shape index: {2}]   ;;  %s1573_s2 = inlined_call_operand.vmem [shape: f32[32,128], index: 2, kind: output, shape index: {0}]  }
   0x1   :  { %v1167_v0 = vld [vmem:[%s1569_s1 + $0x38] sm:$0xff]  ;;  %v1166_v4 = vld [vmem:[%s1569_s1 + $0x30] sm:$0xff]  ;;  %v1165_v8 = vld [vmem:[%s1569_s1 + $0x28] sm:$0xff] }
   0x2   :  { %v1175_v1 = vld [vmem:[%s1569_s1 + $0x78] sm:$0xff]  ;;  %622 = vmatpush.bf16.msra.mxu0 %v1167_v0  ;;  %v1174_v5 = vld [vmem:[%s1569_s1 + $0x70] sm:$0xff]  ;;  %v1173_v9 = vld [vmem:[%s1569_s1 + $0x68] sm:$0xff] }
   0x3   :  { %v1183_v2 = vld [vmem:[%s1569_s1 + $0xb8] sm:$0xff]  ;;  %641 = vmatpush.bf16.msra.mxu1 %v1175_v1  ;;  %v1182_v6 = vld [vmem:[%s1569_s1 + $0xb0] sm:$0xff]  ;;  %v1181_v10 = vld [vmem:[%s1569_s1 + $0xa8] sm:$0xff] }
   0x4   :  { %v1191_v3 = vld [vmem:[%s1569_s1 + $0xf8] sm:$0xff]  ;;  %660 = vmatpush.bf16.msra.mxu2 %v1183_v2  ;;  %v1190_v7 = vld [vmem:[%s1569_s1 + $0xf0] sm:$0xff]  ;;  %v1189_v11 = vld [vmem:[%s1569_s1 + $0xe8] sm:$0xff] }
   0x5   :  { %679 = vmatpush.bf16.msra.mxu3 %v1191_v3  ;;  %v1164_v12 = vld [vmem:[%s1569_s1 + $0x20] sm:$0xff]  ;;  %v1163_v16 = vld [vmem:[%s1569_s1 + $0x18] sm:$0xff]  ;;  %v1162_v20 = vld [vmem:[%s1569_s1 + $0x10] sm:$0xff] }
   0x6   :  { %623 = vmatpush.bf16.msra.mxu0 %v1166_v4  ;;  %v1172_v13 = vld [vmem:[%s1569_s1 + $0x60] sm:$0xff]  ;;  %v1171_v17 = vld [vmem:[%s1569_s1 + $0x58] sm:$0xff]  ;;  %v1170_v21 = vld [vmem:[%s1569_s1 + $0x50] sm:$0xff] }
   0x7   :  { %642 = vmatpush.bf16.msra.mxu1 %v1174_v5  ;;  %v1180_v14 = vld [vmem:[%s1569_s1 + $0xa0] sm:$0xff]  ;;  %v1179_v18 = vld [vmem:[%s1569_s1 + $0x98] sm:$0xff]  ;;  %v1178_v22 = vld [vmem:[%s1569_s1 + $0x90] sm:$0xff] }
   0x8   :  { %661 = vmatpush.bf16.msra.mxu2 %v1182_v6  ;;  %v1188_v15 = vld [vmem:[%s1569_s1 + $0xe0] sm:$0xff]  ;;  %v1187_v19 = vld [vmem:[%s1569_s1 + $0xd8] sm:$0xff]  ;;  %v1186_v23 = vld [vmem:[%s1569_s1 + $0xd0] sm:$0xff] }
   0x9   :  { %680 = vmatpush.bf16.msra.mxu3 %v1190_v7  ;;  %v1161_v24 = vld [vmem:[%s1569_s1 + $0x8] sm:$0xff]  ;;  %v1160_v28 = vld [vmem:[%s1569_s1] sm:$0xff]  ;;  %v1215_v40 = vld [vmem:[%s1569_s1 + $0x1b8] sm:$0xff] }
   0xa   :  { %624 = vmatpush.bf16.msra.mxu0 %v1165_v8  ;;  %v1169_v25 = vld [vmem:[%s1569_s1 + $0x48] sm:$0xff]  ;;  %v1168_v29 = vld [vmem:[%s1569_s1 + $0x40] sm:$0xff]  ;;  %v1199_v41 = vld [vmem:[%s1569_s1 + $0x138] sm:$0xff] }
   0xb   :  { %643 = vmatpush.bf16.msra.mxu1 %v1173_v9  ;;  %v1177_v26 = vld [vmem:[%s1569_s1 + $0x88] sm:$0xff]  ;;  %v1176_v30 = vld [vmem:[%s1569_s1 + $0x80] sm:$0xff]  ;;  %v1207_v46 = vld [vmem:[%s1569_s1 + $0x178] sm:$0xff] }
   0xc   :  { %662 = vmatpush.bf16.msra.mxu2 %v1181_v10  ;;  %v1185_v27 = vld [vmem:[%s1569_s1 + $0xc8] sm:$0xff]  ;;  %v1184_v31 = vld [vmem:[%s1569_s1 + $0xc0] sm:$0xff]  ;;  %v1223_v47 = vld [vmem:[%s1569_s1 + $0x1f8] sm:$0xff] }
   0xd   :  { %681 = vmatpush.bf16.msra.mxu3 %v1189_v11  ;;  %v826_v32 = vld [vmem:[%s1570_s0] sm:$0xf]  ;;  %v1144_v34 = vld [vmem:[%s1570_s0 + $0x4] sm:$0xf]  ;;  %v834_v36 = vld [vmem:[%s1570_s0 + $0x8] sm:$0xf] }
   0xe   :  { %625 = vmatpush.bf16.msra.mxu0 %v1164_v12  ;;  %v1148_v33 = vld [vmem:[%s1570_s0 + $0x1c] sm:$0xf0]  ;;  %v828_v35 = vld [vmem:[%s1570_s0 + $0x20] sm:$0xf0]  ;;  %v1149_v37 = vld [vmem:[%s1570_s0 + $0x24] sm:$0xf0] }
   0xf   :  { %644 = vmatpush.bf16.msra.mxu1 %v1172_v13  ;;  %v1145_v38 = vld [vmem:[%s1570_s0 + $0xc] sm:$0xf]  ;;  %v827_v42 = vor.u32 %v1148_v33, %v826_v32  ;;  %v831_v43 = vor.u32 %v1144_v34, %v828_v35  ;;  %v835_v44 = vor.u32 %v1149_v37, %v834_v36  ;;  %v1214_v48 = vld [vmem:[%s1569_s1 + $0x1b0] sm:$0xff]  ;;  %v1212_v56 = vld [vmem:[%s1569_s1 + $0x1a0] sm:$0xff] }
  0x10   :  { %663 = vmatpush.bf16.msra.mxu2 %v1180_v14  ;;  %v836_v39 = vld [vmem:[%s1570_s0 + $0x28] sm:$0xf0]  ;;  %v1198_v49 = vld [vmem:[%s1569_s1 + $0x130] sm:$0xff]  ;;  %v1196_v57 = vld [vmem:[%s1569_s1 + $0x120] sm:$0xff] }
  0x11   :  { %682 = vmatpush.bf16.msra.mxu3 %v1188_v15  ;;  %v839_v45 = vor.u32 %v1145_v38, %v836_v39  ;;  %v1206_v50 = vld [vmem:[%s1569_s1 + $0x170] sm:$0xff]  ;;  %v1213_v52 = vld [vmem:[%s1569_s1 + $0x1a8] sm:$0xff]  ;;  %v1204_v58 = vld [vmem:[%s1569_s1 + $0x160] sm:$0xff] }
  0x12   :  { %626 = vmatpush.bf16.msra.mxu0 %v1163_v16  ;;  %v1222_v51 = vld [vmem:[%s1569_s1 + $0x1f0] sm:$0xff]  ;;  %v1197_v53 = vld [vmem:[%s1569_s1 + $0x128] sm:$0xff]  ;;  %v1220_v59 = vld [vmem:[%s1569_s1 + $0x1e0] sm:$0xff] }
  0x13   :  { %645 = vmatpush.bf16.msra.mxu1 %v1171_v17  ;;  %v1205_v54 = vld [vmem:[%s1569_s1 + $0x168] sm:$0xff]  ;;  %v858_v60 = vld [vmem:[%s1570_s0 + $0x40] sm:$0xf]  ;;  %v1152_v62 = vld [vmem:[%s1570_s0 + $0x44] sm:$0xf] }
  0x14   :  { %664 = vmatpush.bf16.msra.mxu2 %v1179_v18  ;;  %v1221_v55 = vld [vmem:[%s1569_s1 + $0x1e8] sm:$0xff]  ;;  %v1156_v61 = vld [vmem:[%s1570_s0 + $0x5c] sm:$0xf0]  ;;  %v860_v63 = vld [vmem:[%s1570_s0 + $0x60] sm:$0xf0] }
  0x15   :  { %683 = vmatpush.bf16.msra.mxu3 %v1187_v19  ;;  %v866_v0 = vld [vmem:[%s1570_s0 + $0x48] sm:$0xf]  ;;  %v1153_v2 = vld [vmem:[%s1570_s0 + $0x4c] sm:$0xf]  ;;  %v1211_v4 = vld [vmem:[%s1569_s1 + $0x198] sm:$0xff]  ;;  %v859_v6 = vor.u32 %v1156_v61, %v858_v60  ;;  %v863_v7 = vor.u32 %v1152_v62, %v860_v63 }
  0x16   :  { %627 = vmatpush.bf16.msra.mxu0 %v1162_v20  ;;  %v1157_v1 = vld [vmem:[%s1570_s0 + $0x64] sm:$0xf0]  ;;  %v868_v3 = vld [vmem:[%s1570_s0 + $0x68] sm:$0xf0]  ;;  %v1195_v5 = vld [vmem:[%s1569_s1 + $0x118] sm:$0xff] }
  0x17   :  { %646 = vmatpush.bf16.msra.mxu1 %v1170_v21  ;;  %v867_v8 = vor.u32 %v1157_v1, %v866_v0  ;;  %v871_v9 = vor.u32 %v1153_v2, %v868_v3  ;;  %v1203_v10 = vld [vmem:[%s1569_s1 + $0x158] sm:$0xff]  ;;  %v1210_v12 = vld [vmem:[%s1569_s1 + $0x190] sm:$0xff]  ;;  %v1209_v16 = vld [vmem:[%s1569_s1 + $0x188] sm:$0xff] }
  0x18   :  { %665 = vmatpush.bf16.msra.mxu2 %v1178_v22  ;;  %v1219_v11 = vld [vmem:[%s1569_s1 + $0x1d8] sm:$0xff]  ;;  %v1194_v13 = vld [vmem:[%s1569_s1 + $0x110] sm:$0xff]  ;;  %v1193_v17 = vld [vmem:[%s1569_s1 + $0x108] sm:$0xff] }
  0x19   :  { %684 = vmatpush.bf16.msra.mxu3 %v1186_v23  ;;  %v1202_v14 = vld [vmem:[%s1569_s1 + $0x150] sm:$0xff]  ;;  %v1201_v18 = vld [vmem:[%s1569_s1 + $0x148] sm:$0xff]  ;;  %v1208_v20 = vld [vmem:[%s1569_s1 + $0x180] sm:$0xff] }
  0x1a   :  { %628 = vmatpush.bf16.msra.mxu0 %v1161_v24  ;;  %v1218_v15 = vld [vmem:[%s1569_s1 + $0x1d0] sm:$0xff]  ;;  %v1217_v19 = vld [vmem:[%s1569_s1 + $0x1c8] sm:$0xff]  ;;  %v1192_v21 = vld [vmem:[%s1569_s1 + $0x100] sm:$0xff] }
  0x1b   :  { %647 = vmatpush.bf16.msra.mxu1 %v1169_v25  ;;  %v1200_v22 = vld [vmem:[%s1569_s1 + $0x140] sm:$0xff]  ;;  %v842_v24 = vld [vmem:[%s1570_s0 + $0x10] sm:$0xf]  ;;  %v1154_v38 = vld [vmem:[%s1570_s0 + $0x54] sm:$0xf] }
  0x1c   :  { %666 = vmatpush.bf16.msra.mxu2 %v1177_v26  ;;  %v1216_v23 = vld [vmem:[%s1569_s1 + $0x1c0] sm:$0xff]  ;;  %v1150_v25 = vld [vmem:[%s1570_s0 + $0x2c] sm:$0xf0]  ;;  %v1146_v26 = vld [vmem:[%s1570_s0 + $0x14] sm:$0xf] }
  0x1d   :  { %685 = vmatpush.bf16.msra.mxu3 %v1185_v27  ;;  %v844_v27 = vld [vmem:[%s1570_s0 + $0x30] sm:$0xf0]  ;;  %v843_v32 = vor.u32 %v1150_v25, %v842_v24  ;;  %v874_v36 = vld [vmem:[%s1570_s0 + $0x50] sm:$0xf] }
  0x1e   :  { %629 = vmatpush.bf16.msra.mxu0 %v1160_v28  ;;  %v850_v28 = vld [vmem:[%s1570_s0 + $0x18] sm:$0xf]  ;;  %v847_v33 = vor.u32 %v1146_v26, %v844_v27  ;;  %v1158_v37 = vld [vmem:[%s1570_s0 + $0x6c] sm:$0xf0]  ;;  %v876_v39 = vld [vmem:[%s1570_s0 + $0x70] sm:$0xf0] }
  0x1f   :  { %648 = vmatpush.bf16.msra.mxu1 %v1168_v29  ;;  %v1151_v29 = vld [vmem:[%s1570_s0 + $0x34] sm:$0xf0] }
  0x20   :  { %667 = vmatpush.bf16.msra.mxu2 %v1176_v30  ;;  %v1147_v30 = vld [vmem:[%s1570_s0 + $0x1c] sm:$0xf]  ;;  %v851_v34 = vor.u32 %v1151_v29, %v850_v28 }
  0x21   :  { %686 = vmatpush.bf16.msra.mxu3 %v1184_v31  ;;  %630 = vmatmul.bf16.vlgmr.msra.gmra.mxu0 %v827_v42  ;;  %v852_v31 = vld [vmem:[%s1570_s0 + $0x38] sm:$0xf0] }
  0x22   :  { %698 = vmatpush.bf16.msrb.mxu0 %v1199_v41  ;;  %649 = vmatmul.bf16.vlgmr.msra.gmra.mxu1 %v831_v43  ;;  %v855_v35 = vor.u32 %v1147_v30, %v852_v31  ;;  %v1159_v41 = vld [vmem:[%s1570_s0 + $0x74] sm:$0xf0]  ;;  %v1155_v42 = vld [vmem:[%s1570_s0 + $0x5c] sm:$0xf] }
  0x23   :  { %668 = vmatmul.bf16.vlgmr.msra.gmra.mxu2 %v835_v44  ;;  %717 = vmatpush.bf16.msrb.mxu1 %v1207_v46  ;;  %v884_v43 = vld [vmem:[%s1570_s0 + $0x78] sm:$0xf0]  ;;  %v875_v44 = vor.u32 %v1158_v37, %v874_v36 }
  0x24   :  { %736 = vmatpush.bf16.msrb.mxu2 %v1215_v40  ;;  %687 = vmatmul.bf16.vlgmr.msra.gmra.mxu3 %v839_v45  ;;  %v882_v40 = vld [vmem:[%s1570_s0 + $0x58] sm:$0xf]  ;;  %v879_v45 = vor.u32 %v1154_v38, %v876_v39 }
  0x25   :  { %755 = vmatpush.bf16.msrb.mxu3 %v1223_v47  ;;  %v883_v46 = vor.u32 %v1159_v41, %v882_v40  ;;  %v887_v47 = vor.u32 %v1155_v42, %v884_v43 }
  0x26   :  { %699 = vmatpush.bf16.msrb.mxu0 %v1198_v49 }
  0x27   :  { %718 = vmatpush.bf16.msrb.mxu1 %v1206_v50 }
  0x28   :  { %737 = vmatpush.bf16.msrb.mxu2 %v1214_v48 }
  0x29   :  { %756 = vmatpush.bf16.msrb.mxu3 %v1222_v51 }
  0x2a   :  { %700 = vmatpush.bf16.msrb.mxu0 %v1197_v53 }
  0x2b   :  { %719 = vmatpush.bf16.msrb.mxu1 %v1205_v54 }
  0x2c   :  { %738 = vmatpush.bf16.msrb.mxu2 %v1213_v52 }
  0x2d   :  { %757 = vmatpush.bf16.msrb.mxu3 %v1221_v55 }
  0x2e   :  { %701 = vmatpush.bf16.msrb.mxu0 %v1196_v57 }
  0x2f   :  { %720 = vmatpush.bf16.msrb.mxu1 %v1204_v58 }
  0x30   :  { %739 = vmatpush.bf16.msrb.mxu2 %v1212_v56 }
  0x31   :  { %758 = vmatpush.bf16.msrb.mxu3 %v1220_v59  ;;  %635 = vmatmul.bf16.gmra.mxu0 %v859_v6 }
  0x32   :  { %702 = vmatpush.bf16.msrb.mxu0 %v1195_v5  ;;  %654 = vmatmul.bf16.gmra.mxu1 %v863_v7 }
  0x33   :  { %673 = vmatmul.bf16.gmra.mxu2 %v867_v8  ;;  %721 = vmatpush.bf16.msrb.mxu1 %v1203_v10  ;;  %v1225_v8 = vmov 0.0  }
  0x34   :  { %740 = vmatpush.bf16.msrb.mxu2 %v1211_v4  ;;  %692 = vmatmul.bf16.gmra.mxu3 %v871_v9  ;;  %782 = vst [vmem:[%s1571_s3] sm:$0x1] %v1225_v8 }
  0x35   :  { %759 = vmatpush.bf16.msrb.mxu3 %v1219_v11  ;;  %783 = vst [vmem:[%s1572_s4] sm:$0x1] %v1225_v8 }
  0x36   :  { %703 = vmatpush.bf16.msrb.mxu0 %v1194_v13 }
  0x37   :  { %722 = vmatpush.bf16.msrb.mxu1 %v1202_v14 }
  0x38   :  { %741 = vmatpush.bf16.msrb.mxu2 %v1210_v12 }
  0x39   :  { %760 = vmatpush.bf16.msrb.mxu3 %v1218_v15 }
  0x3a   :  { %704 = vmatpush.bf16.msrb.mxu0 %v1193_v17 }
  0x3b   :  { %723 = vmatpush.bf16.msrb.mxu1 %v1201_v18 }
  0x3c   :  { %742 = vmatpush.bf16.msrb.mxu2 %v1209_v16 }
  0x3d   :  { %761 = vmatpush.bf16.msrb.mxu3 %v1217_v19 }
  0x3e   :  { %705 = vmatpush.bf16.msrb.mxu0 %v1192_v21 }
  0x3f   :  { %724 = vmatpush.bf16.msrb.mxu1 %v1200_v22 }
  0x40   :  { %743 = vmatpush.bf16.msrb.mxu2 %v1208_v20 }
  0x41   :  { %762 = vmatpush.bf16.msrb.mxu3 %v1216_v23  ;;  %706 = vmatmul.bf16.vlgmr.msrb.gmra.mxu0 %v843_v32 }
  0x42   :  { %725 = vmatmul.bf16.vlgmr.msrb.gmra.mxu1 %v847_v33 }
  0x43   :  { %744 = vmatmul.bf16.vlgmr.msrb.gmra.mxu2 %v851_v34 }
  0x44   :  { %763 = vmatmul.bf16.vlgmr.msrb.gmra.mxu3 %v855_v35 }
  0x51   :  { %711 = vmatmul.bf16.gmra.mxu0 %v875_v44 }
  0x52   :  { %730 = vmatmul.bf16.gmra.mxu1 %v879_v45 }
  0x53   :  { %749 = vmatmul.bf16.gmra.mxu2 %v883_v46 }
  0x54   :  { %768 = vmatmul.bf16.gmra.mxu3 %v887_v47 }
  0x9e   :  { %v631_v48 = vpop.f32.mrf.mxu0 }
  0x9f   :  { %v650_v49 = vpop.f32.mrf.mxu1 }
  0xa0   :  { %v651_v62 = vadd.f32 %v650_v49, %v631_v48 }
  0xa6   :  { %v669_v50 = vpop.f32.mrf.mxu2  ;;  %v633_v52 = vpop.f32.mrf.mxu0 }
  0xa7   :  { %v688_v51 = vpop.f32.mrf.mxu3  ;;  %v652_v53 = vpop.f32.mrf.mxu1  ;;  %v670_v63 = vadd.f32 %v669_v50, %v651_v62 }
  0xa8   :  { %v653_v5 = vadd.f32 %v652_v53, %v633_v52 }
  0xa9   :  { %v689_v2 = vadd.f32 %v688_v51, %v670_v63 }
  0xae   :  { %v671_v54 = vpop.f32.mrf.mxu2  ;;  %v636_v56 = vpop.f32.mrf.mxu0 }
  0xaf   :  { %v690_v55 = vpop.f32.mrf.mxu3  ;;  %v655_v57 = vpop.f32.mrf.mxu1  ;;  %v672_v7 = vadd.f32 %v671_v54, %v653_v5 }
  0xb0   :  { %v656_v16 = vadd.f32 %v655_v57, %v636_v56 }
  0xb1   :  { %v691_v11 = vadd.f32 %v690_v55, %v672_v7 }
  0xb6   :  { %v674_v58 = vpop.f32.mrf.mxu2  ;;  %v638_v60 = vpop.f32.mrf.mxu0 }
  0xb7   :  { %v693_v59 = vpop.f32.mrf.mxu3  ;;  %v657_v61 = vpop.f32.mrf.mxu1  ;;  %v675_v19 = vadd.f32 %v674_v58, %v656_v16 }
  0xb8   :  { %v658_v26 = vadd.f32 %v657_v61, %v638_v60 }
  0xb9   :  { %v694_v22 = vadd.f32 %v693_v59, %v675_v19 }
  0xbe   :  { %v676_v0 = vpop.f32.mrf.mxu2  ;;  %v707_v3 = vpop.f32.mrf.mxu0 }
  0xbf   :  { %v695_v1 = vpop.f32.mrf.mxu3  ;;  %v726_v4 = vpop.f32.mrf.mxu1  ;;  %v708_v6 = vadd.f32 %v707_v3, %v689_v2  ;;  %v677_v30 = vadd.f32 %v676_v0, %v658_v26  ;;  %v784_v0 = vld [vmem:[%s1571_s3] sm:$0x1] }
  0xc0   :  { %v796_v3 = vld [vmem:[%s1572_s4] sm:$0x1] }
  0xc1   :  { %v727_v9 = vadd.f32 %v726_v4, %v708_v6  ;;  %v696_v33 = vadd.f32 %v695_v1, %v677_v30 }
  0xc6   :  { %v745_v10 = vpop.f32.mrf.mxu2  ;;  %v709_v14 = vpop.f32.mrf.mxu0 }
  0xc7   :  { %v746_v12 = vadd.f32 %v745_v10, %v727_v9  ;;  %v764_v13 = vpop.f32.mrf.mxu3  ;;  %v728_v15 = vpop.f32.mrf.mxu1  ;;  %v710_v18 = vadd.f32 %v709_v14, %v691_v11 }
  0xc9   :  { %v765_v17 = vadd.f32 %v764_v13, %v746_v12  ;;  %v729_v20 = vadd.f32 %v728_v15, %v710_v18 }
  0xcb   :  { %774 = vst [vmem:[%s1573_s2] sm:$0xff] %v765_v17  ;;  %v797_v43 = vmul.f32 %v765_v17, %v765_v17 }
  0xce   :  { %v747_v21 = vpop.f32.mrf.mxu2  ;;  %v712_v25 = vpop.f32.mrf.mxu0 }
  0xcf   :  { %v748_v23 = vadd.f32 %v747_v21, %v729_v20  ;;  %v766_v24 = vpop.f32.mrf.mxu3  ;;  %v713_v28 = vadd.f32 %v712_v25, %v694_v22  ;;  %v731_v29 = vpop.f32.mrf.mxu1 }
  0xd1   :  { %v767_v27 = vadd.f32 %v766_v24, %v748_v23  ;;  %v732_v31 = vadd.f32 %v731_v29, %v713_v28 }
  0xd3   :  { %775 = vst [vmem:[%s1573_s2 + $0x8] sm:$0xff] %v767_v27  ;;  %v798_v40 = vmul.f32 %v767_v27, %v767_v27  ;;  %v785_v44 = vadd.f32 %v767_v27, %v765_v17 }
  0xd5   :  { %v801_v48 = vadd.f32 %v798_v40, %v797_v43 }
  0xd6   :  { %v750_v32 = vpop.f32.mrf.mxu2  ;;  %v714_v36 = vpop.f32.mrf.mxu0 }
  0xd7   :  { %v751_v34 = vadd.f32 %v750_v32, %v732_v31  ;;  %v769_v35 = vpop.f32.mrf.mxu3  ;;  %v715_v38 = vadd.f32 %v714_v36, %v696_v33  ;;  %v733_v39 = vpop.f32.mrf.mxu1 }
  0xd9   :  { %v770_v37 = vadd.f32 %v769_v35, %v751_v34  ;;  %v734_v41 = vadd.f32 %v733_v39, %v715_v38 }
  0xdb   :  { %776 = vst [vmem:[%s1573_s2 + $0x10] sm:$0xff] %v770_v37  ;;  %v799_v45 = vmul.f32 %v770_v37, %v770_v37  ;;  %v786_v49 = vadd.f32 %v785_v44, %v770_v37 }
  0xdd   :  { %v802_v51 = vadd.f32 %v801_v48, %v799_v45 }
  0xde   :  { %v752_v42 = vpop.f32.mrf.mxu2 }
  0xdf   :  { %v753_v46 = vadd.f32 %v752_v42, %v734_v41  ;;  %v771_v47 = vpop.f32.mrf.mxu3 }
  0xe1   :  { %v772_v50 = vadd.f32 %v771_v47, %v753_v46 }
  0xe3   :  { %777 = vst [vmem:[%s1573_s2 + $0x18] sm:$0xff] %v772_v50  ;;  %v787_v52 = vadd.f32 %v786_v49, %v772_v50  ;;  %v800_v53 = vmul.f32 %v772_v50, %v772_v50 }
  0xe5   :  { %v788_v54 = vrot.slane %v787_v52, 4  ;;  %v803_v55 = vadd.f32 %v802_v51, %v800_v53 }
  0xe7   :  { %v789_v56 = vadd.f32 %v788_v54, %v787_v52  ;;  %v804_v57 = vrot.slane %v803_v55, 4 }
  0xe9   :  { %v790_v58 = vrot.slane %v789_v56, 2  ;;  %v805_v59 = vadd.f32 %v804_v57, %v803_v55 }
  0xeb   :  { %v791_v60 = vadd.f32 %v790_v58, %v789_v56  ;;  %v806_v61 = vrot.slane %v805_v59, 2 }
  0xed   :  { %v792_v62 = vrot.slane %v791_v60, 1  ;;  %v807_v63 = vadd.f32 %v806_v61, %v805_v59 }
  0xef   :  { %v793_v1 = vadd.f32 %v792_v62, %v791_v60  ;;  %v808_v2 = vrot.slane %v807_v63, 1 }
  0xf1   :  { %v794_v4 = vadd.f32 %v793_v1, %v784_v0  ;;  %v809_v5 = vadd.f32 %v808_v2, %v807_v63 }
  0xf3   :  { %795 = vst [vmem:[%s1571_s3] sm:$0x1] %v794_v4  ;;  %v810_v6 = vadd.f32 %v809_v5, %v796_v3 }
  0xf5   :  { %811 = vst [vmem:[%s1572_s4] sm:$0x1] %v810_v6 }

</bundles_post_ra>
